<compile_context>
chip_gen: v7x
topology: tpu7x:2x2x1
jax: 0.10.0
libtpu: 0.0.40
codegen_flags: <defaults>
</compile_context>

<pallas_src>
import math
import functools

import jax
import jax.numpy as jnp
from jax.experimental import pallas as pl
from jax.experimental.pallas import tpu as pltpu


def _rot_heads(k, r, head_dim):
    """k with its head blocks rotated by r blocks along the lane axis.

    Equivalent to jnp.roll(k, r*head_dim, axis=1) but built from static slices
    + one lane concatenate only (robust in Mosaic and interpret mode)."""
    if r == 0:
        return k
    split = k.shape[1] - r * head_dim
    return jnp.concatenate([k[:, split:], k[:, :split]], axis=1)


def _mhsa_kernel(x_ref, wqkv_t_ref, sel_ref, sumtile_ref, mask_ref, wo_t_ref,
                 bo_ref, o_ref, *, heads, seq, head_dim, block_n):
    H, S, D, Bn = heads, seq, head_dim, block_n
    E = H * D
    M = Bn * S
    HH = H * H
    f32, bf16 = jnp.float32, jnp.bfloat16

    # ---- fused QKV projection: one bf16 MXU matmul, f32 accumulate ---------
    x = x_ref[...].reshape(M, E)                                    # bf16 in
    qkv = jnp.dot(x, wqkv_t_ref[...], preferred_element_type=f32)   # (M, 3E)
    q = qkv[:, :E]                       # 1/sqrt(D) already folded into Wq
    k = qkv[:, E:2 * E]
    v = qkv[:, 2 * E:]

    # ---- all H*H head-pair energies in ONE bf16 MXU matmul (K = H*E) -------
    # Rotating k's head blocks by r*D lanes pairs query head i with key head
    # (i - r) mod H; over r = 0..H-1 every (i, j) pair appears exactly once.
    qk_parts = []
    for r in range(H):
        k_r = _rot_heads(k, r, D)
        qk_parts.append((q * k_r).astype(bf16))
    qk_all = jnp.concatenate(qk_parts, axis=1)                      # (M, H*E)
    e_all = jnp.dot(qk_all, sel_ref[...], preferred_element_type=f32)  # (M, HH)

    # ---- softmax over the sequence axis, then sum over key heads -----------
    e3 = e_all.reshape(Bn, S, HH)
    emax = jnp.max(e3, axis=1, keepdims=True)
    p = jnp.exp(e3 - emax)
    p = p * (1.0 / jnp.sum(p, axis=1, keepdims=True))               # exact div
    a3 = p[:, :, :H]
    for r in range(1, H):
        a3 = a3 + p[:, :, r * H:(r + 1) * H]                        # A[n,s,i]

    # ---- Vsum (head-sum of v), tiled H times along lanes, on the MXU -------
    vtile = jnp.dot(v.astype(bf16), sumtile_ref[...],
                    preferred_element_type=f32)                     # (M, E)
    # Row s of the scrambled tensor only touches Wo.T row-block (s mod H):
    # keep only that lane block (mask precomputed on the host).
    vsel = vtile.reshape(Bn, S, E) * mask_ref[...]                  # (Bn, S, E)

    # ---- assemble the module's reshape-scrambled tensor ---------------------
    # out_scr[n, i*(S/H)+t, h*D+d] = A[n,i,t*H+h] * Vsum[n,t*H+h,d]
    # (grouped row-sum over h; masking above guarantees each column block is
    #  picked from exactly one of the H consecutive source rows).
    pieces = []
    for i in range(H):
        wi = a3[:, :, i:i + 1] * vsel                               # (Bn, S, E)
        pieces.append(wi.reshape(Bn, S // H, H, E).sum(axis=2))     # (Bn,S/H,E)
    out_scr = jnp.concatenate(pieces, axis=1)                       # (Bn, S, E)

    # ---- fc_out: single full-depth (M,E)@(E,E) bf16 matmul + bias ----------
    y = jnp.dot(out_scr.reshape(M, E).astype(bf16), wo_t_ref[...],
                preferred_element_type=f32)                         # (M, E)
    o_ref[...] = y.reshape(Bn, S, E) + bo_ref[...]                  # lane-dense


def _pick_block_n(n_batch, seq_len):
    """Batch elements per grid step: target ~512 matmul rows; never split the
    batch just to create extra grid steps (single-TC chips gain nothing)."""
    target_rows = 512
    bn = max(1, min(n_batch, max(1, target_rows // max(seq_len, 1))))
    while n_batch % bn:
        bn -= 1
    return bn


def _vmem_limit_bytes():
    """Generation-aware VMEM limit: ~3/4 of physical (headroom for the
    double-buffered x/out tiles + compiler scratch); safe fallback of 48 MiB."""
    try:
        cap = int(pltpu.get_tpu_info().vmem_capacity_bytes)
        return max(32 * 1024 * 1024, min(cap * 3 // 4, 112 * 1024 * 1024))
    except Exception:
        return 48 * 1024 * 1024


def multi_head_self_attention(x, params, heads, block_n=None):
    N, S, E = x.shape
    H = heads
    D = E // H
    assert D * H == E, "embed_size must be divisible by heads"
    # TODO(synk): support seq_length % heads != 0 (the fused scramble/fc_out
    # step assumes heads | seq_length).
    assert S % H == 0, "this kernel requires seq_length % heads == 0"
    assert E % 128 == 0, "embed_size should be a multiple of 128 lanes"
    f32, bf16 = jnp.float32, jnp.bfloat16

    if block_n is None:
        block_n = _pick_block_n(N, S)
    assert N % block_n == 0

    # bf16 at the boundary: halves HBM->VMEM DMA; compute is bf16 anyway.
    x_bf = x.astype(bf16)

    # Fold the 1/sqrt(D) softmax scale into Wq and fuse the three projections
    # into a single (E, 3E) weight -> one MXU matmul per block.
    wqkv_t = jnp.concatenate(
        [params["wq"] / math.sqrt(D), params["wk"], params["wv"]], axis=0
    ).T.astype(bf16)                                                 # (E, 3E)

    # Energy selector: sel[r*E + i*D + d, r*H + i] = 1 reduces each D block of
    # the concatenated (q * rot_r(k)) products -> all H*H energies in 1 matmul.
    rows = jnp.arange(H * E)
    col_of_row = (rows // E) * H + (rows % E) // D
    sel = (col_of_row[:, None] == jnp.arange(H * H)[None, :]).astype(bf16)

    # Head-sum + lane-tile selector: sumtile[e, e'] = 1 iff e % D == e' % D,
    # so v @ sumtile = Vsum replicated into every head block (full K = E).
    eidx = jnp.arange(E)
    sumtile = (eidx[:, None] % D == eidx[None, :] % D).astype(bf16)  # (E, E)

    # Lane-block mask: mask[s, h*D+d] = 1 iff h == s mod H.
    mask = (jnp.arange(E)[None, :] // D
            == (jnp.arange(S)[:, None] % H)).astype(f32)             # (S, E)

    wo_t = params["wo"].T.astype(bf16)                               # (E, E)
    bo2 = params["bo"].reshape(1, E).astype(f32)

    kernel = functools.partial(_mhsa_kernel, heads=H, seq=S, head_dim=D,
                               block_n=block_n)
    return pl.pallas_call(
        kernel,
        out_shape=jax.ShapeDtypeStruct((N, S, E), f32),
        grid=(N // block_n,),
        in_specs=[
            pl.BlockSpec((block_n, S, E), lambda n: (n, 0, 0)),   # x (bf16)
            pl.BlockSpec((E, 3 * E), lambda n: (0, 0)),           # [Wq/sqrt(D);Wk;Wv]^T
            pl.BlockSpec((H * E, H * H), lambda n: (0, 0)),       # energy selector
            pl.BlockSpec((E, E), lambda n: (0, 0)),               # head-sum/tile selector
            pl.BlockSpec((S, E), lambda n: (0, 0)),               # lane-block mask
            pl.BlockSpec((E, E), lambda n: (0, 0)),               # Wo^T
            pl.BlockSpec((1, E), lambda n: (0, 0)),               # bo
        ],
        out_specs=pl.BlockSpec((block_n, S, E), lambda n: (n, 0, 0)),
        compiler_params=pltpu.CompilerParams(
            dimension_semantics=("parallel",),
            vmem_limit_bytes=_vmem_limit_bytes(),
        ),
    )(x_bf, wqkv_t, sel, sumtile, mask, wo_t, bo2)


def reference(x, params, heads):
    """Direct jnp transcription of the PyTorch forward (for verification)."""
    N, S, E = x.shape
    D = E // heads
    q = x @ params["wq"].T
    k = x @ params["wk"].T
    v = x @ params["wv"].T
    qh = q.reshape(N, S, heads, D).transpose(0, 2, 1, 3)
    kh = k.reshape(N, S, heads, D).transpose(0, 2, 1, 3)
    vh = v.reshape(N, S, heads, D).transpose(0, 2, 1, 3)
    energy = jnp.einsum("nqhd,nkhd->nqkh", qh, kh)
    attn = jax.nn.softmax(energy / math.sqrt(D), axis=3)
    out = jnp.einsum("nqkh,nvhd->nqhd", attn, vh).reshape(N, S, E)
    return out @ params["wo"].T + params["bo"]


if __name__ == "__main__":
    N, S, heads_, E = 8, 16, 4, 128
    key = jax.random.PRNGKey(0)
    kx, kq, kk, kv, ko, kb = jax.random.split(key, 6)
    wscale = 1.0 / math.sqrt(E)
    params = dict(
        wq=jax.random.normal(kq, (E, E), jnp.float32) * wscale,
        wk=jax.random.normal(kk, (E, E), jnp.float32) * wscale,
        wv=jax.random.normal(kv, (E, E), jnp.float32) * wscale,
        wo=jax.random.normal(ko, (E, E), jnp.float32) * wscale,
        bo=jax.random.normal(kb, (E,), jnp.float32) * 0.01,
    )
    x = jax.random.normal(kx, (N, S, E), jnp.float32)

    y = multi_head_self_attention(x, params, heads_)
    y = jax.block_until_ready(y)

    with jax.default_matmul_precision("highest"):
        y_ref = reference(x, params, heads_)
    # bf16 MXU operands through four chained matmuls (f32 accumulation) =>
    # expect ~1e-2..3e-2 worst-case deviation from the f32 "highest" reference;
    # a real semantic bug would be O(1).
    max_err = float(jnp.max(jnp.abs(y - y_ref)))
    if not (max_err < 6e-2):
        raise AssertionError(f"Pallas output mismatch vs reference, max abs err={max_err}")
    print("KERNEL_OK")
</pallas_src>

<mosaic_0001>
module attributes {stable_mosaic.version = 11 : i64} {
  func.func @_mhsa_kernel(%arg0: i32, %arg1: memref<8x16x128xbf16, #tpu.memory_space<vmem>>, %arg2: memref<128x384xbf16, #tpu.memory_space<vmem>>, %arg3: memref<512x16xbf16, #tpu.memory_space<vmem>>, %arg4: memref<128x128xbf16, #tpu.memory_space<vmem>>, %arg5: memref<16x128xf32, #tpu.memory_space<vmem>>, %arg6: memref<128x128xbf16, #tpu.memory_space<vmem>>, %arg7: memref<1x128xf32, #tpu.memory_space<vmem>>, %arg8: memref<8x16x128xf32, #tpu.memory_space<vmem>>) attributes {dimension_semantics = [#tpu.dimension_semantics<parallel>], iteration_bounds = array<i64: 1>, scalar_prefetch = 0 : i64, scratch_operands = 0 : i64, tpu.core_type = #tpu.core_type<tc>, window_params = [{transform_indices = @transform_0, window_bounds = array<i64: 8, 16, 128>}, {pipeline_mode = #tpu.pipeline_mode<synchronous>, transform_indices = @transform_1, window_bounds = array<i64: 128, 384>}, {pipeline_mode = #tpu.pipeline_mode<synchronous>, transform_indices = @transform_2, window_bounds = array<i64: 512, 16>}, {pipeline_mode = #tpu.pipeline_mode<synchronous>, transform_indices = @transform_3, window_bounds = array<i64: 128, 128>}, {pipeline_mode = #tpu.pipeline_mode<synchronous>, transform_indices = @transform_4, window_bounds = array<i64: 16, 128>}, {pipeline_mode = #tpu.pipeline_mode<synchronous>, transform_indices = @transform_5, window_bounds = array<i64: 128, 128>}, {pipeline_mode = #tpu.pipeline_mode<synchronous>, transform_indices = @transform_6, window_bounds = array<i64: 1, 128>}, {transform_indices = @transform_7, window_bounds = array<i64: 8, 16, 128>}]} {
    %c0 = arith.constant 0 : index
    %c0_0 = arith.constant 0 : index
    %c0_1 = arith.constant 0 : index
    %0 = vector.load %arg1[%c0, %c0_0, %c0_1] : memref<8x16x128xbf16, #tpu.memory_space<vmem>>, vector<8x16x128xbf16>
    %1 = vector.shape_cast %0 : vector<8x16x128xbf16> to vector<128x128xbf16>
    %c0_2 = arith.constant 0 : index
    %c0_3 = arith.constant 0 : index
    %2 = vector.load %arg2[%c0_2, %c0_3] : memref<128x384xbf16, #tpu.memory_space<vmem>>, vector<128x384xbf16>
    %cst = arith.constant dense<0.000000e+00> : vector<128x384xf32>
    %3 = tpu.matmul %1, %2, %cst {dimension_numbers = #tpu.dot_dimension_numbers<[1], [0], [0], [1], [0, 0, 1, 1], [], []>} : vector<128x128xbf16>, vector<128x384xbf16>, vector<128x384xf32> -> vector<128x384xf32>
    %4 = vector.extract_strided_slice %3 {offsets = [0, 0], sizes = [128, 128], strides = [1, 1]} : vector<128x384xf32> to vector<128x128xf32>
    %5 = vector.extract_strided_slice %3 {offsets = [0, 128], sizes = [128, 128], strides = [1, 1]} : vector<128x384xf32> to vector<128x128xf32>
    %6 = vector.extract_strided_slice %3 {offsets = [0, 256], sizes = [128, 128], strides = [1, 1]} : vector<128x384xf32> to vector<128x128xf32>
    %7 = arith.mulf %4, %5 : vector<128x128xf32>
    %8 = arith.truncf %7 : vector<128x128xf32> to vector<128x128xbf16>
    %9 = vector.extract_strided_slice %5 {offsets = [0, 96], sizes = [128, 32], strides = [1, 1]} : vector<128x128xf32> to vector<128x32xf32>
    %10 = vector.extract_strided_slice %5 {offsets = [0, 0], sizes = [128, 96], strides = [1, 1]} : vector<128x128xf32> to vector<128x96xf32>
    %11 = tpu.concatenate %9, %10 in 1 : vector<128x32xf32>, vector<128x96xf32> -> vector<128x128xf32>
    %12 = arith.mulf %4, %11 : vector<128x128xf32>
    %13 = arith.truncf %12 : vector<128x128xf32> to vector<128x128xbf16>
    %14 = vector.extract_strided_slice %5 {offsets = [0, 64], sizes = [128, 64], strides = [1, 1]} : vector<128x128xf32> to vector<128x64xf32>
    %15 = vector.extract_strided_slice %5 {offsets = [0, 0], sizes = [128, 64], strides = [1, 1]} : vector<128x128xf32> to vector<128x64xf32>
    %16 = tpu.concatenate %14, %15 in 1 : vector<128x64xf32>, vector<128x64xf32> -> vector<128x128xf32>
    %17 = arith.mulf %4, %16 : vector<128x128xf32>
    %18 = arith.truncf %17 : vector<128x128xf32> to vector<128x128xbf16>
    %19 = vector.extract_strided_slice %5 {offsets = [0, 32], sizes = [128, 96], strides = [1, 1]} : vector<128x128xf32> to vector<128x96xf32>
    %20 = vector.extract_strided_slice %5 {offsets = [0, 0], sizes = [128, 32], strides = [1, 1]} : vector<128x128xf32> to vector<128x32xf32>
    %21 = tpu.concatenate %19, %20 in 1 : vector<128x96xf32>, vector<128x32xf32> -> vector<128x128xf32>
    %22 = arith.mulf %4, %21 : vector<128x128xf32>
    %23 = arith.truncf %22 : vector<128x128xf32> to vector<128x128xbf16>
    %24 = tpu.concatenate %8, %13, %18, %23 in 1 : vector<128x128xbf16>, vector<128x128xbf16>, vector<128x128xbf16>, vector<128x128xbf16> -> vector<128x512xbf16>
    %c0_4 = arith.constant 0 : index
    %c0_5 = arith.constant 0 : index
    %25 = vector.load %arg3[%c0_4, %c0_5] : memref<512x16xbf16, #tpu.memory_space<vmem>>, vector<512x16xbf16>
    %cst_6 = arith.constant dense<0.000000e+00> : vector<128x16xf32>
    %26 = tpu.matmul %24, %25, %cst_6 {dimension_numbers = #tpu.dot_dimension_numbers<[1], [0], [0], [1], [0, 0, 1, 1], [], []>} : vector<128x512xbf16>, vector<512x16xbf16>, vector<128x16xf32> -> vector<128x16xf32>
    %27 = vector.shape_cast %26 : vector<128x16xf32> to vector<8x16x16xf32>
    %cst_7 = arith.constant dense<0xFF800000> : vector<8x16xf32>
    %28 = vector.multi_reduction <maximumf>, %27, %cst_7 [1] : vector<8x16x16xf32> to vector<8x16xf32>
    %29 = vector.shape_cast %28 : vector<8x16xf32> to vector<8x1x16xf32>
    %30 = vector.broadcast %29 : vector<8x1x16xf32> to vector<8x16x16xf32>
    %31 = arith.subf %27, %30 : vector<8x16x16xf32>
    %32 = math.exp %31 : vector<8x16x16xf32>
    %cst_8 = arith.constant dense<0.000000e+00> : vector<8x16xf32>
    %33 = vector.multi_reduction <add>, %32, %cst_8 [1] : vector<8x16x16xf32> to vector<8x16xf32>
    %34 = vector.shape_cast %33 : vector<8x16xf32> to vector<8x1x16xf32>
    %cst_9 = arith.constant 1.000000e+00 : f32
    %35 = vector.broadcast %cst_9 : f32 to vector<8x1x16xf32>
    %36 = arith.divf %35, %34 : vector<8x1x16xf32>
    %37 = vector.broadcast %36 : vector<8x1x16xf32> to vector<8x16x16xf32>
    %38 = arith.mulf %32, %37 : vector<8x16x16xf32>
    %39 = vector.extract_strided_slice %38 {offsets = [0, 0, 0], sizes = [8, 16, 4], strides = [1, 1, 1]} : vector<8x16x16xf32> to vector<8x16x4xf32>
    %40 = vector.extract_strided_slice %38 {offsets = [0, 0, 4], sizes = [8, 16, 4], strides = [1, 1, 1]} : vector<8x16x16xf32> to vector<8x16x4xf32>
    %41 = arith.addf %39, %40 : vector<8x16x4xf32>
    %42 = vector.extract_strided_slice %38 {offsets = [0, 0, 8], sizes = [8, 16, 4], strides = [1, 1, 1]} : vector<8x16x16xf32> to vector<8x16x4xf32>
    %43 = arith.addf %41, %42 : vector<8x16x4xf32>
    %44 = vector.extract_strided_slice %38 {offsets = [0, 0, 12], sizes = [8, 16, 4], strides = [1, 1, 1]} : vector<8x16x16xf32> to vector<8x16x4xf32>
    %45 = arith.addf %43, %44 : vector<8x16x4xf32>
    %46 = arith.truncf %6 : vector<128x128xf32> to vector<128x128xbf16>
    %c0_10 = arith.constant 0 : index
    %c0_11 = arith.constant 0 : index
    %47 = vector.load %arg4[%c0_10, %c0_11] : memref<128x128xbf16, #tpu.memory_space<vmem>>, vector<128x128xbf16>
    %cst_12 = arith.constant dense<0.000000e+00> : vector<128x128xf32>
    %48 = tpu.matmul %46, %47, %cst_12 {dimension_numbers = #tpu.dot_dimension_numbers<[1], [0], [0], [1], [0, 0, 1, 1], [], []>} : vector<128x128xbf16>, vector<128x128xbf16>, vector<128x128xf32> -> vector<128x128xf32>
    %49 = vector.shape_cast %48 : vector<128x128xf32> to vector<8x16x128xf32>
    %c0_13 = arith.constant 0 : index
    %c0_14 = arith.constant 0 : index
    %50 = vector.load %arg5[%c0_13, %c0_14] : memref<16x128xf32, #tpu.memory_space<vmem>>, vector<16x128xf32>
    %51 = vector.shape_cast %50 : vector<16x128xf32> to vector<1x16x128xf32>
    %52 = vector.broadcast %51 : vector<1x16x128xf32> to vector<8x16x128xf32>
    %53 = arith.mulf %49, %52 : vector<8x16x128xf32>
    %54 = vector.extract_strided_slice %45 {offsets = [0, 0, 0], sizes = [8, 16, 1], strides = [1, 1, 1]} : vector<8x16x4xf32> to vector<8x16x1xf32>
    %55 = vector.broadcast %54 : vector<8x16x1xf32> to vector<8x16x128xf32>
    %56 = arith.mulf %55, %53 : vector<8x16x128xf32>
    %57 = vector.shape_cast %56 : vector<8x16x128xf32> to vector<8x4x4x128xf32>
    %cst_15 = arith.constant dense<0.000000e+00> : vector<8x4x128xf32>
    %58 = vector.multi_reduction <add>, %57, %cst_15 [2] : vector<8x4x4x128xf32> to vector<8x4x128xf32>
    %59 = vector.extract_strided_slice %45 {offsets = [0, 0, 1], sizes = [8, 16, 1], strides = [1, 1, 1]} : vector<8x16x4xf32> to vector<8x16x1xf32>
    %60 = vector.broadcast %59 : vector<8x16x1xf32> to vector<8x16x128xf32>
    %61 = arith.mulf %60, %53 : vector<8x16x128xf32>
    %62 = vector.shape_cast %61 : vector<8x16x128xf32> to vector<8x4x4x128xf32>
    %cst_16 = arith.constant dense<0.000000e+00> : vector<8x4x128xf32>
    %63 = vector.multi_reduction <add>, %62, %cst_16 [2] : vector<8x4x4x128xf32> to vector<8x4x128xf32>
    %64 = vector.extract_strided_slice %45 {offsets = [0, 0, 2], sizes = [8, 16, 1], strides = [1, 1, 1]} : vector<8x16x4xf32> to vector<8x16x1xf32>
    %65 = vector.broadcast %64 : vector<8x16x1xf32> to vector<8x16x128xf32>
    %66 = arith.mulf %65, %53 : vector<8x16x128xf32>
    %67 = vector.shape_cast %66 : vector<8x16x128xf32> to vector<8x4x4x128xf32>
    %cst_17 = arith.constant dense<0.000000e+00> : vector<8x4x128xf32>
    %68 = vector.multi_reduction <add>, %67, %cst_17 [2] : vector<8x4x4x128xf32> to vector<8x4x128xf32>
    %69 = vector.extract_strided_slice %45 {offsets = [0, 0, 3], sizes = [8, 16, 1], strides = [1, 1, 1]} : vector<8x16x4xf32> to vector<8x16x1xf32>
    %70 = vector.broadcast %69 : vector<8x16x1xf32> to vector<8x16x128xf32>
    %71 = arith.mulf %70, %53 : vector<8x16x128xf32>
    %72 = vector.shape_cast %71 : vector<8x16x128xf32> to vector<8x4x4x128xf32>
    %cst_18 = arith.constant dense<0.000000e+00> : vector<8x4x128xf32>
    %73 = vector.multi_reduction <add>, %72, %cst_18 [2] : vector<8x4x4x128xf32> to vector<8x4x128xf32>
    %74 = tpu.concatenate %58, %63, %68, %73 in 1 : vector<8x4x128xf32>, vector<8x4x128xf32>, vector<8x4x128xf32>, vector<8x4x128xf32> -> vector<8x16x128xf32>
    %75 = vector.shape_cast %74 : vector<8x16x128xf32> to vector<128x128xf32>
    %76 = arith.truncf %75 : vector<128x128xf32> to vector<128x128xbf16>
    %c0_19 = arith.constant 0 : index
    %c0_20 = arith.constant 0 : index
    %77 = vector.load %arg6[%c0_19, %c0_20] : memref<128x128xbf16, #tpu.memory_space<vmem>>, vector<128x128xbf16>
    %cst_21 = arith.constant dense<0.000000e+00> : vector<128x128xf32>
    %78 = tpu.matmul %76, %77, %cst_21 {dimension_numbers = #tpu.dot_dimension_numbers<[1], [0], [0], [1], [0, 0, 1, 1], [], []>} : vector<128x128xbf16>, vector<128x128xbf16>, vector<128x128xf32> -> vector<128x128xf32>
    %79 = vector.shape_cast %78 : vector<128x128xf32> to vector<8x16x128xf32>
    %c0_22 = arith.constant 0 : index
    %c0_23 = arith.constant 0 : index
    %80 = vector.load %arg7[%c0_22, %c0_23] : memref<1x128xf32, #tpu.memory_space<vmem>>, vector<1x128xf32>
    %81 = vector.shape_cast %80 : vector<1x128xf32> to vector<1x1x128xf32>
    %82 = vector.broadcast %81 : vector<1x1x128xf32> to vector<8x16x128xf32>
    %83 = arith.addf %79, %82 : vector<8x16x128xf32>
    %c0_24 = arith.constant 0 : index
    %c0_25 = arith.constant 0 : index
    %c0_26 = arith.constant 0 : index
    %84 = vector.load %arg8[%c0_24, %c0_25, %c0_26] : memref<8x16x128xf32, #tpu.memory_space<vmem>>, vector<8x16x128xf32>
    tpu.vector_store %arg8[%c0_24, %c0_25, %c0_26], %83 {strides = array<i32>} : memref<8x16x128xf32, #tpu.memory_space<vmem>>, vector<8x16x128xf32>,
    return
  }
  func.func @transform_0(%arg0: i32) -> (i32, i32, i32) {
    %c0_i32 = arith.constant 0 : i32
    %c0_i32_0 = arith.constant 0 : i32
    %c0_i32_1 = arith.constant 0 : i32
    return %arg0, %c0_i32, %c0_i32_0 : i32, i32, i32
  }
  func.func @transform_1(%arg0: i32) -> (i32, i32) {
    %c0_i32 = arith.constant 0 : i32
    %c0_i32_0 = arith.constant 0 : i32
    %c0_i32_1 = arith.constant 0 : i32
    return %c0_i32, %c0_i32_0 : i32, i32
  }
  func.func @transform_2(%arg0: i32) -> (i32, i32) {
    %c0_i32 = arith.constant 0 : i32
    %c0_i32_0 = arith.constant 0 : i32
    %c0_i32_1 = arith.constant 0 : i32
    return %c0_i32, %c0_i32_0 : i32, i32
  }
  func.func @transform_3(%arg0: i32) -> (i32, i32) {
    %c0_i32 = arith.constant 0 : i32
    %c0_i32_0 = arith.constant 0 : i32
    %c0_i32_1 = arith.constant 0 : i32
    return %c0_i32, %c0_i32_0 : i32, i32
  }
  func.func @transform_4(%arg0: i32) -> (i32, i32) {
    %c0_i32 = arith.constant 0 : i32
    %c0_i32_0 = arith.constant 0 : i32
    %c0_i32_1 = arith.constant 0 : i32
    return %c0_i32, %c0_i32_0 : i32, i32
  }
  func.func @transform_5(%arg0: i32) -> (i32, i32) {
    %c0_i32 = arith.constant 0 : i32
    %c0_i32_0 = arith.constant 0 : i32
    %c0_i32_1 = arith.constant 0 : i32
    return %c0_i32, %c0_i32_0 : i32, i32
  }
  func.func @transform_6(%arg0: i32) -> (i32, i32) {
    %c0_i32 = arith.constant 0 : i32
    %c0_i32_0 = arith.constant 0 : i32
    %c0_i32_1 = arith.constant 0 : i32
    return %c0_i32, %c0_i32_0 : i32, i32
  }
  func.func @transform_7(%arg0: i32) -> (i32, i32, i32) {
    %c0_i32 = arith.constant 0 : i32
    %c0_i32_0 = arith.constant 0 : i32
    %c0_i32_1 = arith.constant 0 : i32
    return %arg0, %c0_i32, %c0_i32_0 : i32, i32, i32
  }
}

</mosaic_0001>

<bundles_post_ra>
// kernel: tpu_custom_call.1
= control target key start
LH: loop header
LB: loop body
LE: loop exit
PB: predicated region body
PF: predicated region fallthrough
CT: control target
= control target key end

     0   :  { %12 = vsyncpa [#allocation3], 0  ;;  %s6069_s0 = inlined_call_operand.vmem [shape: bf16[8,16,128], index: 0, kind: input, shape index: {}]   ;;  %s6070_s1 = inlined_call_operand.vmem [shape: bf16[128,384], index: 1, kind: input, shape index: {}]   ;;  %s6071_s2 = inlined_call_operand.vmem [shape: bf16[512,16], index: 2, kind: input, shape index: {}]   ;;  %s6072_s3 = inlined_call_operand.hbm [shape: bf16[128,128], index: 3, kind: input, shape index: {}]   ;;  %s6073_s4 = inlined_call_operand.vmem [shape: f32[16,128], index: 4, kind: input, shape index: {}]   ;;  %s6074_s5 = inlined_call_operand.hbm [shape: bf16[128,128], index: 5, kind: input, shape index: {}]   ;;  %s6075_s6 = inlined_call_operand.vmem [shape: f32[1,128], index: 6, kind: input, shape index: {}]   ;;  %s6076_s7 = inlined_call_operand.hbm [shape: f32[8,16,128], index: 7, kind: output, shape index: {}]  }
   0x1   :  { %13 = vsyncpa [#allocation6], 0 }
   0x2   :  { %14 = vsyncpa [#allocation4], 0  ;;  %s4402_s24 = smov [#allocation2]   ;;  %s4330_s28 = scalar_lea.hbm %s6072_s3, 1024 }
   0x3   :  { %s26_s25 = sshll.u32 %s4402_s24, 4  ;;  %p4331_p0 = scmp.ne.s32.totalorder %s6072_s3, %s4330_s28  ;;  %s27_s25 = int_to_ptr.vmem [resolvable:$true] %s26_s25 }
   0x4   :  { %p4334_p1 = scmp.lt.u32.totalorder %s4330_s28, %s6072_s3 }
   0x6   :  { %p4336_p2 = pnand %p4334_p1, %p4331_p0 }
   0x8   :  { %4339 = shalt.err (!%p4336_p2)
}
   0x9   :  { %s4340_s10 = scalar_lea.vmem %s27_s25, 1024  ;;  %p4345_p4 = scmp.lt.s32.totalorder %s27_s25, %s27_s25 }
   0xa   :  { %p4341_p3 = scmp.ne.s32.totalorder %s27_s25, %s4340_s10  ;;  %p4346_p5 = scmp.lt.s32.totalorder %s4340_s10, %s4340_s10 }
   0xc   :  { %p4347_p6 = por %p4346_p5, %p4345_p4 }
   0xe   :  { %p4348_p7 = pnand %p4347_p6, %p4341_p3 }
  0x10   :  { %4351 = shalt.err (!%p4348_p7)
}
  0x11   :  { %s4403_s11 = smov 64   ;;  %s4404_s12 = smov 4  }
  0x12   :  { %32 = dma.hbm_to_vmem [thread:$0]  %s6072_s3, 1024, %s27_s25, [#allocation3], %s4403_s11, %s4403_s11, %s4404_s12  }
  0x13   :  { %s4405_s15 = smov [#allocation5]   ;;  %s4352_s19 = scalar_lea.hbm %s6074_s5, 1024 }
  0x14   :  { %s40_s16 = sshll.u32 %s4405_s15, 4  ;;  %p4353_p8 = scmp.ne.s32.totalorder %s6074_s5, %s4352_s19  ;;  %s41_s16 = int_to_ptr.vmem [resolvable:$true] %s40_s16 }
  0x15   :  { %p4356_p9 = scmp.lt.u32.totalorder %s4352_s19, %s6074_s5 }
  0x17   :  { %p4358_p10 = pnand %p4356_p9, %p4353_p8 }
  0x19   :  { %4361 = shalt.err (!%p4358_p10)
}
  0x1a   :  { %s4362_s24 = scalar_lea.vmem %s41_s16, 1024  ;;  %p4367_p12 = scmp.lt.s32.totalorder %s41_s16, %s41_s16 }
  0x1b   :  { %p4363_p11 = scmp.ne.s32.totalorder %s41_s16, %s4362_s24  ;;  %p4368_p13 = scmp.lt.s32.totalorder %s4362_s24, %s4362_s24 }
  0x1d   :  { %p4369_p0 = por %p4368_p13, %p4367_p12 }
  0x1f   :  { %p4370_p1 = pnand %p4369_p0, %p4363_p11 }
  0x21   :  { %4373 = shalt.err (!%p4370_p1)
}
  0x22   :  { %46 = dma.hbm_to_vmem [thread:$0]  %s6074_s5, 1024, %s41_s16, [#allocation6], %s4403_s11, %s4403_s11, %s4404_s12  }
  0x23   :  { %4396 = dma.done.wait [#allocation3], 1024  }
  0x24   :  { %4397 = vsyncadd [#allocation3], 4294966272 }
  0x25   :  { %4398 = dma.done.wait [#allocation6], 1024  }
  0x26   :  { %4399 = vsyncadd [#allocation6], 4294966272  ;;  %v6082_v0 = vmov 0   ;;  %v4194_v1 = vld [vmem:[%s6070_s1 + $0x4] ss:$12 sps:$4 sm:$0xff]   ;;  %v4219_v18 = vld [vmem:[%s6069_s0 + $0x8] sm:$0xff]  }
  0x27   :  { %312 = vmatprep.mubr.bf16.mxu0 %v6082_v0  ;;  %4130 = vset.pattern.permute.xlu0 %v6082_v0  ;;  %v4196_v2 = vld [vmem:[%s6070_s1] ss:$12 sps:$4 sm:$0xff]   ;;  %v4197_v3 = vld [vmem:[%s6070_s1 + $0x1c] ss:$12 sps:$4 sm:$0xff]   ;;  %v4199_v4 = vld [vmem:[%s6070_s1 + $0x18] ss:$12 sps:$4 sm:$0xff]  }
  0x28   :  { %280 = vmatprep.subr.bf16.mxu0 %v4194_v1  ;;  %v4200_v5 = vld [vmem:[%s6070_s1 + $0x34] ss:$12 sps:$4 sm:$0xff]   ;;  %v4202_v6 = vld [vmem:[%s6070_s1 + $0x30] ss:$12 sps:$4 sm:$0xff]   ;;  %v4203_v7 = vld [vmem:[%s6070_s1 + $0x4c] ss:$12 sps:$4 sm:$0xff]  }
  0x29   :  { %281 = vmatpush1.bf16.msra.mxu0 %v4196_v2  ;;  %v4205_v8 = vld [vmem:[%s6070_s1 + $0x48] ss:$12 sps:$4 sm:$0xff]   ;;  %v4218_v9 = vld [vmem:[%s6069_s0] sm:$0xff]   ;;  %v4214_v15 = vld [vmem:[%s6070_s1 + $0x90] ss:$12 sps:$4 sm:$0xff]   ;;  %s4407_s29 = smov 96  }
  0x2a   :  { %282 = vmatprep.subr.bf16.mxu0 %v4197_v3  ;;  %v4206_v10 = vld [vmem:[%s6070_s1 + $0x64] ss:$12 sps:$4 sm:$0xff]   ;;  %4018 = vmatprep.mubr.bf16.mxu1 %v4218_v9  ;;  %v4208_v11 = vld [vmem:[%s6070_s1 + $0x60] ss:$12 sps:$4 sm:$0xff]   ;;  %v4209_v12 = vld [vmem:[%s6070_s1 + $0x7c] ss:$12 sps:$4 sm:$0xff]  }
  0x2b   :  { %v4211_v13 = vld [vmem:[%s6070_s1 + $0x78] ss:$12 sps:$4 sm:$0xff]   ;;  %v4212_v14 = vld [vmem:[%s6070_s1 + $0x94] ss:$12 sps:$4 sm:$0xff]   ;;  %v4568_v22 = vld [vmem:[%s6069_s0 + $0x28] sm:$0xff]   ;;  %s4408_s30 = smov 32  }
  0x2c   :  { %v4215_v16 = vld [vmem:[%s6070_s1 + $0xac] ss:$12 sps:$4 sm:$0xff]   ;;  %v4217_v17 = vld [vmem:[%s6070_s1 + $0xa8] ss:$12 sps:$4 sm:$0xff]   ;;  %v4561_v21 = vld [vmem:[%s6069_s0 + $0x20] sm:$0xff]   ;;  %vm1196_vm0 = vcmask 130048  }
  0x2d   :  { %283 = vmatpush1.bf16.msra.mxu0 %v4199_v4  ;;  %v4547_v19 = vld [vmem:[%s6069_s0 + $0x10] sm:$0xff]   ;;  %v4554_v20 = vld [vmem:[%s6069_s0 + $0x18] sm:$0xff]   ;;  %v4227_v26 = vld [vmem:[%s6070_s1 + $0x20] ss:$12 sps:$4 sm:$0xff]   ;;  %s4412_s5 = smov 116   ;;  %vm1960_vm1 = vcmask 1043456  }
  0x2e   :  { %284 = vmatprep.subr.bf16.mxu0 %v4200_v5  ;;  %v4575_v23 = vld [vmem:[%s6069_s0 + $0x30] sm:$0xff]   ;;  %v4582_v24 = vld [vmem:[%s6069_s0 + $0x38] sm:$0xff]   ;;  %v4229_v28 = vld [vmem:[%s6071_s2 + $0xc0] sm:$0xff]   ;;  %vm3273_vm2 = vcmask 1041409   ;;  %vm3275_vm3 = vcmask 1042434   ;;  %vm3277_vm4 = vcmask 1043459  }
  0x2f   :  { %v4226_v25 = vld [vmem:[%s6070_s1 + $0x8] ss:$12 sps:$4 sm:$0xff]   ;;  %v4228_v27 = vld [vmem:[%s6070_s1 + $0x38] ss:$12 sps:$4 sm:$0xff]   ;;  %v4231_v30 = vld [vmem:[%s6070_s1 + $0x50] ss:$12 sps:$4 sm:$0xff]  }
  0x30   :  { %4002 = vmatprep.subr.bf16.mxu1 %v4226_v25  ;;  %v4230_v29 = vld [vmem:[%s6071_s2 + $0x80] sm:$0xff]   ;;  %v4232_v31 = vld [vmem:[%s6070_s1 + $0x68] ss:$12 sps:$4 sm:$0xff]   ;;  %v4239_v38 = vld [vmem:[%s6070_s1 + $0xb0] ss:$12 sps:$4 sm:$0xff]   ;;  %vm3340_vm5 = vcmask 1045509  }
  0x31   :  { %285 = vmatpush1.bf16.msra.mxu0 %v4202_v6  ;;  %4003 = vmatpush3.bf16.msra.mxu1 %v4226_v25  ;;  %v4233_v32 = vld [vmem:[%s6071_s2 + $0xc8] sm:$0xff]   ;;  %v4236_v35 = vld [vmem:[%s6070_s1 + $0x98] ss:$12 sps:$4 sm:$0xff]   ;;  %v4237_v36 = vld [vmem:[%s6071_s2 + $0xd0] sm:$0xff]   ;;  %vm3342_vm6 = vcmask 1046534   ;;  %vm3344_vm7 = vcmask 1047559  }
  0x32   :  { %286 = vmatprep.subr.bf16.mxu0 %v4203_v7  ;;  %4004 = vmatprep.subr.bf16.mxu1 %v4227_v26  ;;  %v4234_v33 = vld [vmem:[%s6071_s2 + $0x88] sm:$0xff]   ;;  %v4238_v37 = vld [vmem:[%s6071_s2 + $0x90] sm:$0xff]   ;;  %v4240_v39 = vld [vmem:[%s6071_s2 + $0x40] sm:$0xff]  }
  0x33   :  { %v4235_v34 = vld [vmem:[%s6070_s1 + $0x80] ss:$12 sps:$4 sm:$0xff]   ;;  %v4242_v41 = vld [vmem:[%s6071_s2 + $0xd8] sm:$0xff]   ;;  %v4246_v46 = vld [vmem:[%s6071_s2 + $0x50] sm:$0xff]  }
  0x34   :  { %v4241_v40 = vld [vmem:[%s6071_s2] sm:$0xff]   ;;  %v4243_v42 = vld [vmem:[%s6071_s2 + $0x98] sm:$0xff]   ;;  %v4244_v43 = vld [vmem:[%s6071_s2 + $0x48] sm:$0xff]  }
  0x35   :  { %287 = vmatpush1.bf16.msra.mxu0 %v4205_v8  ;;  %4005 = vmatpush3.bf16.msra.mxu1 %v4227_v26  ;;  %v4248_v44 = vld [vmem:[%s6071_s2 + $0xe0] sm:$0xff]   ;;  %v4245_v45 = vld [vmem:[%s6071_s2 + $0x8] sm:$0xff]   ;;  %v4247_v49 = vld [vmem:[%s6071_s2 + $0x10] sm:$0xff]  }
  0x36   :  { %288 = vmatprep.subr.bf16.mxu0 %v4206_v10  ;;  %4006 = vmatprep.subr.bf16.mxu1 %v4228_v27  ;;  %v4249_v47 = vld [vmem:[%s6071_s2 + $0xa0] sm:$0xff]   ;;  %v4254_v48 = vld [vmem:[%s6071_s2 + $0xe8] sm:$0xff]   ;;  %v4250_v50 = vld [vmem:[%s6071_s2 + $0x58] sm:$0xff]  }
  0x37   :  { %v4255_v51 = vld [vmem:[%s6071_s2 + $0xa8] sm:$0xff]   ;;  %v4251_v52 = vld [vmem:[%s6071_s2 + $0x18] sm:$0xff]   ;;  %v4252_v53 = vld [vmem:[%s6071_s2 + $0x60] sm:$0xff]  }
  0x38   :  { %v4253_v54 = vld [vmem:[%s6071_s2 + $0x20] sm:$0xff]   ;;  %v4256_v55 = vld [vmem:[%s6071_s2 + $0x68] sm:$0xff]   ;;  %v4258_v57 = vld [vmem:[%s6071_s2 + $0xf0] sm:$0xff]  }
  0x39   :  { %289 = vmatpush1.bf16.msra.mxu0 %v4208_v11  ;;  %4007 = vmatpush3.bf16.msra.mxu1 %v4228_v27  ;;  %v4257_v56 = vld [vmem:[%s6071_s2 + $0x28] sm:$0xff]   ;;  %v4259_v58 = vld [vmem:[%s6071_s2 + $0x70] sm:$0xff]   ;;  %v4262_v61 = vld [vmem:[%s6071_s2 + $0xf8] sm:$0xff]  }
  0x3a   :  { %290 = vmatprep.subr.bf16.mxu0 %v4209_v12  ;;  %4008 = vmatprep.subr.bf16.mxu1 %v4231_v30  ;;  %v4260_v59 = vld [vmem:[%s6071_s2 + $0xb0] sm:$0xff]   ;;  %v4263_v62 = vld [vmem:[%s6071_s2 + $0x78] sm:$0xff]  }
  0x3b   :  { %v4261_v60 = vld [vmem:[%s6071_s2 + $0x30] sm:$0xff]   ;;  %v4264_v63 = vld [vmem:[%s6071_s2 + $0xb8] sm:$0xff]  }
  0x3c   :  { %v4265_v1 = vld [vmem:[%s6071_s2 + $0x38] sm:$0xff]   ;;  %s4409_s2 = smov 124  }
  0x3d   :  { %291 = vmatpush1.bf16.msra.mxu0 %v4211_v13  ;;  %4009 = vmatpush3.bf16.msra.mxu1 %v4231_v30 }
  0x3e   :  { %292 = vmatprep.subr.bf16.mxu0 %v4212_v14  ;;  %4010 = vmatprep.subr.bf16.mxu1 %v4232_v31 }
  0x41   :  { %293 = vmatpush1.bf16.msra.mxu0 %v4214_v15  ;;  %4011 = vmatpush3.bf16.msra.mxu1 %v4232_v31 }
  0x42   :  { %294 = vmatprep.subr.bf16.mxu0 %v4215_v16  ;;  %4012 = vmatprep.subr.bf16.mxu1 %v4235_v34 }
  0x45   :  { %295 = vmatpush1.bf16.msra.mxu0 %v4217_v17  ;;  %4013 = vmatpush3.bf16.msra.mxu1 %v4235_v34 }
  0x46   :  { %3906 = vmatprep.subr.bf16.mxu0 %v4229_v28  ;;  %4014 = vmatprep.subr.bf16.mxu1 %v4236_v35 }
  0x48   :  { %313 = vmatmul.mubr.bf16.vlgmr.msra.gmra.mrb[0].mxu0 %v4218_v9 }
  0x49   :  { %322 = vmatprep.mubr.bf16.mxu0 %v6082_v0  ;;  %3907 = vmatpush3.bf16.msra.mxu0 %v4230_v29 }
  0x4a   :  { %3908 = vmatprep.subr.bf16.mxu0 %v4233_v32  ;;  %4015 = vmatpush3.bf16.msra.mxu1 %v4236_v35 }
  0x4b   :  { %4016 = vmatprep.subr.bf16.mxu1 %v4239_v38 }
  0x4d   :  { %3909 = vmatpush3.bf16.msra.mxu0 %v4234_v33 }
  0x4e   :  { %3910 = vmatprep.subr.bf16.mxu0 %v4237_v36  ;;  %4017 = vmatpush3.bf16.msra.mxu1 %v4239_v38 }
  0x4f   :  { %3842 = vmatprep.subr.bf16.mxu1 %v4240_v39 }
  0x50   :  { %323 = vmatmul.mubr.bf16.gmra.mrb[4].mxu0 %v4219_v18 }
  0x51   :  { %332 = vmatprep.mubr.bf16.mxu0 %v6082_v0  ;;  %3911 = vmatpush3.bf16.msra.mxu0 %v4238_v37 }
  0x52   :  { %4019 = vmatmul.mubr.bf16.vlgmr.msra.gmra.mrb[0].mxu1 %v4219_v18  ;;  %3912 = vmatprep.subr.bf16.mxu0 %v4242_v41 }
  0x53   :  { %3843 = vmatpush3.bf16.msra.mxu1 %v4241_v40  ;;  %4022 = vmatprep.mubr.bf16.mxu1 %v4547_v19 }
  0x54   :  { %3844 = vmatprep.subr.bf16.mxu1 %v4244_v43 }
  0x55   :  { %3913 = vmatpush3.bf16.msra.mxu0 %v4243_v42 }
  0x56   :  { %3914 = vmatprep.subr.bf16.mxu0 %v4248_v44 }
  0x57   :  { %3845 = vmatpush3.bf16.msra.mxu1 %v4245_v45 }
  0x58   :  { %333 = vmatmul.mubr.bf16.gmra.mrb[8].mxu0 %v4547_v19  ;;  %3846 = vmatprep.subr.bf16.mxu1 %v4246_v46 }
  0x59   :  { %342 = vmatprep.mubr.bf16.mxu0 %v6082_v0  ;;  %3915 = vmatpush3.bf16.msra.mxu0 %v4249_v47 }
  0x5a   :  { %3916 = vmatprep.subr.bf16.mxu0 %v4254_v48  ;;  %4023 = vmatmul.mubr.bf16.gmra.mrb[4].mxu1 %v4554_v20 }
  0x5b   :  { %3847 = vmatpush3.bf16.msra.mxu1 %v4247_v49  ;;  %4026 = vmatprep.mubr.bf16.mxu1 %v4561_v21 }
  0x5c   :  { %3848 = vmatprep.subr.bf16.mxu1 %v4250_v50 }
  0x5d   :  { %3917 = vmatpush3.bf16.msra.mxu0 %v4255_v51 }
  0x5e   :  { %3918 = vmatprep.subr.bf16.mxu0 %v4258_v57 }
  0x5f   :  { %3849 = vmatpush3.bf16.msra.mxu1 %v4251_v52 }
  0x60   :  { %343 = vmatmul.mubr.bf16.gmra.mrb[12].mxu0 %v4554_v20  ;;  %3850 = vmatprep.subr.bf16.mxu1 %v4252_v53 }
  0x61   :  { %352 = vmatprep.mubr.bf16.mxu0 %v6082_v0  ;;  %3919 = vmatpush3.bf16.msra.mxu0 %v4260_v59 }
  0x62   :  { %4027 = vmatmul.mubr.bf16.gmra.mrb[8].mxu1 %v4568_v22  ;;  %3920 = vmatprep.subr.bf16.mxu0 %v4262_v61 }
  0x63   :  { %3851 = vmatpush3.bf16.msra.mxu1 %v4253_v54  ;;  %4030 = vmatprep.mubr.bf16.mxu1 %v4575_v23 }
  0x64   :  { %3852 = vmatprep.subr.bf16.mxu1 %v4256_v55 }
  0x65   :  { %3921 = vmatpush3.bf16.msra.mxu0 %v4264_v63 }
  0x67   :  { %3853 = vmatpush3.bf16.msra.mxu1 %v4257_v56 }
  0x68   :  { %353 = vmatmul.mubr.bf16.gmra.mrb[16].mxu0 %v4561_v21  ;;  %3854 = vmatprep.subr.bf16.mxu1 %v4259_v58  ;;  %v4266_v58 = vld [vmem:[#allocation2] sm:$0xff]  }
  0x69   :  { %362 = vmatprep.mubr.bf16.mxu0 %v6082_v0 }
  0x6a   :  { %4031 = vmatmul.mubr.bf16.gmra.mrb[12].mxu1 %v4582_v24 }
  0x6b   :  { %3855 = vmatpush3.bf16.msra.mxu1 %v4261_v60 }
  0x6c   :  { %3856 = vmatprep.subr.bf16.mxu1 %v4263_v62 }
  0x6f   :  { %3857 = vmatpush3.bf16.msra.mxu1 %v4265_v1 }
  0x70   :  { %363 = vmatmul.mubr.bf16.gmra.mrb[20].mxu0 %v4568_v22  ;;  %4034 = vmatprep.subr.bf16.mxu1 %v4266_v58 }
  0x71   :  { %372 = vmatprep.mubr.bf16.mxu0 %v6082_v0 }
  0x78   :  { %373 = vmatmul.mubr.bf16.gmra.mrb[24].mxu0 %v4575_v23 }
  0x79   :  { %382 = vmatprep.mubr.bf16.mxu0 %v6082_v0 }
  0x80   :  { %383 = vmatmul.mubr.bf16.gmra.mrb[28].mxu0 %v4582_v24 }
 0x11b   :  { %v4711_v2 = vpop.f32.mrb[0].mxu0 }
 0x11c   :  { %v316_v3 = vpop.f32.mrb[1].mxu0 }
 0x11d   :  { %v4714_v4 = vmul.f32 %v316_v3, %v4711_v2  ;;  %674 = vrot.lane.b32.xlu1 %v316_v3, %s4407_s29  ;;  %530 = vrot.lane.b32.xlu0 %v316_v3, %s4408_s30  ;;  %v4718_v5 = vpop.f32.mrb[2].mxu0 }
 0x11e   :  { %v320_v6 = vpop.f32.mrb[3].mxu0 }
 0x11f   :  { %v4721_v7 = vmul.f32 %v320_v6, %v4718_v5 }
 0x121   :  { %v506_v8 = vpack.c.bf16 %v4721_v7, %v4714_v4  ;;  %602 = vrot.lane.b32.xlu0 %v316_v3, %s4403_s11  ;;  %676 = vrot.lane.b32.xlu1 %v320_v6, %s4407_s29 }
 0x123   :  { %v4727_v9 = vpop.f32.mrb[4].mxu0 }
 0x124   :  { %v326_v10 = vpop.f32.mrb[5].mxu0 }
 0x125   :  { %v4730_v11 = vmul.f32 %v326_v10, %v4727_v9  ;;  %604 = vrot.lane.b32.xlu1 %v320_v6, %s4403_s11  ;;  %532 = vrot.lane.b32.xlu0 %v320_v6, %s4408_s30  ;;  %v4734_v12 = vpop.f32.mrb[6].mxu0 }
 0x126   :  { %v330_v13 = vpop.f32.mrb[7].mxu0 }
 0x127   :  { %v4737_v14 = vmul.f32 %v330_v13, %v4734_v12 }
 0x129   :  { %534 = vrot.lane.b32.xlu0 %v326_v10, %s4408_s30  ;;  %536 = vrot.lane.b32.xlu1 %v330_v13, %s4408_s30  ;;  %v507_v15 = vpack.c.bf16 %v4737_v14, %v4730_v11 }
 0x12b   :  { %v4743_v16 = vpop.f32.mrb[8].mxu0 }
 0x12c   :  { %v336_v17 = vpop.f32.mrb[9].mxu0 }
 0x12d   :  { %678 = vrot.lane.b32.xlu0 %v326_v10, %s4407_s29  ;;  %680 = vrot.lane.b32.xlu1 %v330_v13, %s4407_s29  ;;  %v4748_v18 = vmul.f32 %v336_v17, %v4743_v16  ;;  %v4750_v19 = vpop.f32.mrb[10].mxu0 }
 0x12e   :  { %v340_v20 = vpop.f32.mrb[11].mxu0 }
 0x12f   :  { %v4753_v21 = vmul.f32 %v340_v20, %v4750_v19 }
 0x131   :  { %606 = vrot.lane.b32.xlu0 %v326_v10, %s4403_s11  ;;  %608 = vrot.lane.b32.xlu1 %v330_v13, %s4403_s11  ;;  %v508_v22 = vpack.c.bf16 %v4753_v21, %v4748_v18 }
 0x133   :  { %v4759_v23 = vpop.f32.mrb[12].mxu0 }
 0x134   :  { %v346_v24 = vpop.f32.mrb[13].mxu0 }
 0x135   :  { %538 = vrot.lane.b32.xlu0 %v336_v17, %s4408_s30  ;;  %540 = vrot.lane.b32.xlu1 %v340_v20, %s4408_s30  ;;  %v4764_v25 = vmul.f32 %v346_v24, %v4759_v23  ;;  %v4766_v26 = vpop.f32.mrb[14].mxu0 }
 0x136   :  { %v350_v27 = vpop.f32.mrb[15].mxu0 }
 0x137   :  { %v4769_v28 = vmul.f32 %v350_v27, %v4766_v26 }
 0x139   :  { %682 = vrot.lane.b32.xlu0 %v336_v17, %s4407_s29  ;;  %684 = vrot.lane.b32.xlu1 %v340_v20, %s4407_s29  ;;  %v509_v29 = vpack.c.bf16 %v4769_v28, %v4764_v25 }
 0x13b   :  { %v4775_v30 = vpop.f32.mrb[16].mxu0 }
 0x13c   :  { %v356_v31 = vpop.f32.mrb[17].mxu0 }
 0x13d   :  { %610 = vrot.lane.b32.xlu0 %v336_v17, %s4403_s11  ;;  %612 = vrot.lane.b32.xlu1 %v340_v20, %s4403_s11  ;;  %v4780_v32 = vmul.f32 %v356_v31, %v4775_v30  ;;  %v4782_v33 = vpop.f32.mrb[18].mxu0 }
 0x13e   :  { %v360_v34 = vpop.f32.mrb[19].mxu0 }
 0x13f   :  { %v4785_v35 = vmul.f32 %v360_v34, %v4782_v33 }
 0x141   :  { %542 = vrot.lane.b32.xlu0 %v346_v24, %s4408_s30  ;;  %544 = vrot.lane.b32.xlu1 %v350_v27, %s4408_s30  ;;  %v510_v36 = vpack.c.bf16 %v4785_v35, %v4780_v32 }
 0x143   :  { %v4791_v37 = vpop.f32.mrb[20].mxu0 }
 0x144   :  { %v366_v38 = vpop.f32.mrb[21].mxu0 }
 0x145   :  { %686 = vrot.lane.b32.xlu0 %v346_v24, %s4407_s29  ;;  %688 = vrot.lane.b32.xlu1 %v350_v27, %s4407_s29  ;;  %v4796_v39 = vmul.f32 %v366_v38, %v4791_v37  ;;  %v4798_v40 = vpop.f32.mrb[22].mxu0 }
 0x146   :  { %v370_v41 = vpop.f32.mrb[23].mxu0 }
 0x147   :  { %v4801_v42 = vmul.f32 %v370_v41, %v4798_v40 }
 0x149   :  { %614 = vrot.lane.b32.xlu0 %v346_v24, %s4403_s11  ;;  %616 = vrot.lane.b32.xlu1 %v350_v27, %s4403_s11  ;;  %v511_v43 = vpack.c.bf16 %v4801_v42, %v4796_v39 }
 0x14b   :  { %v4807_v44 = vpop.f32.mrb[24].mxu0 }
 0x14c   :  { %v376_v45 = vpop.f32.mrb[25].mxu0 }
 0x14d   :  { %546 = vrot.lane.b32.xlu0 %v356_v31, %s4408_s30  ;;  %548 = vrot.lane.b32.xlu1 %v360_v34, %s4408_s30  ;;  %v4812_v46 = vmul.f32 %v376_v45, %v4807_v44  ;;  %v4814_v47 = vpop.f32.mrb[26].mxu0 }
 0x14e   :  { %v380_v48 = vpop.f32.mrb[27].mxu0 }
 0x14f   :  { %v4817_v49 = vmul.f32 %v380_v48, %v4814_v47 }
 0x151   :  { %690 = vrot.lane.b32.xlu0 %v356_v31, %s4407_s29  ;;  %692 = vrot.lane.b32.xlu1 %v360_v34, %s4407_s29  ;;  %v512_v50 = vpack.c.bf16 %v4817_v49, %v4812_v46 }
 0x153   :  { %v4823_v51 = vpop.f32.mrb[28].mxu0 }
 0x154   :  { %v386_v52 = vpop.f32.mrb[29].mxu0 }
 0x155   :  { %618 = vrot.lane.b32.xlu0 %v356_v31, %s4403_s11  ;;  %620 = vrot.lane.b32.xlu1 %v360_v34, %s4403_s11  ;;  %v4828_v53 = vmul.f32 %v386_v52, %v4823_v51  ;;  %v4830_v54 = vpop.f32.mrb[30].mxu0 }
 0x156   :  { %v390_v55 = vpop.f32.mrb[31].mxu0 }
 0x157   :  { %v4833_v56 = vmul.f32 %v390_v55, %v4830_v54 }
 0x159   :  { %550 = vrot.lane.b32.xlu0 %v366_v38, %s4408_s30  ;;  %552 = vrot.lane.b32.xlu1 %v370_v41, %s4408_s30  ;;  %v513_v57 = vpack.c.bf16 %v4833_v56, %v4828_v53 }
 0x15d   :  { %694 = vrot.lane.b32.xlu0 %v366_v38, %s4407_s29  ;;  %696 = vrot.lane.b32.xlu1 %v370_v41, %s4407_s29 }
 0x161   :  { %622 = vrot.lane.b32.xlu0 %v366_v38, %s4403_s11  ;;  %624 = vrot.lane.b32.xlu1 %v370_v41, %s4403_s11  ;;  %v4267_v41 = vld [vmem:[#allocation2 + $0x8] sm:$0xff]  }
 0x165   :  { %554 = vrot.lane.b32.xlu0 %v376_v45, %s4408_s30  ;;  %556 = vrot.lane.b32.xlu1 %v380_v48, %s4408_s30 }
 0x169   :  { %698 = vrot.lane.b32.xlu0 %v376_v45, %s4407_s29  ;;  %700 = vrot.lane.b32.xlu1 %v380_v48, %s4407_s29 }
 0x16d   :  { %626 = vrot.lane.b32.xlu0 %v376_v45, %s4403_s11  ;;  %628 = vrot.lane.b32.xlu1 %v380_v48, %s4403_s11 }
 0x171   :  { %558 = vrot.lane.b32.xlu0 %v386_v52, %s4408_s30  ;;  %560 = vrot.lane.b32.xlu1 %v390_v55, %s4408_s30 }
 0x175   :  { %702 = vrot.lane.b32.xlu0 %v386_v52, %s4407_s29  ;;  %704 = vrot.lane.b32.xlu1 %v390_v55, %s4407_s29 }
 0x179   :  { %630 = vrot.lane.b32.xlu0 %v386_v52, %s4403_s11  ;;  %632 = vrot.lane.b32.xlu1 %v390_v55, %s4403_s11  ;;  %v4268_v55 = vld [vmem:[#allocation2 + $0x10] sm:$0xff]   ;;  %s4410_s11 = smov 120  }
 0x18f   :  { %v675_v59 = vpop.permute.xlu1 %674  ;;  %v531_v60 = vpop.permute.xlu0 %530 }
 0x190   :  { %v722_v63 = vmul.f32 %v675_v59, %v4711_v2  ;;  %v578_v13 = vmul.f32 %v531_v60, %v4711_v2 }
 0x193   :  { %v603_v61 = vpop.permute.xlu0 %602  ;;  %v677_v62 = vpop.permute.xlu1 %676 }
 0x194   :  { %v723_v1 = vmul.f32 %v677_v62, %v4718_v5  ;;  %v650_v17 = vmul.f32 %v603_v61, %v4711_v2 }
 0x196   :  { %v738_v3 = vpack.c.bf16 %v723_v1, %v722_v63  ;;  %v4269_v1 = vld [vmem:[#allocation2 + $0x18] sm:$0xff]  }
 0x197   :  { %v605_v6 = vpop.permute.xlu1 %604  ;;  %v533_v10 = vpop.permute.xlu0 %532 }
 0x198   :  { %v651_v20 = vmul.f32 %v605_v6, %v4718_v5  ;;  %v579_v24 = vmul.f32 %v533_v10, %v4718_v5  ;;  %1131 = vmatprep.mubr.bf16.mxu0 %v738_v3  ;;  %v4270_v6 = vld [vmem:[#allocation2 + $0x20] sm:$0xff]  }
 0x19a   :  { %v666_v27 = vpack.c.bf16 %v651_v20, %v650_v17  ;;  %v594_v31 = vpack.c.bf16 %v579_v24, %v578_v13  ;;  %v4271_v20 = vld [vmem:[#allocation2 + $0x28] sm:$0xff]  }
 0x19b   :  { %v535_v34 = vpop.permute.xlu0 %534  ;;  %v537_v38 = vpop.permute.xlu1 %536 }
 0x19c   :  { %v580_v45 = vmul.f32 %v535_v34, %v4727_v9  ;;  %v581_v48 = vmul.f32 %v537_v38, %v4734_v12  ;;  %1034 = vmatprep.mubr.bf16.mxu1 %v594_v31  ;;  %1132 = vmatmul.mubr.bf16.vlgmr.msra.gmra.mrb[32].mxu0 %v666_v27  ;;  %v4272_v31 = vld [vmem:[#allocation2 + $0x30] sm:$0xff]  }
 0x19d   :  { %1035 = vmatmul.mubr.bf16.vlgmr.msra.gmra.mrb[16].mxu1 %v506_v8 }
 0x19e   :  { %v595_v2 = vpack.c.bf16 %v581_v48, %v580_v45  ;;  %4035 = vmatpush3.bf16.msra.mxu1 %v4266_v58 }
 0x19f   :  { %v679_v52 = vpop.permute.xlu0 %678  ;;  %v681_v5 = vpop.permute.xlu1 %680  ;;  %4036 = vmatprep.subr.bf16.mxu1 %v4267_v41 }
 0x1a0   :  { %v724_v59 = vmul.f32 %v679_v52, %v4727_v9  ;;  %v725_v60 = vmul.f32 %v681_v5, %v4734_v12  ;;  %1042 = vmatprep.mubr.bf16.mxu1 %v595_v2  ;;  %v4273_v2 = vld [vmem:[#allocation2 + $0x38] sm:$0xff]  }
 0x1a2   :  { %v739_v61 = vpack.c.bf16 %v725_v60, %v724_v59  ;;  %4037 = vmatpush3.bf16.msra.mxu1 %v4267_v41 }
 0x1a3   :  { %v607_v62 = vpop.permute.xlu0 %606  ;;  %v609_v63 = vpop.permute.xlu1 %608  ;;  %4038 = vmatprep.subr.bf16.mxu1 %v4268_v55 }
 0x1a4   :  { %v652_v4 = vmul.f32 %v607_v62, %v4727_v9  ;;  %v653_v7 = vmul.f32 %v609_v63, %v4734_v12  ;;  %1139 = vmatprep.mubr.bf16.mxu0 %v739_v61 }
 0x1a5   :  { %1043 = vmatmul.mubr.bf16.gmra.mrb[20].mxu1 %v507_v15 }
 0x1a6   :  { %v667_v8 = vpack.c.bf16 %v653_v7, %v652_v4  ;;  %4039 = vmatpush3.bf16.msra.mxu1 %v4268_v55 }
 0x1a7   :  { %v539_v58 = vpop.permute.xlu0 %538  ;;  %v541_v3 = vpop.permute.xlu1 %540  ;;  %4040 = vmatprep.subr.bf16.mxu1 %v4269_v1 }
 0x1a8   :  { %v582_v10 = vmul.f32 %v539_v58, %v4743_v16  ;;  %v583_v13 = vmul.f32 %v541_v3, %v4750_v19  ;;  %1140 = vmatmul.mubr.bf16.gmra.mrb[36].mxu0 %v667_v8 }
 0x1aa   :  { %v596_v17 = vpack.c.bf16 %v583_v13, %v582_v10  ;;  %4041 = vmatpush3.bf16.msra.mxu1 %v4269_v1 }
 0x1ab   :  { %v683_v9 = vpop.permute.xlu0 %682  ;;  %v685_v12 = vpop.permute.xlu1 %684  ;;  %4042 = vmatprep.subr.bf16.mxu1 %v4270_v6 }
 0x1ac   :  { %v726_v11 = vmul.f32 %v683_v9, %v4743_v16  ;;  %v727_v14 = vmul.f32 %v685_v12, %v4750_v19  ;;  %1050 = vmatprep.mubr.bf16.mxu1 %v596_v17 }
 0x1ad   :  { %1051 = vmatmul.mubr.bf16.gmra.mrb[24].mxu1 %v508_v22 }
 0x1ae   :  { %v740_v15 = vpack.c.bf16 %v727_v14, %v726_v11  ;;  %4043 = vmatpush3.bf16.msra.mxu1 %v4270_v6 }
 0x1af   :  { %v611_v24 = vpop.permute.xlu0 %610  ;;  %v613_v27 = vpop.permute.xlu1 %612  ;;  %4044 = vmatprep.subr.bf16.mxu1 %v4271_v20 }
 0x1b0   :  { %v654_v34 = vmul.f32 %v611_v24, %v4743_v16  ;;  %v655_v38 = vmul.f32 %v613_v27, %v4750_v19  ;;  %1147 = vmatprep.mubr.bf16.mxu0 %v740_v15  ;;  %v4902_v15 = vpop.f32.mrb[0].mxu1 }
 0x1b2   :  { %v668_v41 = vpack.c.bf16 %v655_v38, %v654_v34  ;;  %4045 = vmatpush3.bf16.msra.mxu1 %v4271_v20 }
 0x1b3   :  { %v543_v45 = vpop.permute.xlu0 %542  ;;  %v545_v48 = vpop.permute.xlu1 %544  ;;  %4046 = vmatprep.subr.bf16.mxu1 %v4272_v31 }
 0x1b4   :  { %v584_v18 = vmul.f32 %v543_v45, %v4759_v23  ;;  %v585_v21 = vmul.f32 %v545_v48, %v4766_v26  ;;  %1148 = vmatmul.mubr.bf16.gmra.mrb[40].mxu0 %v668_v41 }
 0x1b6   :  { %v597_v22 = vpack.c.bf16 %v585_v21, %v584_v18  ;;  %4047 = vmatpush3.bf16.msra.mxu1 %v4272_v31 }
 0x1b7   :  { %v687_v52 = vpop.permute.xlu0 %686  ;;  %v689_v5 = vpop.permute.xlu1 %688  ;;  %4048 = vmatprep.subr.bf16.mxu1 %v4273_v2 }
 0x1b8   :  { %v728_v16 = vmul.f32 %v687_v52, %v4759_v23  ;;  %v729_v19 = vmul.f32 %v689_v5, %v4766_v26  ;;  %1058 = vmatprep.mubr.bf16.mxu1 %v597_v22 }
 0x1b9   :  { %1059 = vmatmul.mubr.bf16.gmra.mrb[28].mxu1 %v509_v29 }
 0x1ba   :  { %v741_v55 = vpack.c.bf16 %v729_v19, %v728_v16  ;;  %4049 = vmatpush3.bf16.msra.mxu1 %v4273_v2 }
 0x1bb   :  { %v615_v59 = vpop.permute.xlu0 %614  ;;  %v617_v60 = vpop.permute.xlu1 %616 }
 0x1bc   :  { %v656_v61 = vmul.f32 %v615_v59, %v4759_v23  ;;  %v657_v62 = vmul.f32 %v617_v60, %v4766_v26  ;;  %1155 = vmatprep.mubr.bf16.mxu0 %v741_v55 }
 0x1be   :  { %v669_v63 = vpack.c.bf16 %v657_v62, %v656_v61 }
 0x1bf   :  { %v547_v1 = vpop.permute.xlu0 %546  ;;  %v549_v4 = vpop.permute.xlu1 %548 }
 0x1c0   :  { %v586_v7 = vmul.f32 %v547_v1, %v4775_v30  ;;  %v587_v8 = vmul.f32 %v549_v4, %v4782_v33  ;;  %1156 = vmatmul.mubr.bf16.gmra.mrb[44].mxu0 %v669_v63 }
 0x1c2   :  { %v598_v58 = vpack.c.bf16 %v587_v8, %v586_v7 }
 0x1c3   :  { %v691_v25 = vpop.permute.xlu0 %690  ;;  %v693_v28 = vpop.permute.xlu1 %692 }
 0x1c4   :  { %v730_v29 = vmul.f32 %v691_v25, %v4775_v30  ;;  %v731_v3 = vmul.f32 %v693_v28, %v4782_v33  ;;  %1066 = vmatprep.mubr.bf16.mxu1 %v598_v58 }
 0x1c5   :  { %1067 = vmatmul.mubr.bf16.gmra.mrb[32].mxu1 %v510_v36 }
 0x1c6   :  { %v742_v23 = vpack.c.bf16 %v731_v3, %v730_v29 }
 0x1c7   :  { %v619_v26 = vpop.permute.xlu0 %618  ;;  %v621_v6 = vpop.permute.xlu1 %620 }
 0x1c8   :  { %v658_v10 = vmul.f32 %v619_v26, %v4775_v30  ;;  %v659_v13 = vmul.f32 %v621_v6, %v4782_v33  ;;  %1163 = vmatprep.mubr.bf16.mxu0 %v742_v23  ;;  %v427_v33 = vpop.f32.mrb[1].mxu1 }
 0x1c9   :  { %v4909_v24 = vpop.f32.mrb[2].mxu1 }
 0x1ca   :  { %v670_v17 = vpack.c.bf16 %v659_v13, %v658_v10  ;;  %v1630_v31 = vpack.c.bf16 %v4909_v24, %v4902_v15  ;;  %v430_v34 = vpop.f32.mrb[3].mxu1 }
 0x1cb   :  { %v551_v9 = vpop.permute.xlu0 %550  ;;  %v553_v12 = vpop.permute.xlu1 %552  ;;  %v1629_v45 = vpack.c.bf16 %v430_v34, %v427_v33 }
 0x1cc   :  { %v588_v20 = vmul.f32 %v551_v9, %v4791_v37  ;;  %v589_v11 = vmul.f32 %v553_v12, %v4798_v40  ;;  %1164 = vmatmul.mubr.bf16.gmra.mrb[48].mxu0 %v670_v17  ;;  %v4024_v21 = vpop.f32.mrb[4].mxu1 }
 0x1cd   :  { %v443_v52 = vpop.f32.mrb[5].mxu1 }
 0x1ce   :  { %v599_v14 = vpack.c.bf16 %v589_v11, %v588_v20  ;;  %v4025_v5 = vpop.f32.mrb[6].mxu1 }
 0x1cf   :  { %v695_v32 = vpop.permute.xlu0 %694  ;;  %v697_v35 = vpop.permute.xlu1 %696  ;;  %v1632_v19 = vpack.c.bf16 %v4025_v5, %v4024_v21 }
 0x1d0   :  { %v732_v36 = vmul.f32 %v695_v32, %v4791_v37  ;;  %v733_v30 = vmul.f32 %v697_v35, %v4798_v40  ;;  %1074 = vmatprep.mubr.bf16.mxu1 %v599_v14  ;;  %v446_v55 = vpop.f32.mrb[7].mxu1 }
 0x1d1   :  { %1075 = vmatmul.mubr.bf16.gmra.mrb[36].mxu1 %v511_v43  ;;  %v4028_v63 = vpop.f32.mrb[8].mxu1 }
 0x1d2   :  { %v743_v27 = vpack.c.bf16 %v733_v30, %v732_v36  ;;  %v459_v58 = vpop.f32.mrb[9].mxu1 }
 0x1d3   :  { %v623_v38 = vpop.permute.xlu0 %622  ;;  %v625_v41 = vpop.permute.xlu1 %624 }
 0x1d4   :  { %v660_v48 = vmul.f32 %v623_v38, %v4791_v37  ;;  %v661_v2 = vmul.f32 %v625_v41, %v4798_v40  ;;  %1171 = vmatprep.mubr.bf16.mxu0 %v743_v27  ;;  %v1631_v37 = vpack.c.bf16 %v446_v55, %v443_v52  ;;  %v4029_v25 = vpop.f32.mrb[10].mxu1 }
 0x1d5   :  { %v1634_v29 = vpack.c.bf16 %v4029_v25, %v4028_v63  ;;  %v462_v3 = vpop.f32.mrb[11].mxu1 }
 0x1d6   :  { %v671_v18 = vpack.c.bf16 %v661_v2, %v660_v48  ;;  %v1633_v6 = vpack.c.bf16 %v462_v3, %v459_v58  ;;  %v4032_v10 = vpop.f32.mrb[12].mxu1 }
 0x1d7   :  { %v555_v22 = vpop.permute.xlu0 %554  ;;  %v557_v39 = vpop.permute.xlu1 %556 }
 0x1d8   :  { %v590_v42 = vmul.f32 %v555_v22, %v4807_v44  ;;  %v591_v43 = vmul.f32 %v557_v39, %v4814_v47  ;;  %1172 = vmatmul.mubr.bf16.gmra.mrb[52].mxu0 %v671_v18  ;;  %v475_v9 = vpop.f32.mrb[13].mxu1 }
 0x1d9   :  { %v4033_v12 = vpop.f32.mrb[14].mxu1 }
 0x1da   :  { %v600_v16 = vpack.c.bf16 %v591_v43, %v590_v42  ;;  %v1636_v11 = vpack.c.bf16 %v4033_v12, %v4032_v10  ;;  %v478_v14 = vpop.f32.mrb[15].mxu1 }
 0x1db   :  { %v699_v59 = vpop.permute.xlu0 %698  ;;  %v701_v60 = vpop.permute.xlu1 %700  ;;  %v1635_v36 = vpack.c.bf16 %v478_v14, %v475_v9 }
 0x1dc   :  { %v734_v40 = vmul.f32 %v699_v59, %v4807_v44  ;;  %v735_v61 = vmul.f32 %v701_v60, %v4814_v47  ;;  %1082 = vmatprep.mubr.bf16.mxu1 %v600_v16 }
 0x1dd   :  { %1083 = vmatmul.mubr.bf16.gmra.mrb[40].mxu1 %v512_v50 }
 0x1de   :  { %v744_v62 = vpack.c.bf16 %v735_v61, %v734_v40 }
 0x1df   :  { %v627_v1 = vpop.permute.xlu0 %626  ;;  %v629_v4 = vpop.permute.xlu1 %628 }
 0x1e0   :  { %v662_v7 = vmul.f32 %v627_v1, %v4807_v44  ;;  %v663_v8 = vmul.f32 %v629_v4, %v4814_v47  ;;  %1179 = vmatprep.mubr.bf16.mxu0 %v744_v62 }
 0x1e2   :  { %v672_v28 = vpack.c.bf16 %v663_v8, %v662_v7 }
 0x1e3   :  { %v559_v23 = vpop.permute.xlu0 %558  ;;  %v561_v26 = vpop.permute.xlu1 %560 }
 0x1e4   :  { %v592_v46 = vmul.f32 %v559_v23, %v4823_v51  ;;  %v593_v49 = vmul.f32 %v561_v26, %v4830_v54  ;;  %1180 = vmatmul.mubr.bf16.gmra.mrb[56].mxu0 %v672_v28 }
 0x1e6   :  { %v601_v50 = vpack.c.bf16 %v593_v49, %v592_v46 }
 0x1e7   :  { %v703_v13 = vpop.permute.xlu0 %702  ;;  %v705_v44 = vpop.permute.xlu1 %704 }
 0x1e8   :  { %v736_v47 = vmul.f32 %v703_v13, %v4823_v51  ;;  %v737_v17 = vmul.f32 %v705_v44, %v4830_v54  ;;  %1090 = vmatprep.mubr.bf16.mxu1 %v601_v50 }
 0x1e9   :  { %1091 = vmatmul.mubr.bf16.gmra.mrb[44].mxu1 %v513_v57 }
 0x1ea   :  { %v745_v20 = vpack.c.bf16 %v737_v17, %v736_v47  ;;  %4050 = vmatprep.mubr.bf16.mxu1 %v1629_v45 }
 0x1eb   :  { %v631_v32 = vpop.permute.xlu0 %630  ;;  %v633_v35 = vpop.permute.xlu1 %632 }
 0x1ec   :  { %v664_v30 = vmul.f32 %v631_v32, %v4823_v51  ;;  %v665_v33 = vmul.f32 %v633_v35, %v4830_v54  ;;  %1187 = vmatprep.mubr.bf16.mxu0 %v745_v20 }
 0x1ee   :  { %v673_v27 = vpack.c.bf16 %v665_v33, %v664_v30 }
 0x1f0   :  { %1188 = vmatmul.mubr.bf16.gmra.mrb[60].mxu0 %v673_v27 }
 0x1f1   :  { %4051 = vmatmul.mubr.bf16.vlgmr.msra.gmra.mrb[48].mxu1 %v1630_v31 }
 0x1f2   :  { %4054 = vmatprep.mubr.bf16.mxu1 %v1631_v37 }
 0x1f9   :  { %4055 = vmatmul.mubr.bf16.gmra.mrb[52].mxu1 %v1632_v19 }
 0x1fa   :  { %4058 = vmatprep.mubr.bf16.mxu1 %v1633_v6 }
 0x201   :  { %4059 = vmatmul.mubr.bf16.gmra.mrb[56].mxu1 %v1634_v29 }
 0x202   :  { %4062 = vmatprep.mubr.bf16.mxu1 %v1635_v36 }
 0x209   :  { %4063 = vmatmul.mubr.bf16.gmra.mrb[60].mxu1 %v1636_v11 }
 0x26f   :  { %v3922_v53 = vpop.f32.mrb[32].mxu0 }
 0x270   :  { %v3858_v56 = vpop.f32.mrb[16].mxu1  ;;  %v3923_v57 = vpop.f32.mrb[33].mxu0 }
 0x271   :  { %v3924_v34 = vadd.f32 %v3923_v57, %v3922_v53  ;;  %v3859_v51 = vpop.f32.mrb[17].mxu1  ;;  %v3925_v38 = vpop.f32.mrb[34].mxu0 }
 0x272   :  { %v3860_v54 = vadd.f32 %v3859_v51, %v3858_v56  ;;  %v3861_v41 = vpop.f32.mrb[18].mxu1  ;;  %v3926_v45 = vpop.f32.mrb[35].mxu0 }
 0x273   :  { %v3927_v48 = vadd.f32 %v3926_v45, %v3925_v38  ;;  %v3862_v2 = vpop.f32.mrb[19].mxu1 }
 0x274   :  { %v1134_v18 = vadd.f32 %v3924_v34, %v3860_v54  ;;  %v3863_v15 = vadd.f32 %v3862_v2, %v3861_v41 }
 0x276   :  { %v1137_v24 = vadd.f32 %v3927_v48, %v3863_v15  ;;  %v1197_v31 = vsel %vm1196_vm0, %v1134_v18, -inf }
 0x278   :  { %v1198_v21 = vsel %vm1196_vm0, %v1137_v24, -inf  ;;  %v3864_v22 = vpop.f32.mrb[20].mxu1 }
 0x279   :  { %v1199_v39 = vmax.f32 %v1197_v31, %v1198_v21  ;;  %v3865_v42 = vpop.f32.mrb[21].mxu1 }
 0x27a   :  { %v3866_v43 = vadd.f32 %v3865_v42, %v3864_v22  ;;  %v3867_v52 = vpop.f32.mrb[22].mxu1 }
 0x27b   :  { %v1200_v5 = vrot.slane %v1199_v39, 4  ;;  %v3868_v16 = vpop.f32.mrb[23].mxu1  ;;  %v3928_v19 = vpop.f32.mrb[36].mxu0 }
 0x27c   :  { %v3869_v55 = vadd.f32 %v3868_v16, %v3867_v52  ;;  %v3929_v59 = vpop.f32.mrb[37].mxu0 }
 0x27d   :  { %v1201_v60 = vmax.f32 %v1199_v39, %v1200_v5  ;;  %v3930_v37 = vadd.f32 %v3929_v59, %v3928_v19  ;;  %v3931_v40 = vpop.f32.mrb[38].mxu0 }
 0x27e   :  { %v3932_v61 = vpop.f32.mrb[39].mxu0 }
 0x27f   :  { %v1202_v62 = vrot.slane %v1201_v60, 2  ;;  %v1142_v63 = vadd.f32 %v3930_v37, %v3866_v43  ;;  %v3933_v1 = vadd.f32 %v3932_v61, %v3931_v40 }
 0x280   :  { %v3870_v4 = vpop.f32.mrb[24].mxu1 }
 0x281   :  { %v1203_v7 = vmax.f32 %v1201_v60, %v1202_v62  ;;  %v1145_v8 = vadd.f32 %v3933_v1, %v3869_v55  ;;  %v3871_v58 = vpop.f32.mrb[25].mxu1  ;;  %v1206_v3 = vsel %vm1196_vm0, %v1142_v63, -inf }
 0x282   :  { %v3872_v25 = vadd.f32 %v3871_v58, %v3870_v4  ;;  %v3873_v28 = vpop.f32.mrb[26].mxu1 }
 0x283   :  { %v1204_v29 = vrot.slane %v1203_v7, 1  ;;  %v1207_v23 = vsel %vm1196_vm0, %v1145_v8, -inf  ;;  %v3874_v26 = vpop.f32.mrb[27].mxu1 }
 0x284   :  { %v1208_v6 = vmax.f32 %v1206_v3, %v1207_v23  ;;  %v3875_v46 = vadd.f32 %v3874_v26, %v3873_v28 }
 0x285   :  { %v1205_v49 = vmax.f32 %v1203_v7, %v1204_v29 }
 0x286   :  { %v1209_v50 = vrot.slane %v1208_v6, 4 }
 0x287   :  { %v1269_v10 = vsub.f32 %v1134_v18, %v1205_v49  ;;  %v1270_v13 = vsub.f32 %v1137_v24, %v1205_v49  ;;  %v3934_v44 = vpop.f32.mrb[40].mxu0 }
 0x288   :  { %v1210_v47 = vmax.f32 %v1208_v6, %v1209_v50  ;;  %v3935_v17 = vpop.f32.mrb[41].mxu0 }
 0x289   :  { %v1285_v9 = vmul.f32 1.442695, %v1269_v10  ;;  %v1287_v12 = vmul.f32 1.442695, %v1270_v13  ;;  %v3936_v20 = vadd.f32 %v3935_v17, %v3934_v44  ;;  %v3937_v11 = vpop.f32.mrb[42].mxu0 }
 0x28a   :  { %v1211_v14 = vrot.slane %v1210_v47, 2  ;;  %v3938_v32 = vpop.f32.mrb[43].mxu0 }
 0x28b   :  { %4282 = vpow2.f32 %v1285_v9  ;;  %v1150_v35 = vadd.f32 %v3936_v20, %v3872_v25  ;;  %v3939_v36 = vadd.f32 %v3938_v32, %v3937_v11 }
 0x28c   :  { %4284 = vpow2.f32 %v1287_v12  ;;  %v1212_v30 = vmax.f32 %v1210_v47, %v1211_v14  ;;  %v3876_v33 = vpop.f32.mrb[28].mxu1 }
 0x28d   :  { %v1153_v27 = vadd.f32 %v3939_v36, %v3875_v46  ;;  %v3877_v53 = vpop.f32.mrb[29].mxu1  ;;  %v1215_v51 = vsel %vm1196_vm0, %v1150_v35, -inf }
 0x28e   :  { %v1213_v56 = vrot.slane %v1212_v30, 1  ;;  %v3878_v57 = vadd.f32 %v3877_v53, %v3876_v33  ;;  %v3879_v34 = vpop.f32.mrb[30].mxu1 }
 0x28f   :  { %v1216_v38 = vsel %vm1196_vm0, %v1153_v27, -inf  ;;  %v3880_v54 = vpop.f32.mrb[31].mxu1 }
 0x290   :  { %v1214_v41 = vmax.f32 %v1212_v30, %v1213_v56  ;;  %v1217_v45 = vmax.f32 %v1215_v51, %v1216_v38  ;;  %v3881_v48 = vadd.f32 %v3880_v54, %v3879_v34 }
 0x292   :  { %v1271_v2 = vsub.f32 %v1142_v63, %v1214_v41  ;;  %v1272_v18 = vsub.f32 %v1145_v8, %v1214_v41  ;;  %v1218_v15 = vrot.slane %v1217_v45, 4 }
 0x293   :  { %v3940_v24 = vpop.f32.mrb[44].mxu0 }
 0x294   :  { %v1289_v31 = vmul.f32 1.442695, %v1271_v2  ;;  %v1291_v21 = vmul.f32 1.442695, %v1272_v18  ;;  %v1219_v22 = vmax.f32 %v1217_v45, %v1218_v15  ;;  %v3941_v39 = vpop.f32.mrb[45].mxu0 }
 0x295   :  { %v4942_v42 = vpop.eup %4282  ;;  %v3942_v43 = vadd.f32 %v3941_v39, %v3940_v24  ;;  %v3943_v52 = vpop.f32.mrb[46].mxu0 }
 0x296   :  { %v4944_v5 = vpop.eup %4284  ;;  %v1317_v16 = vsel %vm1196_vm0, %v4942_v42, 0.0  ;;  %4286 = vpow2.f32 %v1289_v31  ;;  %v1220_v19 = vrot.slane %v1219_v22, 2  ;;  %v3944_v55 = vpop.f32.mrb[47].mxu0 }
 0x297   :  { %v1318_v59 = vsel %vm1196_vm0, %v4944_v5, 0.0  ;;  %4288 = vpow2.f32 %v1291_v21  ;;  %v4950_v60 = vadd.f32 %v3942_v43, %v3878_v57  ;;  %v3945_v37 = vadd.f32 %v3944_v55, %v3943_v52 }
 0x298   :  { %v1319_v40 = vadd.f32 %v1318_v59, %v1317_v16  ;;  %v1221_v61 = vmax.f32 %v1219_v22, %v1220_v19  ;;  %v3882_v62 = vpop.f32.mrb[32].mxu1 }
 0x299   :  { %v1161_v63 = vadd.f32 %v3945_v37, %v3881_v48  ;;  %v3883_v1 = vpop.f32.mrb[33].mxu1  ;;  %v1224_v25 = vsel %vm1196_vm0, %v4950_v60, -inf }
 0x29a   :  { %v1320_v4 = vrot.slane %v1319_v40, 4  ;;  %v1222_v7 = vrot.slane %v1221_v61, 1  ;;  %v3884_v8 = vadd.f32 %v3883_v1, %v3882_v62  ;;  %v3885_v58 = vpop.f32.mrb[34].mxu1 }
 0x29b   :  { %v1225_v28 = vsel %vm1196_vm0, %v1161_v63, -inf  ;;  %v3886_v29 = vpop.f32.mrb[35].mxu1 }
 0x29c   :  { %v1321_v3 = vadd.f32 %v1320_v4, %v1319_v40  ;;  %v1223_v23 = vmax.f32 %v1221_v61, %v1222_v7  ;;  %v1226_v26 = vmax.f32 %v1224_v25, %v1225_v28  ;;  %v3887_v6 = vadd.f32 %v3886_v29, %v3885_v58 }
 0x29e   :  { %v1322_v46 = vrot.slane %v1321_v3, 2  ;;  %v1273_v49 = vsub.f32 %v1150_v35, %v1223_v23  ;;  %v1274_v50 = vsub.f32 %v1153_v27, %v1223_v23  ;;  %v1227_v10 = vrot.slane %v1226_v26, 4 }
 0x29f   :  { %v3946_v13 = vpop.f32.mrb[48].mxu0 }
 0x2a0   :  { %v4955_v44 = vpop.eup %4286  ;;  %v1293_v47 = vmul.f32 1.442695, %v1273_v49  ;;  %v1295_v17 = vmul.f32 1.442695, %v1274_v50  ;;  %v1228_v9 = vmax.f32 %v1226_v26, %v1227_v10  ;;  %v3947_v12 = vpop.f32.mrb[49].mxu0  ;;  %v1323_v20 = vadd.f32 %v1322_v46, %v1321_v3 }
 0x2a1   :  { %v4957_v11 = vpop.eup %4288  ;;  %v1326_v14 = vsel %vm1196_vm0, %v4955_v44, 0.0  ;;  %v3948_v32 = vadd.f32 %v3947_v12, %v3946_v13  ;;  %v3949_v36 = vpop.f32.mrb[50].mxu0 }
 0x2a2   :  { %v1327_v35 = vsel %vm1196_vm0, %v4957_v11, 0.0  ;;  %4290 = vpow2.f32 %v1293_v47  ;;  %v1229_v30 = vrot.slane %v1228_v9, 2  ;;  %v3950_v33 = vpop.f32.mrb[51].mxu0  ;;  %v1324_v27 = vrot.slane %v1323_v20, 1 }
 0x2a3   :  { %v1328_v53 = vadd.f32 %v1327_v35, %v1326_v14  ;;  %4292 = vpow2.f32 %v1295_v17  ;;  %v4963_v56 = vadd.f32 %v3948_v32, %v3884_v8  ;;  %v3951_v57 = vadd.f32 %v3950_v33, %v3949_v36 }
 0x2a4   :  { %v1230_v34 = vmax.f32 %v1228_v9, %v1229_v30  ;;  %v3888_v51 = vpop.f32.mrb[36].mxu1  ;;  %v1325_v38 = vadd.f32 %v1324_v27, %v1323_v20 }
 0x2a5   :  { %v1329_v54 = vrot.slane %v1328_v53, 4  ;;  %v4965_v41 = vadd.f32 %v3951_v57, %v3887_v6  ;;  %v3889_v45 = vpop.f32.mrb[37].mxu1  ;;  %v1233_v24 = vsel %vm1196_vm0, %v4963_v56, -inf }
 0x2a6   :  { %v1231_v48 = vrot.slane %v1230_v34, 1  ;;  %v3890_v2 = vadd.f32 %v3889_v45, %v3888_v51  ;;  %v3891_v18 = vpop.f32.mrb[38].mxu1  ;;  %4294 = vrcp.f32 %v1325_v38 }
 0x2a7   :  { %v1330_v15 = vadd.f32 %v1329_v54, %v1328_v53  ;;  %v1234_v31 = vsel %vm1196_vm0, %v4965_v41, -inf  ;;  %v3892_v21 = vpop.f32.mrb[39].mxu1 }
 0x2a8   :  { %v1232_v22 = vmax.f32 %v1230_v34, %v1231_v48  ;;  %v1235_v39 = vmax.f32 %v1233_v24, %v1234_v31  ;;  %v3893_v43 = vadd.f32 %v3892_v21, %v3891_v18 }
 0x2a9   :  { %v1331_v52 = vrot.slane %v1330_v15, 2 }
 0x2aa   :  { %v1275_v16 = vsub.f32 %v4950_v60, %v1232_v22  ;;  %v1276_v19 = vsub.f32 %v1161_v63, %v1232_v22  ;;  %v1236_v55 = vrot.slane %v1235_v39, 4 }
 0x2ab   :  { %v3952_v59 = vpop.f32.mrb[52].mxu0  ;;  %v1332_v37 = vadd.f32 %v1331_v52, %v1330_v15 }
 0x2ac   :  { %v4972_v40 = vpop.eup %4290  ;;  %v1297_v61 = vmul.f32 1.442695, %v1275_v16  ;;  %v1299_v62 = vmul.f32 1.442695, %v1276_v19  ;;  %v1237_v1 = vmax.f32 %v1235_v39, %v1236_v55  ;;  %v3953_v4 = vpop.f32.mrb[53].mxu0 }
 0x2ad   :  { %v4974_v7 = vpop.eup %4292  ;;  %v1335_v8 = vsel %vm1196_vm0, %v4972_v40, 0.0  ;;  %v3954_v58 = vadd.f32 %v3953_v4, %v3952_v59  ;;  %v3955_v25 = vpop.f32.mrb[54].mxu0  ;;  %v1333_v28 = vrot.slane %v1332_v37, 1 }
 0x2ae   :  { %v1336_v60 = vsel %vm1196_vm0, %v4974_v7, 0.0  ;;  %4296 = vpow2.f32 %v1297_v61  ;;  %v1238_v63 = vrot.slane %v1237_v1, 2  ;;  %v3956_v29 = vpop.f32.mrb[55].mxu0 }
 0x2af   :  { %v1337_v3 = vadd.f32 %v1336_v60, %v1335_v8  ;;  %4298 = vpow2.f32 %v1299_v62  ;;  %v4980_v23 = vadd.f32 %v3954_v58, %v3890_v2  ;;  %v3957_v26 = vadd.f32 %v3956_v29, %v3955_v25 }
 0x2b0   :  { %v4295_v6 = vpop.eup %4294  ;;  %v1239_v46 = vmax.f32 %v1237_v1, %v1238_v63  ;;  %v3894_v49 = vpop.f32.mrb[40].mxu1  ;;  %v1334_v50 = vadd.f32 %v1333_v28, %v1332_v37 }
 0x2b1   :  { %v1338_v10 = vrot.slane %v1337_v3, 4  ;;  %v4982_v13 = vadd.f32 %v3957_v26, %v3893_v43  ;;  %v3895_v47 = vpop.f32.mrb[41].mxu1  ;;  %v4985_v17 = vmul.f32 %v4295_v6, %v4942_v42  ;;  %v4988_v14 = vmul.f32 %v4295_v6, %v4944_v5 }
 0x2b2   :  { %v1240_v9 = vrot.slane %v1239_v46, 1  ;;  %v3896_v12 = vadd.f32 %v3895_v47, %v3894_v49  ;;  %v3897_v20 = vpop.f32.mrb[42].mxu1  ;;  %4300 = vrcp.f32 %v1334_v50  ;;  %v1242_v36 = vsel %vm1196_vm0, %v4980_v23, -inf }
 0x2b3   :  { %v1339_v32 = vadd.f32 %v1338_v10, %v1337_v3  ;;  %v1243_v35 = vsel %vm1196_vm0, %v4982_v13, -inf  ;;  %1437 = vrot.lane.b32.xlu0 %v4985_v17, %s4409_s2  ;;  %v3898_v42 = vpop.f32.mrb[43].mxu1 }
 0x2b4   :  { %v1241_v30 = vmax.f32 %v1239_v46, %v1240_v9  ;;  %v1244_v33 = vmax.f32 %v1242_v36, %v1243_v35  ;;  %v3899_v27 = vadd.f32 %v3898_v42, %v3897_v20  ;;  %v6077_v46 = vmov 1  }
 0x2b5   :  { %v1340_v53 = vrot.slane %v1339_v32, 2  ;;  %4131 = vset.pattern.permute.xlu1 %v6077_v46 }
 0x2b6   :  { %v1277_v5 = vsub.f32 %v4963_v56, %v1241_v30  ;;  %v1278_v57 = vsub.f32 %v4965_v41, %v1241_v30  ;;  %v1245_v34 = vrot.slane %v1244_v33, 4 }
 0x2b7   :  { %1439 = vrot.lane.b32.xlu0 %v4988_v14, %s4409_s2  ;;  %v3958_v51 = vpop.f32.mrb[56].mxu0  ;;  %v1341_v38 = vadd.f32 %v1340_v53, %v1339_v32 }
 0x2b8   :  { %v5000_v54 = vpop.eup %4296  ;;  %v1301_v45 = vmul.f32 1.442695, %v1277_v5  ;;  %v1303_v48 = vmul.f32 1.442695, %v1278_v57  ;;  %v1246_v2 = vmax.f32 %v1244_v33, %v1245_v34  ;;  %v3959_v18 = vpop.f32.mrb[57].mxu0 }
 0x2b9   :  { %v5002_v15 = vpop.eup %4298  ;;  %v1344_v24 = vsel %vm1196_vm0, %v5000_v54, 0.0  ;;  %v3960_v56 = vadd.f32 %v3959_v18, %v3958_v51  ;;  %v3961_v31 = vpop.f32.mrb[58].mxu0  ;;  %v1342_v41 = vrot.slane %v1341_v38, 1 }
 0x2ba   :  { %v1345_v21 = vsel %vm1196_vm0, %v5002_v15, 0.0  ;;  %4302 = vpow2.f32 %v1301_v45  ;;  %v1247_v22 = vrot.slane %v1246_v2, 2  ;;  %v3962_v39 = vpop.f32.mrb[59].mxu0 }
 0x2bb   :  { %v1346_v43 = vadd.f32 %v1345_v21, %v1344_v24  ;;  %4304 = vpow2.f32 %v1303_v48  ;;  %v5008_v52 = vadd.f32 %v3960_v56, %v3896_v12  ;;  %v3963_v16 = vadd.f32 %v3962_v39, %v3961_v31  ;;  %1501 = vrot.lane.b32.xlu0 %v4985_v17, %s4410_s11 }
 0x2bc   :  { %v4301_v19 = vpop.eup %4300  ;;  %v1248_v55 = vmax.f32 %v1246_v2, %v1247_v22  ;;  %v3900_v59 = vpop.f32.mrb[44].mxu1  ;;  %v1343_v37 = vadd.f32 %v1342_v41, %v1341_v38 }
 0x2bd   :  { %v1347_v61 = vrot.slane %v1346_v43, 4  ;;  %v5012_v62 = vadd.f32 %v3963_v16, %v3899_v27  ;;  %v3901_v1 = vpop.f32.mrb[45].mxu1  ;;  %v5015_v4 = vmul.f32 %v4301_v19, %v4955_v44  ;;  %v5018_v28 = vmul.f32 %v4301_v19, %v4957_v11 }
 0x2be   :  { %v1249_v8 = vrot.slane %v1248_v55, 1  ;;  %v3902_v58 = vadd.f32 %v3901_v1, %v3900_v59  ;;  %v3903_v25 = vpop.f32.mrb[46].mxu1  ;;  %4306 = vrcp.f32 %v1343_v37  ;;  %v1251_v63 = vsel %vm1196_vm0, %v5008_v52, -inf }
 0x2bf   :  { %v1348_v60 = vadd.f32 %v1347_v61, %v1346_v43  ;;  %v1252_v29 = vsel %vm1196_vm0, %v5012_v62, -inf  ;;  %1503 = vrot.lane.b32.xlu0 %v4988_v14, %s4410_s11  ;;  %v3904_v3 = vpop.f32.mrb[47].mxu1 }
 0x2c0   :  { %v1250_v44 = vmax.f32 %v1248_v55, %v1249_v8  ;;  %v1253_v26 = vmax.f32 %v1251_v63, %v1252_v29  ;;  %v3905_v6 = vadd.f32 %v3904_v3, %v3903_v25 }
 0x2c1   :  { %v1349_v11 = vrot.slane %v1348_v60, 2 }
 0x2c2   :  { %v1279_v49 = vsub.f32 %v4980_v23, %v1250_v44  ;;  %v1280_v50 = vsub.f32 %v4982_v13, %v1250_v44  ;;  %v1254_v10 = vrot.slane %v1253_v26, 4 }
 0x2c3   :  { %1565 = vrot.lane.b32.xlu0 %v4985_v17, %s4412_s5  ;;  %v3964_v47 = vpop.f32.mrb[60].mxu0  ;;  %v1350_v9 = vadd.f32 %v1349_v11, %v1348_v60  ;;  %v5078_v60 = vld [vmem:[%s6073_s4 + $0x8] sm:$0xff] }
 0x2c4   :  { %v5031_v12 = vpop.eup %4302  ;;  %v1305_v20 = vmul.f32 1.442695, %v1279_v49  ;;  %v1307_v32 = vmul.f32 1.442695, %v1280_v50  ;;  %v1255_v36 = vmax.f32 %v1253_v26, %v1254_v10  ;;  %v3965_v35 = vpop.f32.mrb[61].mxu0 }
 0x2c5   :  { %v5033_v42 = vpop.f32.mrb[48].mxu1  ;;  %v5035_v30 = vpop.eup %4304  ;;  %v1353_v23 = vsel %vm1196_vm0, %v5031_v12, 0.0  ;;  %v3966_v13 = vadd.f32 %v3965_v35, %v3964_v47  ;;  %v1351_v27 = vrot.slane %v1350_v9, 1 }
 0x2c6   :  { %v3967_v33 = vpop.f32.mrb[62].mxu0  ;;  %v5039_v53 = vpop.f32.mrb[49].mxu1  ;;  %v1354_v5 = vsel %vm1196_vm0, %v5035_v30, 0.0  ;;  %4308 = vpow2.f32 %v1305_v20  ;;  %v1256_v57 = vrot.slane %v1255_v36, 2 }
 0x2c7   :  { %v3968_v34 = vpop.f32.mrb[63].mxu0  ;;  %v5043_v51 = vpop.f32.mrb[50].mxu1  ;;  %v1355_v38 = vadd.f32 %v1354_v5, %v1353_v23  ;;  %4310 = vpow2.f32 %v1307_v32  ;;  %v5045_v45 = vadd.f32 %v3966_v13, %v3902_v58  ;;  %1567 = vrot.lane.b32.xlu0 %v4988_v14, %s4412_s5  ;;  %v1352_v56 = vadd.f32 %v1351_v27, %v1350_v9 }
 0x2c8   :  { %v3969_v48 = vadd.f32 %v3968_v34, %v3967_v33  ;;  %v5049_v2 = vpop.f32.mrb[51].mxu1  ;;  %v4307_v18 = vpop.eup %4306  ;;  %v1257_v24 = vmax.f32 %v1255_v36, %v1256_v57 }
 0x2c9   :  { %v1356_v31 = vrot.slane %v1355_v38, 4  ;;  %v5054_v21 = vmul.f32 %v4307_v18, %v4972_v40  ;;  %v5057_v39 = vmul.f32 %v4307_v18, %v4974_v7  ;;  %4312 = vrcp.f32 %v1352_v56  ;;  %v5068_v40 = vld [vmem:[%s6073_s4] sm:$0xff] }
 0x2ca   :  { %v5051_v41 = vadd.f32 %v3969_v48, %v3905_v6  ;;  %v1258_v22 = vrot.slane %v1257_v24, 1  ;;  %v1260_v16 = vsel %vm1196_vm0, %v5045_v45, -inf }
 0x2cb   :  { %v1357_v43 = vadd.f32 %v1356_v31, %v1355_v38  ;;  %1441 = vrot.lane.b32.xlu0 %v5015_v4, %s4409_s2 }
 0x2cc   :  { %v1261_v19 = vsel %vm1196_vm0, %v5051_v41, -inf  ;;  %v1259_v55 = vmax.f32 %v1257_v24, %v1258_v22  ;;  %v4056_v7 = vpop.f32.mrb[52].mxu1 }
 0x2cd   :  { %v1262_v59 = vmax.f32 %v1260_v16, %v1261_v19  ;;  %v1358_v37 = vrot.slane %v1357_v43, 2  ;;  %v5071_v61 = vmul.f32 %v4056_v7, %v5068_v40  ;;  %v1751_v1 = vpop.f32.mrb[53].mxu1 }
 0x2ce   :  { %v1281_v8 = vsub.f32 %v5008_v52, %v1259_v55  ;;  %v1282_v58 = vsub.f32 %v5012_v62, %v1259_v55  ;;  %v5081_v63 = vmul.f32 %v5068_v40, %v1751_v1  ;;  %v4057_v29 = vpop.f32.mrb[54].mxu1 }
 0x2cf   :  { %v1263_v25 = vrot.slane %v1262_v59, 4  ;;  %1443 = vrot.lane.b32.xlu0 %v5018_v28, %s4409_s2  ;;  %v1359_v3 = vadd.f32 %v1358_v37, %v1357_v43  ;;  %v5086_v44 = vmul.f32 %v4057_v29, %v5078_v60  ;;  %v1754_v52 = vpop.f32.mrb[55].mxu1 }
 0x2d0   :  { %v5088_v26 = vpop.eup %4308  ;;  %v1309_v62 = vmul.f32 1.442695, %v1281_v8  ;;  %v1311_v6 = vmul.f32 1.442695, %v1282_v58  ;;  %v5091_v49 = vmul.f32 %v5078_v60, %v1754_v52 }
 0x2d1   :  { %6087 = vst [vmem:[#allocation11_spill] sm:$0xff] %v5086_v44  ;;  %v1264_v11 = vmax.f32 %v1262_v59, %v1263_v25  ;;  %v5093_v50 = vpop.eup %4310  ;;  %v1362_v10 = vsel %vm1196_vm0, %v5088_v26, 0.0  ;;  %v1360_v47 = vrot.slane %v1359_v3, 1 }
 0x2d2   :  { %v1363_v9 = vsel %vm1196_vm0, %v5093_v50, 0.0  ;;  %4314 = vpow2.f32 %v1309_v62 }
 0x2d3   :  { %v1265_v20 = vrot.slane %v1264_v11, 2  ;;  %v1364_v32 = vadd.f32 %v1363_v9, %v1362_v10  ;;  %4316 = vpow2.f32 %v1311_v6  ;;  %1505 = vrot.lane.b32.xlu0 %v5015_v4, %s4410_s11  ;;  %v1361_v36 = vadd.f32 %v1360_v47, %v1359_v3  ;;  %v4313_v35 = vpop.eup %4312 }
 0x2d4   :  { %v4060_v13 = vpop.f32.mrb[56].mxu1  ;;  %v5102_v27 = vmul.f32 %v4313_v35, %v5000_v54  ;;  %v5105_v5 = vmul.f32 %v4313_v35, %v5002_v15 }
 0x2d5   :  { %v1266_v23 = vmax.f32 %v1264_v11, %v1265_v20  ;;  %v1365_v33 = vrot.slane %v1364_v32, 4  ;;  %4318 = vrcp.f32 %v1361_v36  ;;  %v1767_v57 = vpop.f32.mrb[57].mxu1  ;;  %v5108_v38 = vmul.f32 %v4060_v13, %v5068_v40 }
 0x2d6   :  { %v5111_v48 = vmul.f32 %v5068_v40, %v1767_v57  ;;  %v4061_v18 = vpop.f32.mrb[58].mxu1 }
 0x2d7   :  { %v1267_v34 = vrot.slane %v1266_v23, 1  ;;  %v1366_v24 = vadd.f32 %v1365_v33, %v1364_v32  ;;  %1507 = vrot.lane.b32.xlu0 %v5018_v28, %s4410_s11  ;;  %v5116_v56 = vmul.f32 %v4061_v18, %v5078_v60  ;;  %v1770_v54 = vpop.f32.mrb[59].mxu1 }
 0x2d8   :  { %v5119_v15 = vmul.f32 %v5078_v60, %v1770_v54 }
 0x2d9   :  { %v1268_v31 = vmax.f32 %v1266_v23, %v1267_v34  ;;  %v1367_v22 = vrot.slane %v1366_v24, 2 }
 0x2db   :  { %v1283_v43 = vsub.f32 %v5045_v45, %v1268_v31  ;;  %v1284_v16 = vsub.f32 %v5051_v41, %v1268_v31  ;;  %1569 = vrot.lane.b32.xlu0 %v5015_v4, %s4412_s5  ;;  %v1368_v19 = vadd.f32 %v1367_v22, %v1366_v24 }
 0x2dc   :  { %v4315_v55 = vpop.eup %4314  ;;  %v4064_v37 = vpop.f32.mrb[60].mxu1 }
 0x2dd   :  { %v1313_v59 = vmul.f32 1.442695, %v1283_v43  ;;  %v1315_v7 = vmul.f32 1.442695, %v1284_v16  ;;  %v4317_v1 = vpop.eup %4316  ;;  %v1371_v8 = vsel %vm1196_vm0, %v4315_v55, 0.0  ;;  %v1369_v58 = vrot.slane %v1368_v19, 1 }
 0x2de   :  { %v5127_v25 = vmul.f32 %v4064_v37, %v5068_v40  ;;  %v1783_v29 = vpop.f32.mrb[61].mxu1  ;;  %v1372_v45 = vsel %vm1196_vm0, %v4317_v1, 0.0 }
 0x2df   :  { %4320 = vpow2.f32 %v1313_v59  ;;  %v5131_v41 = vmul.f32 %v5068_v40, %v1783_v29  ;;  %v4065_v3 = vpop.f32.mrb[62].mxu1  ;;  %v4319_v52 = vpop.eup %4318  ;;  %v1373_v62 = vadd.f32 %v1372_v45, %v1371_v8  ;;  %1571 = vrot.lane.b32.xlu0 %v5018_v28, %s4412_s5  ;;  %v1370_v6 = vadd.f32 %v1369_v58, %v1368_v19 }
 0x2e0   :  { %6088 = vst [vmem:[#allocation12_spill] sm:$0xff] %v5127_v25  ;;  %4322 = vpow2.f32 %v1315_v7  ;;  %v5136_v11 = vmul.f32 %v4065_v3, %v5078_v60  ;;  %v1786_v10 = vpop.f32.mrb[63].mxu1  ;;  %v5139_v47 = vmul.f32 %v4319_v52, %v5031_v12  ;;  %v5142_v9 = vmul.f32 %v4319_v52, %v5035_v30 }
 0x2e1   :  { %v5145_v20 = vmul.f32 %v5078_v60, %v1786_v10  ;;  %v1374_v32 = vrot.slane %v1373_v62, 4  ;;  %4324 = vrcp.f32 %v1370_v6 }
 0x2e2   :  { %6089 = vst [vmem:[#allocation13_spill] sm:$0xff] %v5136_v11  ;;  %1453 = vrot.lane.b32.xlu1 %v5139_v47, %s4409_s2 }
 0x2e3   :  { %6090 = vst [vmem:[#allocation14_spill] sm:$0xff] %v5145_v20  ;;  %v1375_v36 = vadd.f32 %v1374_v32, %v1373_v62  ;;  %1445 = vrot.lane.b32.xlu0 %v5054_v21, %s4409_s2 }
 0x2e5   :  { %v1376_v35 = vrot.slane %v1375_v36, 2 }
 0x2e6   :  { %1455 = vrot.lane.b32.xlu1 %v5142_v9, %s4409_s2 }
 0x2e7   :  { %1447 = vrot.lane.b32.xlu0 %v5057_v39, %s4409_s2  ;;  %v1377_v12 = vadd.f32 %v1376_v35, %v1375_v36  ;;  %v6080_v35 = vmov 3  }
 0x2e9   :  { %v4321_v30 = vpop.eup %4320  ;;  %v1378_v33 = vrot.slane %v1377_v12, 1 }
 0x2ea   :  { %v4323_v23 = vpop.eup %4322  ;;  %v1380_v13 = vsel %vm1196_vm0, %v4321_v30, 0.0  ;;  %1517 = vrot.lane.b32.xlu1 %v5139_v47, %s4410_s11 }
 0x2eb   :  { %v1381_v57 = vsel %vm1196_vm0, %v4323_v23, 0.0  ;;  %v4325_v34 = vpop.eup %4324  ;;  %1509 = vrot.lane.b32.xlu0 %v5054_v21, %s4410_s11  ;;  %v1379_v24 = vadd.f32 %v1378_v33, %v1377_v12  ;;  %v6079_v33 = vmov 2  }
 0x2ec   :  { %v1382_v18 = vadd.f32 %v1381_v57, %v1380_v13  ;;  %v5162_v54 = vmul.f32 %v4325_v34, %v5088_v26  ;;  %v5165_v31 = vmul.f32 %v4325_v34, %v5093_v50 }
 0x2ed   :  { %4326 = vrcp.f32 %v1379_v24 }
 0x2ee   :  { %v1383_v22 = vrot.slane %v1382_v18, 4  ;;  %1519 = vrot.lane.b32.xlu1 %v5142_v9, %s4410_s11 }
 0x2ef   :  { %1511 = vrot.lane.b32.xlu0 %v5057_v39, %s4410_s11 }
 0x2f0   :  { %v1384_v43 = vadd.f32 %v1383_v22, %v1382_v18 }
 0x2f2   :  { %v1385_v16 = vrot.slane %v1384_v43, 2  ;;  %1581 = vrot.lane.b32.xlu1 %v5139_v47, %s4412_s5 }
 0x2f3   :  { %1573 = vrot.lane.b32.xlu0 %v5054_v21, %s4412_s5 }
 0x2f4   :  { %v1386_v26 = vadd.f32 %v1385_v16, %v1384_v43 }
 0x2f6   :  { %v1387_v19 = vrot.slane %v1386_v26, 1  ;;  %1583 = vrot.lane.b32.xlu1 %v5142_v9, %s4412_s5 }
 0x2f7   :  { %v4327_v50 = vpop.eup %4326  ;;  %1575 = vrot.lane.b32.xlu0 %v5057_v39, %s4412_s5 }
 0x2f8   :  { %v1388_v59 = vadd.f32 %v1387_v19, %v1386_v26  ;;  %v5179_v7 = vmul.f32 %v4327_v50, %v4315_v55  ;;  %v5181_v37 = vmul.f32 %v4327_v50, %v4317_v1 }
 0x2fa   :  { %4328 = vrcp.f32 %v1388_v59  ;;  %1457 = vrot.lane.b32.xlu1 %v5162_v54, %s4409_s2 }
 0x2fb   :  { %1449 = vrot.lane.b32.xlu0 %v5102_v27, %s4409_s2 }
 0x2fe   :  { %1459 = vrot.lane.b32.xlu1 %v5165_v31, %s4409_s2 }
 0x2ff   :  { %1451 = vrot.lane.b32.xlu0 %v5105_v5, %s4409_s2 }
 0x302   :  { %1521 = vrot.lane.b32.xlu1 %v5162_v54, %s4410_s11 }
 0x303   :  { %1513 = vrot.lane.b32.xlu0 %v5102_v27, %s4410_s11 }
 0x304   :  { %v4329_v55 = vpop.eup %4328 }
 0x305   :  { %v5195_v1 = vmul.f32 %v4329_v55, %v4321_v30  ;;  %v5197_v8 = vmul.f32 %v4329_v55, %v4323_v23 }
 0x306   :  { %1523 = vrot.lane.b32.xlu1 %v5165_v31, %s4410_s11 }
 0x307   :  { %1515 = vrot.lane.b32.xlu0 %v5105_v5, %s4410_s11 }
 0x30a   :  { %1585 = vrot.lane.b32.xlu1 %v5162_v54, %s4412_s5 }
 0x30b   :  { %1577 = vrot.lane.b32.xlu0 %v5102_v27, %s4412_s5 }
 0x30e   :  { %1587 = vrot.lane.b32.xlu1 %v5165_v31, %s4412_s5 }
 0x30f   :  { %1579 = vrot.lane.b32.xlu0 %v5105_v5, %s4412_s5 }
 0x312   :  { %1461 = vrot.lane.b32.xlu1 %v5179_v7, %s4409_s2 }
 0x316   :  { %1463 = vrot.lane.b32.xlu1 %v5181_v37, %s4409_s2 }
 0x31a   :  { %1525 = vrot.lane.b32.xlu1 %v5179_v7, %s4410_s11 }
 0x31e   :  { %1527 = vrot.lane.b32.xlu1 %v5181_v37, %s4410_s11 }
 0x322   :  { %1589 = vrot.lane.b32.xlu1 %v5179_v7, %s4412_s5 }
 0x325   :  { %v1438_v58 = vpop.permute.xlu0 %1437 }
 0x326   :  { %1591 = vrot.lane.b32.xlu1 %v5181_v37, %s4412_s5  ;;  %v1485_v52 = vadd.f32 %v1438_v58, %v4985_v17 }
 0x329   :  { %v1440_v29 = vpop.permute.xlu0 %1439 }
 0x32a   :  { %1465 = vrot.lane.b32.xlu1 %v5195_v1, %s4409_s2  ;;  %v1486_v36 = vadd.f32 %v1440_v29, %v4988_v14 }
 0x32d   :  { %v1502_v45 = vpop.permute.xlu0 %1501 }
 0x32e   :  { %1467 = vrot.lane.b32.xlu1 %v5197_v8, %s4409_s2  ;;  %v1549_v62 = vadd.f32 %v1502_v45, %v1485_v52 }
 0x331   :  { %v1504_v3 = vpop.permute.xlu0 %1503 }
 0x332   :  { %1529 = vrot.lane.b32.xlu1 %v5195_v1, %s4410_s11  ;;  %v1550_v12 = vadd.f32 %v1504_v3, %v1486_v36 }
 0x335   :  { %v1566_v6 = vpop.permute.xlu0 %1565 }
 0x336   :  { %v1613_v10 = vadd.f32 %v1566_v6, %v1549_v62  ;;  %1531 = vrot.lane.b32.xlu1 %v5197_v8, %s4410_s11 }
 0x338   :  { %1818 = vperm.xlu0 %4130, %v1613_v10  }
 0x339   :  { %v1568_v32 = vpop.permute.xlu0 %1567 }
 0x33a   :  { %1593 = vrot.lane.b32.xlu1 %v5195_v1, %s4412_s5  ;;  %v1614_v30 = vadd.f32 %v1568_v32, %v1550_v12 }
 0x33c   :  { %4133 = vset.pattern.permute.xlu0 %v6080_v35 }
 0x33d   :  { %2890 = vperm.xlu0 %4133, %v1613_v10   ;;  %v1442_v17 = vpop.permute.xlu0 %1441 }
 0x33e   :  { %1595 = vrot.lane.b32.xlu1 %v5197_v8, %s4412_s5  ;;  %v1487_v57 = vadd.f32 %v1442_v17, %v5015_v4 }
 0x341   :  { %4135 = vset.pattern.permute.xlu0 %v6077_v46  ;;  %v1444_v23 = vpop.permute.xlu0 %1443 }
 0x342   :  { %2190 = vperm.xlu0 %4135, %v1614_v30   ;;  %2186 = vperm.xlu1 %4131, %v1613_v10   ;;  %v1488_v24 = vadd.f32 %v1444_v23, %v5018_v28 }
 0x345   :  { %v1506_v13 = vpop.permute.xlu0 %1505 }
 0x346   :  { %4132 = vset.pattern.permute.xlu1 %v6079_v33  ;;  %4140 = vset.pattern.permute.xlu0 %v6079_v33  ;;  %v1551_v34 = vadd.f32 %v1506_v13, %v1487_v57 }
 0x347   :  { %2538 = vperm.xlu1 %4132, %v1613_v10  }
 0x349   :  { %v1508_v14 = vpop.permute.xlu0 %1507 }
 0x34a   :  { %v1552_v43 = vadd.f32 %v1508_v14, %v1488_v24  ;;  %v4275_v14 = vld [vmem:[#allocation5 + $0x8] sm:$0xff]  }
 0x34b   :  { %4134 = vset.pattern.permute.xlu1 %v6082_v0 }
 0x34c   :  { %1823 = vperm.xlu1 %4134, %v1614_v30  }
 0x34d   :  { %v1570_v18 = vpop.permute.xlu0 %1569 }
 0x34e   :  { %v1615_v22 = vadd.f32 %v1570_v18, %v1551_v34 }
 0x350   :  { %2546 = vperm.xlu0 %4140, %v1615_v22   ;;  %4136 = vset.pattern.permute.xlu1 %v6079_v33 }
 0x351   :  { %v1572_v16 = vpop.permute.xlu0 %1571  ;;  %2542 = vperm.xlu1 %4136, %v1614_v30  }
 0x352   :  { %v1616_v26 = vadd.f32 %v1572_v16, %v1552_v43 }
 0x354   :  { %v5245_v19 = vpop.permute.xlu1 %1453  ;;  %4142 = vset.pattern.permute.xlu0 %v6082_v0 }
 0x355   :  { %1833 = vperm.xlu0 %4142, %v1616_v26   ;;  %v1446_v4 = vpop.permute.xlu0 %1445  ;;  %4137 = vset.pattern.permute.xlu1 %v6080_v35 }
 0x356   :  { %2894 = vperm.xlu1 %4137, %v1614_v30   ;;  %v1489_v45 = vadd.f32 %v1446_v4, %v5054_v21  ;;  %v4274_v30 = vld [vmem:[#allocation5] sm:$0xff]  }
 0x357   :  { %4066 = vmatprep.subr.bf16.mxu0 %v4274_v30  ;;  %4098 = vmatprep.subr.bf16.mxu1 %v4274_v30 }
 0x358   :  { %v5249_v50 = vpop.permute.xlu1 %1455  ;;  %4067 = vmatpush3.bf16.msra.mxu0 %v4274_v30  ;;  %4106 = vmatpush3.bf16.msra.mxu1 %v4274_v30 }
 0x359   :  { %4145 = vset.pattern.permute.xlu0 %v6080_v35  ;;  %v1448_v28 = vpop.permute.xlu0 %1447  ;;  %4068 = vmatprep.subr.bf16.mxu0 %v4275_v14 }
 0x35a   :  { %2902 = vperm.xlu0 %4145, %v1616_v26   ;;  %4138 = vset.pattern.permute.xlu1 %v6082_v0  ;;  %v1490_v6 = vadd.f32 %v1448_v28, %v5057_v39 }
 0x35b   :  { %1828 = vperm.xlu1 %4138, %v1615_v22   ;;  %4099 = vmatprep.subr.bf16.mxu1 %v4275_v14 }
 0x35c   :  { %v5253_v59 = vpop.permute.xlu1 %1517  ;;  %4069 = vmatpush3.bf16.msra.mxu0 %v4275_v14  ;;  %4107 = vmatpush3.bf16.msra.mxu1 %v4275_v14 }
 0x35d   :  { %v1510_v55 = vpop.permute.xlu0 %1509 }
 0x35e   :  { %4148 = vset.pattern.permute.xlu0 %v6079_v33  ;;  %v1553_v3 = vadd.f32 %v1510_v55, %v1489_v45 }
 0x35f   :  { %4139 = vset.pattern.permute.xlu1 %v6077_v46 }
 0x360   :  { %v5257_v58 = vpop.permute.xlu1 %1519  ;;  %2194 = vperm.xlu1 %4139, %v1615_v22  }
 0x361   :  { %v1512_v29 = vpop.permute.xlu0 %1511 }
 0x362   :  { %v1554_v32 = vadd.f32 %v1512_v29, %v1490_v6  ;;  %v4276_v6 = vld [vmem:[#allocation5 + $0x10] sm:$0xff]  }
 0x363   :  { %4070 = vmatprep.subr.bf16.mxu0 %v4276_v6  ;;  %4100 = vmatprep.subr.bf16.mxu1 %v4276_v6 }
 0x364   :  { %v5260_v52 = vpop.permute.xlu1 %1581  ;;  %4141 = vset.pattern.permute.xlu1 %v6080_v35  ;;  %4071 = vmatpush3.bf16.msra.mxu0 %v4276_v6 }
 0x365   :  { %v1574_v62 = vpop.permute.xlu0 %1573  ;;  %2898 = vperm.xlu1 %4141, %v1615_v22   ;;  %4108 = vmatpush3.bf16.msra.mxu1 %v4276_v6 }
 0x366   :  { %v1617_v10 = vadd.f32 %v1574_v62, %v1553_v3 }
 0x368   :  { %v5264_v36 = vpop.permute.xlu1 %1583  ;;  %2554 = vperm.xlu0 %4148, %v1617_v10  }
 0x369   :  { %v1576_v17 = vpop.permute.xlu0 %1575  ;;  %4143 = vset.pattern.permute.xlu1 %v6077_v46 }
 0x36a   :  { %v1618_v12 = vadd.f32 %v1576_v17, %v1554_v32  ;;  %2198 = vperm.xlu1 %4143, %v1616_v26  }
 0x36c   :  { %v5267_v21 = vpop.permute.xlu1 %1457  ;;  %4150 = vset.pattern.permute.xlu0 %v6082_v0 }
 0x36d   :  { %1843 = vperm.xlu0 %4150, %v1618_v12   ;;  %v1450_v23 = vpop.permute.xlu0 %1449  ;;  %v1495_v17 = vadd.f32 %v5267_v21, %v5162_v54 }
 0x36e   :  { %4144 = vset.pattern.permute.xlu1 %v6079_v33  ;;  %v1491_v22 = vadd.f32 %v1450_v23, %v5102_v27  ;;  %v1493_v27 = vadd.f32 %v5245_v19, %v5139_v47  ;;  %v1494_v47 = vadd.f32 %v5249_v50, %v5142_v9  ;;  %v4278_v23 = vld [vmem:[#allocation5 + $0x20] sm:$0xff]  }
 0x36f   :  { %2550 = vperm.xlu1 %4144, %v1616_v26  }
 0x370   :  { %v5271_v39 = vpop.permute.xlu1 %1459  ;;  %v1558_v19 = vadd.f32 %v5257_v58, %v1494_v47 }
 0x371   :  { %4153 = vset.pattern.permute.xlu0 %v6080_v35  ;;  %v1452_v13 = vpop.permute.xlu0 %1451  ;;  %v1496_v54 = vadd.f32 %v5271_v39, %v5165_v31  ;;  %v4280_v39 = vld [vmem:[#allocation5 + $0x30] sm:$0xff]  }
 0x372   :  { %2910 = vperm.xlu0 %4153, %v1618_v12   ;;  %v1492_v4 = vadd.f32 %v1452_v13, %v5105_v5  ;;  %v1557_v5 = vadd.f32 %v5253_v59, %v1493_v27  ;;  %v4279_v13 = vld [vmem:[#allocation5 + $0x28] sm:$0xff]  }
 0x373   :  { %4146 = vset.pattern.permute.xlu1 %v6082_v0 }
 0x374   :  { %v1522_v57 = vpop.permute.xlu1 %1521  ;;  %1838 = vperm.xlu1 %4146, %v1617_v10  }
 0x375   :  { %v1514_v34 = vpop.permute.xlu0 %1513  ;;  %v1559_v9 = vadd.f32 %v1522_v57, %v1495_v17 }
 0x376   :  { %4155 = vset.pattern.permute.xlu0 %v6077_v46  ;;  %v1555_v43 = vadd.f32 %v1514_v34, %v1491_v22  ;;  %v4281_v22 = vld [vmem:[#allocation5 + $0x38] sm:$0xff]  }
 0x378   :  { %v5276_v18 = vpop.permute.xlu1 %1523  ;;  %4147 = vset.pattern.permute.xlu1 %v6077_v46 }
 0x379   :  { %v1516_v24 = vpop.permute.xlu0 %1515  ;;  %2202 = vperm.xlu1 %4147, %v1617_v10   ;;  %v1560_v30 = vadd.f32 %v5276_v18, %v1496_v54 }
 0x37a   :  { %v1556_v55 = vadd.f32 %v1516_v24, %v1492_v4 }
 0x37c   :  { %v1586_v16 = vpop.permute.xlu1 %1585 }
 0x37d   :  { %v1578_v26 = vpop.permute.xlu0 %1577  ;;  %4149 = vset.pattern.permute.xlu1 %v6080_v35  ;;  %v5310_v58 = vadd.f32 %v1586_v16, %v1559_v9 }
 0x37e   :  { %v1619_v28 = vadd.f32 %v1578_v26, %v1555_v43  ;;  %2906 = vperm.xlu1 %4149, %v1617_v10   ;;  %v5292_v10 = vadd.f32 %v5260_v52, %v1557_v5  ;;  %v5303_v52 = vadd.f32 %v5264_v36, %v1558_v19  ;;  %v4277_v36 = vld [vmem:[#allocation5 + $0x18] sm:$0xff]   ;;  %v1800_v5 = vmul.f32 %v5068_v40, %v5039_v53 }
 0x37f   :  { %4072 = vmatprep.subr.bf16.mxu0 %v4277_v36  ;;  %4101 = vmatprep.subr.bf16.mxu1 %v4277_v36 }
 0x380   :  { %v1588_v29 = vpop.permute.xlu1 %1587  ;;  %2210 = vperm.xlu0 %4155, %v1619_v28   ;;  %4073 = vmatpush3.bf16.msra.mxu0 %v4277_v36 }
 0x381   :  { %v1580_v45 = vpop.permute.xlu0 %1579  ;;  %4109 = vmatpush3.bf16.msra.mxu1 %v4277_v36  ;;  %v5321_v14 = vadd.f32 %v1588_v29, %v1560_v30  ;;  %4074 = vmatprep.subr.bf16.mxu0 %v4278_v23 }
 0x382   :  { %v5282_v3 = vadd.f32 %v1580_v45, %v1556_v55  ;;  %4151 = vset.pattern.permute.xlu1 %v6077_v46  ;;  %4102 = vmatprep.subr.bf16.mxu1 %v4278_v23 }
 0x383   :  { %2206 = vperm.xlu1 %4151, %v1618_v12  }
 0x384   :  { %v1462_v62 = vpop.permute.xlu1 %1461  ;;  %4160 = vset.pattern.permute.xlu0 %v6079_v33  ;;  %4075 = vmatpush3.bf16.msra.mxu0 %v4278_v23 }
 0x385   :  { %2566 = vperm.xlu0 %4160, %v5282_v3   ;;  %v1497_v31 = vadd.f32 %v1462_v62, %v5179_v7  ;;  %4076 = vmatprep.subr.bf16.mxu0 %v4279_v13 }
 0x386   :  { %4110 = vmatpush3.bf16.msra.mxu1 %v4278_v23 }
 0x387   :  { %4152 = vset.pattern.permute.xlu1 %v6079_v33  ;;  %4103 = vmatprep.subr.bf16.mxu1 %v4279_v13 }
 0x388   :  { %v5294_v32 = vpop.permute.xlu1 %1463  ;;  %2558 = vperm.xlu1 %4152, %v1618_v12   ;;  %4077 = vmatpush3.bf16.msra.mxu0 %v4279_v13 }
 0x389   :  { %4162 = vset.pattern.permute.xlu0 %v6077_v46  ;;  %4078 = vmatprep.subr.bf16.mxu0 %v4280_v39  ;;  %v1498_v43 = vadd.f32 %v5294_v32, %v5181_v37 }
 0x38a   :  { %2218 = vperm.xlu0 %4162, %v5292_v10   ;;  %4111 = vmatpush3.bf16.msra.mxu1 %v4279_v13 }
 0x38b   :  { %4104 = vmatprep.subr.bf16.mxu1 %v4280_v39 }
 0x38c   :  { %v1526_v59 = vpop.permute.xlu1 %1525  ;;  %4154 = vset.pattern.permute.xlu1 %v6082_v0  ;;  %4079 = vmatpush3.bf16.msra.mxu0 %v4280_v39 }
 0x38d   :  { %1848 = vperm.xlu1 %4154, %v1619_v28   ;;  %v1561_v34 = vadd.f32 %v1526_v59, %v1497_v31  ;;  %4080 = vmatprep.subr.bf16.mxu0 %v4281_v22 }
 0x38e   :  { %4167 = vset.pattern.permute.xlu0 %v6079_v33  ;;  %4112 = vmatpush3.bf16.msra.mxu1 %v4280_v39 }
 0x38f   :  { %2574 = vperm.xlu0 %4167, %v5303_v52   ;;  %4105 = vmatprep.subr.bf16.mxu1 %v4281_v22 }
 0x390   :  { %v1528_v50 = vpop.permute.xlu1 %1527  ;;  %4081 = vmatpush3.bf16.msra.mxu0 %v4281_v22 }
 0x391   :  { %4156 = vset.pattern.permute.xlu1 %v6079_v33  ;;  %v1562_v26 = vadd.f32 %v1528_v50, %v1498_v43  ;;  %v5378_v43 = vmul.f32 %v5033_v42, %v5068_v40 }
 0x392   :  { %2562 = vperm.xlu1 %4156, %v1619_v28   ;;  %4113 = vmatpush3.bf16.msra.mxu1 %v4281_v22 }
 0x393   :  { %4169 = vset.pattern.permute.xlu0 %v6082_v0 }
 0x394   :  { %v1590_v12 = vpop.permute.xlu1 %1589  ;;  %1868 = vperm.xlu0 %4169, %v5310_v58  }
 0x395   :  { %v5328_v24 = vadd.f32 %v1590_v12, %v1561_v34 }
 0x396   :  { %4157 = vset.pattern.permute.xlu1 %v6080_v35 }
 0x397   :  { %2914 = vperm.xlu1 %4157, %v1619_v28  }
 0x398   :  { %v1592_v21 = vpop.permute.xlu1 %1591  ;;  %4172 = vset.pattern.permute.xlu0 %v6080_v35 }
 0x399   :  { %2930 = vperm.xlu0 %4172, %v5310_v58   ;;  %v5340_v4 = vadd.f32 %v1592_v21, %v1562_v26  ;;  %v5372_v21 = vmul.f32 %v5078_v60, %v5049_v2 }
 0x39b   :  { %4158 = vset.pattern.permute.xlu1 %v6082_v0 }
 0x39c   :  { %1853 = vperm.xlu1 %4158, %v5282_v3   ;;  %v1466_v57 = vpop.permute.xlu1 %1465 }
 0x39d   :  { %4174 = vset.pattern.permute.xlu0 %v6077_v46  ;;  %v1499_v28 = vadd.f32 %v1466_v57, %v5195_v1 }
 0x39e   :  { %2230 = vperm.xlu0 %4174, %v5321_v14  }
 0x3a0   :  { %4159 = vset.pattern.permute.xlu1 %v6077_v46  ;;  %v1468_v18 = vpop.permute.xlu1 %1467 }
 0x3a1   :  { %2214 = vperm.xlu1 %4159, %v5282_v3   ;;  %v1500_v45 = vadd.f32 %v1468_v18, %v5197_v8 }
 0x3a2   :  { %4177 = vset.pattern.permute.xlu0 %v6082_v0 }
 0x3a3   :  { %1878 = vperm.xlu0 %4177, %v5328_v24  }
 0x3a4   :  { %v1530_v7 = vpop.permute.xlu1 %1529 }
 0x3a5   :  { %4161 = vset.pattern.permute.xlu1 %v6082_v0  ;;  %v1563_v55 = vadd.f32 %v1530_v7, %v1499_v28 }
 0x3a6   :  { %1858 = vperm.xlu1 %4161, %v5292_v10  }
 0x3a7   :  { %4180 = vset.pattern.permute.xlu0 %v6080_v35 }
 0x3a8   :  { %2938 = vperm.xlu0 %4180, %v5328_v24   ;;  %v1532_v16 = vpop.permute.xlu1 %1531 }
 0x3a9   :  { %v1564_v1 = vadd.f32 %v1532_v16, %v1500_v45 }
 0x3aa   :  { %4163 = vset.pattern.permute.xlu1 %v6079_v33 }
 0x3ab   :  { %2570 = vperm.xlu1 %4163, %v5292_v10  }
 0x3ac   :  { %4182 = vset.pattern.permute.xlu0 %v6077_v46  ;;  %v1594_v37 = vpop.permute.xlu1 %1593 }
 0x3ad   :  { %2238 = vperm.xlu0 %4182, %v5340_v4   ;;  %v5347_v29 = vadd.f32 %v1594_v37, %v1563_v55  ;;  %v5385_v55 = vmul.f32 %v5043_v51, %v5078_v60 }
 0x3af   :  { %4164 = vset.pattern.permute.xlu1 %v6080_v35 }
 0x3b0   :  { %2922 = vperm.xlu1 %4164, %v5292_v10   ;;  %v1596_v27 = vpop.permute.xlu1 %1595 }
 0x3b1   :  { %4187 = vset.pattern.permute.xlu0 %v6079_v33  ;;  %v5354_v62 = vadd.f32 %v1596_v27, %v1564_v1 }
 0x3b2   :  { %2594 = vperm.xlu0 %4187, %v5347_v29  }
 0x3b4   :  { %4165 = vset.pattern.permute.xlu1 %v6082_v0 }
 0x3b5   :  { %1863 = vperm.xlu1 %4165, %v5303_v52  }
 0x3b6   :  { %4189 = vset.pattern.permute.xlu0 %v6082_v0 }
 0x3b7   :  { %v1819_v6 = vpop.permute.xlu0 %1818  ;;  %1893 = vperm.xlu0 %4189, %v5354_v62  }
 0x3b8   :  { %v1896_v8 = vmul.f32 %v1819_v6, %v1800_v5 }
 0x3b9   :  { %4166 = vset.pattern.permute.xlu1 %v6077_v46 }
 0x3ba   :  { %v1928_v10 = vcombine.high %v1896_v8, %v1896_v8  ;;  %v1961_v32 = vsel %vm1960_vm1, %v1896_v8, 0.0  ;;  %2222 = vperm.xlu1 %4166, %v5303_v52  }
 0x3bb   :  { %v1962_v47 = vrot.slane %v1961_v32, 4  ;;  %4193 = vset.pattern.permute.xlu0 %v6080_v35 }
 0x3bc   :  { %v1968_v19 = vsel %vm1960_vm1, %v1928_v10, 0.0  ;;  %v2891_v53 = vpop.permute.xlu0 %2890  ;;  %2950 = vperm.xlu0 %4193, %v5354_v62  }
 0x3bd   :  { %v1963_v59 = vadd.f32 %v1962_v47, %v1961_v32  ;;  %v1969_v17 = vrot.slane %v1968_v19, 4  ;;  %v2953_v9 = vmul.f32 %v2891_v53, %v1800_v5 }
 0x3be   :  { %4168 = vset.pattern.permute.xlu1 %v6080_v35 }
 0x3bf   :  { %v1964_v50 = vrot.slane %v1963_v59, 2  ;;  %v1970_v12 = vadd.f32 %v1969_v17, %v1968_v19  ;;  %v2985_v36 = vcombine.high %v2953_v9, %v2953_v9  ;;  %v3017_v54 = vsel %vm1960_vm1, %v2953_v9, 0.0  ;;  %2926 = vperm.xlu1 %4168, %v5303_v52  }
 0x3c0   :  { %v3018_v30 = vrot.slane %v3017_v54, 4 }
 0x3c1   :  { %v1965_v23 = vadd.f32 %v1964_v50, %v1963_v59  ;;  %v1971_v13 = vrot.slane %v1970_v12, 2  ;;  %v3024_v57 = vsel %vm1960_vm1, %v2985_v36, 0.0  ;;  %v2191_v31 = vpop.permute.xlu0 %2190  ;;  %v2187_v39 = vpop.permute.xlu1 %2186 }
 0x3c2   :  { %v3019_v34 = vadd.f32 %v3018_v30, %v3017_v54  ;;  %v3025_v18 = vrot.slane %v3024_v57, 4  ;;  %v2250_v7 = vmul.f32 %v2191_v31, %v5372_v21  ;;  %v2249_v22 = vmul.f32 %v2187_v39, %v1800_v5 }
 0x3c3   :  { %v1966_v52 = vrot.slane %v1965_v23, 1  ;;  %v1972_v16 = vadd.f32 %v1971_v13, %v1970_v12  ;;  %4170 = vset.pattern.permute.xlu1 %v6077_v46 }
 0x3c4   :  { %v3020_v2 = vrot.slane %v3019_v34, 2  ;;  %v3026_v26 = vadd.f32 %v3025_v18, %v3024_v57  ;;  %v2282_v28 = vcombine.high %v2250_v7, %v2250_v7  ;;  %v2327_v37 = vsel %vm1960_vm1, %v2250_v7, 0.0  ;;  %2226 = vperm.xlu1 %4170, %v5310_v58  }
 0x3c5   :  { %v1973_v45 = vrot.slane %v1972_v16, 1  ;;  %v2328_v27 = vrot.slane %v2327_v37, 4  ;;  %v2281_v1 = vcombine.high %v2249_v22, %v2249_v22  ;;  %v2313_v8 = vsel %vm1960_vm1, %v2249_v22, 0.0 }
 0x3c6   :  { %v3021_v42 = vadd.f32 %v3020_v2, %v3019_v34  ;;  %v3027_v40 = vrot.slane %v3026_v26, 2  ;;  %v2334_v6 = vsel %vm1960_vm1, %v2282_v28, 0.0  ;;  %v2539_v10 = vpop.permute.xlu1 %2538  ;;  %v5389_v32 = vadd.f32 %v1966_v52, %v1965_v23 }
 0x3c7   :  { %v2329_v47 = vadd.f32 %v2328_v27, %v2327_v37  ;;  %v2335_v19 = vrot.slane %v2334_v6, 4  ;;  %v2314_v53 = vrot.slane %v2313_v8, 4  ;;  %v2320_v51 = vsel %vm1960_vm1, %v2281_v1, 0.0 }
 0x3c8   :  { %v3022_v59 = vrot.slane %v3021_v42, 1  ;;  %v3028_v17 = vadd.f32 %v3027_v40, %v3026_v26  ;;  %v2601_v60 = vmul.f32 %v2539_v10, %v1800_v5  ;;  %4171 = vset.pattern.permute.xlu1 %v6079_v33  ;;  %v2321_v36 = vrot.slane %v2320_v51, 4 }
 0x3c9   :  { %v2330_v9 = vrot.slane %v2329_v47, 2  ;;  %v2336_v50 = vadd.f32 %v2335_v19, %v2334_v6  ;;  %v2315_v12 = vadd.f32 %v2314_v53, %v2313_v8  ;;  %2578 = vperm.xlu1 %4171, %v5310_v58   ;;  %v1974_v54 = vadd.f32 %v1973_v45, %v1972_v16 }
 0x3ca   :  { %v3029_v30 = vrot.slane %v3028_v17, 1  ;;  %v2633_v23 = vcombine.high %v2601_v60, %v2601_v60  ;;  %v2665_v13 = vsel %vm1960_vm1, %v2601_v60, 0.0  ;;  %v2322_v34 = vadd.f32 %v2321_v36, %v2320_v51 }
 0x3cb   :  { %v2331_v57 = vadd.f32 %v2330_v9, %v2329_v47  ;;  %v2337_v31 = vrot.slane %v2336_v50, 2  ;;  %v2316_v39 = vrot.slane %v2315_v12, 2  ;;  %v1824_v18 = vpop.permute.xlu1 %1823  ;;  %v5395_v5 = vadd.f32 %v3022_v59, %v3021_v42 }
 0x3cc   :  { %v2666_v7 = vrot.slane %v2665_v13, 4  ;;  %v2672_v22 = vsel %vm1960_vm1, %v2633_v23, 0.0  ;;  %v1897_v52 = vmul.f32 %v1824_v18, %v5372_v21  ;;  %v2323_v26 = vrot.slane %v2322_v34, 2 }
 0x3cd   :  { %v2332_v2 = vrot.slane %v2331_v57, 1  ;;  %v2338_v58 = vadd.f32 %v2337_v31, %v2336_v50  ;;  %v2317_v16 = vadd.f32 %v2316_v39, %v2315_v12  ;;  %4173 = vset.pattern.permute.xlu1 %v6082_v0  ;;  %v2673_v37 = vrot.slane %v2672_v22, 4 }
 0x3ce   :  { %v2667_v28 = vadd.f32 %v2666_v7, %v2665_v13  ;;  %v1929_v45 = vcombine.high %v1897_v52, %v1897_v52  ;;  %v1975_v27 = vsel %vm1960_vm1, %v1897_v52, 0.0  ;;  %1873 = vperm.xlu1 %4173, %v5321_v14   ;;  %v5402_v1 = vadd.f32 %v3029_v30, %v3028_v17 }
 0x3cf   :  { %v2339_v42 = vrot.slane %v2338_v58, 1  ;;  %v2318_v40 = vrot.slane %v2317_v16, 1  ;;  %v2324_v6 = vadd.f32 %v2323_v26, %v2322_v34  ;;  %v2547_v8 = vpop.permute.xlu0 %2546  ;;  %v2674_v47 = vadd.f32 %v2673_v37, %v2672_v22 }
 0x3d0   :  { %v2668_v10 = vrot.slane %v2667_v28, 2  ;;  %v1976_v19 = vrot.slane %v1975_v27, 4  ;;  %v1982_v53 = vsel %vm1960_vm1, %v1929_v45, 0.0  ;;  %v2543_v59 = vpop.permute.xlu1 %2542  ;;  %v5405_v51 = vadd.f32 %v2332_v2, %v2331_v57 }
 0x3d1   :  { %v5407_v60 = vadd.f32 %v2339_v42, %v2338_v58  ;;  %v2325_v9 = vrot.slane %v2324_v6, 1  ;;  %v1983_v50 = vrot.slane %v1982_v53, 4  ;;  %v2675_v36 = vrot.slane %v2674_v47, 2 }
 0x3d2   :  { %v2669_v12 = vadd.f32 %v2668_v10, %v2667_v28  ;;  %v1977_v17 = vadd.f32 %v1976_v19, %v1975_v27  ;;  %v2603_v30 = vmul.f32 %v2547_v8, %v5378_v43  ;;  %4175 = vset.pattern.permute.xlu1 %v6079_v33  ;;  %v5411_v23 = vadd.f32 %v2318_v40, %v2317_v16 }
 0x3d3   :  { %v5413_v13 = vadd.f32 %v2325_v9, %v2324_v6  ;;  %v1984_v31 = vadd.f32 %v1983_v50, %v1982_v53  ;;  %v2602_v39 = vmul.f32 %v2543_v59, %v5372_v21  ;;  %2582 = vperm.xlu1 %4175, %v5321_v14   ;;  %v2676_v34 = vadd.f32 %v2675_v36, %v2674_v47 }
 0x3d4   :  { %v2670_v57 = vrot.slane %v2669_v12, 1  ;;  %v1978_v18 = vrot.slane %v1977_v17, 2  ;;  %v2635_v7 = vcombine.high %v2603_v30, %v2603_v30  ;;  %v2693_v52 = vsel %vm1960_vm1, %v2603_v30, 0.0  ;;  %v1834_v37 = vpop.permute.xlu0 %1833 }
 0x3d5   :  { %v1985_v22 = vrot.slane %v1984_v31, 2  ;;  %v2634_v2 = vcombine.high %v2602_v39, %v2602_v39  ;;  %v2679_v58 = vsel %vm1960_vm1, %v2602_v39, 0.0  ;;  %v2677_v26 = vrot.slane %v2676_v34, 1  ;;  %v2895_v45 = vpop.permute.xlu1 %2894 }
 0x3d6   :  { %v1979_v16 = vadd.f32 %v1978_v18, %v1977_v17  ;;  %v2694_v28 = vrot.slane %v2693_v52, 4  ;;  %v5421_v27 = vsel %vm3273_vm2, %v1974_v54, %v5389_v32  ;;  %v2700_v40 = vsel %vm1960_vm1, %v2635_v7, 0.0 }
 0x3d7   :  { %v1986_v42 = vadd.f32 %v1985_v22, %v1984_v31  ;;  %v2680_v6 = vrot.slane %v2679_v58, 4  ;;  %v2686_v8 = vsel %vm1960_vm1, %v2634_v2, 0.0  ;;  %4176 = vset.pattern.permute.xlu1 %v6080_v35  ;;  %v5426_v10 = vadd.f32 %v2670_v57, %v2669_v12 }
 0x3d8   :  { %v1980_v47 = vrot.slane %v1979_v16, 1  ;;  %v2695_v19 = vadd.f32 %v2694_v28, %v2693_v52  ;;  %v2701_v53 = vrot.slane %v2700_v40, 4  ;;  %2934 = vperm.xlu1 %4176, %v5321_v14   ;;  %v5429_v59 = vadd.f32 %v2677_v26, %v2676_v34 }
 0x3d9   :  { %v2681_v9 = vadd.f32 %v2680_v6, %v2679_v58  ;;  %v2687_v32 = vrot.slane %v2686_v8, 4  ;;  %v1899_v54 = vmul.f32 %v1834_v37, %v5385_v55  ;;  %v1987_v50 = vrot.slane %v1986_v42, 1 }
 0x3da   :  { %v2696_v36 = vrot.slane %v2695_v19, 2  ;;  %v2702_v17 = vadd.f32 %v2701_v53, %v2700_v40  ;;  %v2954_v30 = vmul.f32 %v2895_v45, %v5372_v21  ;;  %v5433_v31 = vadd.f32 %v1980_v47, %v1979_v16  ;;  %v1829_v22 = vpop.permute.xlu1 %1828  ;;  %v2903_v47 = vpop.permute.xlu0 %2902 }
 0x3db   :  { %v2682_v12 = vrot.slane %v2681_v9, 2  ;;  %v2688_v39 = vadd.f32 %v2687_v32, %v2686_v8  ;;  %v1931_v57 = vcombine.high %v1899_v54, %v1899_v54  ;;  %v2003_v14 = vsel %vm1960_vm1, %v1899_v54, 0.0 }
 0x3dc   :  { %v2697_v18 = vadd.f32 %v2696_v36, %v2695_v19  ;;  %v2703_v7 = vrot.slane %v2702_v17, 2  ;;  %v2986_v34 = vcombine.high %v2954_v30, %v2954_v30  ;;  %4178 = vset.pattern.permute.xlu1 %v6077_v46  ;;  %v2004_v58 = vrot.slane %v2003_v14, 4 }
 0x3dd   :  { %v2683_v52 = vadd.f32 %v2682_v12, %v2681_v9  ;;  %v2689_v2 = vrot.slane %v2688_v39, 2  ;;  %v2010_v26 = vsel %vm1960_vm1, %v1931_v57, 0.0  ;;  %2234 = vperm.xlu1 %4178, %v5328_v24   ;;  %v3031_v37 = vsel %vm1960_vm1, %v2954_v30, 0.0 }
 0x3de   :  { %v2698_v21 = vrot.slane %v2697_v18, 1  ;;  %v2704_v16 = vadd.f32 %v2703_v7, %v2702_v17  ;;  %v2011_v28 = vrot.slane %v2010_v26, 4  ;;  %v2005_v6 = vadd.f32 %v2004_v58, %v2003_v14 }
 0x3df   :  { %v2684_v45 = vrot.slane %v2683_v52, 1  ;;  %v2690_v40 = vadd.f32 %v2689_v2, %v2688_v39  ;;  %v3032_v8 = vrot.slane %v3031_v37, 4  ;;  %v5440_v19 = vadd.f32 %v1987_v50, %v1986_v42  ;;  %v2195_v14 = vpop.permute.xlu1 %2194 }
 0x3e0   :  { %v2705_v53 = vrot.slane %v2704_v16, 1  ;;  %v2012_v9 = vadd.f32 %v2011_v28, %v2010_v26  ;;  %v3038_v32 = vsel %vm1960_vm1, %v2986_v34, 0.0  ;;  %v2699_v54 = vadd.f32 %v2698_v21, %v2697_v18 }
 0x3e1   :  { %v2691_v36 = vrot.slane %v2690_v40, 1  ;;  %v2006_v12 = vrot.slane %v2005_v6, 2  ;;  %v3033_v57 = vadd.f32 %v3032_v8, %v3031_v37  ;;  %4179 = vset.pattern.permute.xlu1 %v6079_v33  ;;  %v5444_v17 = vadd.f32 %v2684_v45, %v2683_v52 }
 0x3e2   :  { %v2013_v30 = vrot.slane %v2012_v9, 2  ;;  %v3039_v7 = vrot.slane %v3038_v32, 4  ;;  %v2956_v39 = vmul.f32 %v2903_v47, %v5385_v55  ;;  %2586 = vperm.xlu1 %4179, %v5328_v24   ;;  %v2706_v42 = vadd.f32 %v2705_v53, %v2704_v16 }
 0x3e3   :  { %v2007_v50 = vadd.f32 %v2006_v12, %v2005_v6  ;;  %v3034_v2 = vrot.slane %v3033_v57, 2  ;;  %v1898_v34 = vmul.f32 %v1829_v22, %v5378_v43  ;;  %v5449_v18 = vadd.f32 %v2691_v36, %v2690_v40 }
 0x3e4   :  { %v2014_v58 = vadd.f32 %v2013_v30, %v2012_v9  ;;  %v3040_v26 = vadd.f32 %v3039_v7, %v3038_v32  ;;  %v2988_v21 = vcombine.high %v2956_v39, %v2956_v39  ;;  %v3059_v37 = vsel %vm1960_vm1, %v2956_v39, 0.0  ;;  %v2899_v12 = vpop.permute.xlu1 %2898 }
 0x3e5   :  { %v2008_v28 = vrot.slane %v2007_v50, 1  ;;  %v3035_v52 = vadd.f32 %v3034_v2, %v3033_v57  ;;  %v1930_v45 = vcombine.high %v1898_v34, %v1898_v34  ;;  %v3060_v46 = vrot.slane %v3059_v37, 4 }
 0x3e6   :  { %v2015_v8 = vrot.slane %v2014_v58, 1  ;;  %v3041_v47 = vrot.slane %v3040_v26, 2  ;;  %v3066_v24 = vsel %vm1960_vm1, %v2988_v21, 0.0  ;;  %4181 = vset.pattern.permute.xlu1 %v6082_v0  ;;  %v5455_v16 = vsel %vm3273_vm2, %v2706_v42, %v2699_v54 }
 0x3e7   :  { %v5457_v22 = vadd.f32 %v2008_v28, %v2007_v50  ;;  %v3067_v40 = vrot.slane %v3066_v24, 4  ;;  %v1989_v6 = vsel %vm1960_vm1, %v1898_v34, 0.0  ;;  %1883 = vperm.xlu1 %4181, %v5340_v4   ;;  %v3036_v53 = vrot.slane %v3035_v52, 1 }
 0x3e8   :  { %v3042_v9 = vadd.f32 %v3041_v47, %v3040_v26  ;;  %v3061_v32 = vadd.f32 %v3060_v46, %v3059_v37  ;;  %v1990_v36 = vrot.slane %v1989_v6, 4  ;;  %v5461_v57 = vadd.f32 %v2015_v8, %v2014_v58 }
 0x3e9   :  { %v3068_v30 = vadd.f32 %v3067_v40, %v3066_v24  ;;  %v1996_v7 = vsel %vm1960_vm1, %v1930_v45, 0.0  ;;  %v2251_v54 = vmul.f32 %v2195_v14, %v5378_v43  ;;  %v2955_v26 = vmul.f32 %v2899_v12, %v5378_v43 }
 0x3ea   :  { %v3043_v39 = vrot.slane %v3042_v9, 1  ;;  %v3062_v42 = vrot.slane %v3061_v32, 2  ;;  %v1991_v50 = vadd.f32 %v1990_v36, %v1989_v6  ;;  %v1997_v2 = vrot.slane %v1996_v7, 4 }
 0x3eb   :  { %v3069_v21 = vrot.slane %v3068_v30, 2  ;;  %v2283_v34 = vcombine.high %v2251_v54, %v2251_v54  ;;  %v2341_v28 = vsel %vm1960_vm1, %v2251_v54, 0.0  ;;  %4183 = vset.pattern.permute.xlu1 %v6079_v33  ;;  %v5468_v46 = vadd.f32 %v3036_v53, %v3035_v52 }
 0x3ec   :  { %v3063_v58 = vadd.f32 %v3062_v42, %v3061_v32  ;;  %v1992_v37 = vrot.slane %v1991_v50, 2  ;;  %v1998_v8 = vadd.f32 %v1997_v2, %v1996_v7  ;;  %2590 = vperm.xlu1 %4183, %v5340_v4   ;;  %v2342_v45 = vrot.slane %v2341_v28, 4  ;;  %v2555_v32 = vpop.permute.xlu0 %2554 }
 0x3ed   :  { %v3070_v14 = vadd.f32 %v3069_v21, %v3068_v30  ;;  %v2348_v47 = vsel %vm1960_vm1, %v2283_v34, 0.0  ;;  %v2987_v24 = vcombine.high %v2955_v26, %v2955_v26  ;;  %v5472_v43 = vadd.f32 %v3043_v39, %v3042_v9  ;;  %v2199_v21 = vpop.permute.xlu1 %2198 }
 0x3ee   :  { %v3064_v40 = vrot.slane %v3063_v58, 1  ;;  %v1993_v6 = vadd.f32 %v1992_v37, %v1991_v50  ;;  %v1999_v36 = vrot.slane %v1998_v8, 2  ;;  %v2349_v54 = vrot.slane %v2348_v47, 4 }
 0x3ef   :  { %v2343_v12 = vadd.f32 %v2342_v45, %v2341_v28  ;;  %v3045_v52 = vsel %vm1960_vm1, %v2955_v26, 0.0  ;;  %v3052_v53 = vsel %vm1960_vm1, %v2987_v24, 0.0  ;;  %v3071_v7 = vrot.slane %v3070_v14, 1 }
 0x3f0   :  { %v1994_v42 = vrot.slane %v1993_v6, 1  ;;  %v2000_v30 = vadd.f32 %v1999_v36, %v1998_v8  ;;  %v2350_v2 = vadd.f32 %v2349_v54, %v2348_v47  ;;  %4184 = vset.pattern.permute.xlu1 %v6080_v35  ;;  %v5477_v34 = vadd.f32 %v3064_v40, %v3063_v58  ;;  %v1844_v25 = vpop.permute.xlu0 %1843 }
 0x3f1   :  { %v2344_v50 = vrot.slane %v2343_v12, 2  ;;  %v3046_v37 = vrot.slane %v3045_v52, 4  ;;  %v3053_v33 = vrot.slane %v3052_v53, 4  ;;  %2942 = vperm.xlu1 %4184, %v5340_v4   ;;  %v2605_v26 = vmul.f32 %v2555_v32, %v5081_v63  ;;  %v2551_v20 = vpop.permute.xlu1 %2550 }
 0x3f2   :  { %v1995_v9 = vadd.f32 %v1994_v42, %v1993_v6  ;;  %v2001_v39 = vrot.slane %v2000_v30, 1  ;;  %v2351_v28 = vrot.slane %v2350_v2, 2  ;;  %v2252_v47 = vmul.f32 %v2199_v21, %v5385_v55 }
 0x3f3   :  { %v2345_v45 = vadd.f32 %v2344_v50, %v2343_v12  ;;  %v3047_v24 = vadd.f32 %v3046_v37, %v3045_v52  ;;  %v3054_v8 = vadd.f32 %v3053_v33, %v3052_v53  ;;  %v2637_v40 = vcombine.high %v2605_v26, %v2605_v26 }
 0x3f4   :  { %v2002_v36 = vadd.f32 %v2001_v39, %v2000_v30  ;;  %v2352_v58 = vadd.f32 %v2351_v28, %v2350_v2  ;;  %v2721_v54 = vsel %vm1960_vm1, %v2605_v26, 0.0  ;;  %v6091_v42 = vmov 0  }
 0x3f5   :  { %v2346_v35 = vrot.slane %v2345_v45, 1  ;;  %v3048_v0 = vrot.slane %v3047_v24, 2  ;;  %v3055_v4 = vrot.slane %v3054_v8, 2  ;;  %v2722_v6 = vrot.slane %v2721_v54, 4  ;;  %4185 = vset.pattern.permute.xlu1 %v6091_v42 }
 0x3f6   :  { %v3279_v12 = vsel %vm3273_vm2, %v2002_v36, %v1995_v9  ;;  %v2353_v52 = vrot.slane %v2352_v58, 1  ;;  %v2728_v33 = vsel %vm1960_vm1, %v2637_v40, 0.0  ;;  %v2284_v53 = vcombine.high %v2252_v47, %v2252_v47  ;;  %1888 = vperm.xlu1 %4185, %v5347_v29  }
 0x3f7   :  { %v5487_v32 = vadd.f32 %v3071_v7, %v3070_v14  ;;  %v5491_v30 = vsel %vm3275_vm3, %v5457_v22, %v3279_v12  ;;  %v3049_v2 = vadd.f32 %v3048_v0, %v3047_v24  ;;  %v3056_v21 = vadd.f32 %v3055_v4, %v3054_v8 }
 0x3f8   :  { %v2347_v50 = vadd.f32 %v2346_v35, %v2345_v45  ;;  %v2723_v37 = vadd.f32 %v2722_v6, %v2721_v54  ;;  %v2729_v39 = vrot.slane %v2728_v33, 4  ;;  %v2355_v28 = vsel %vm1960_vm1, %v2252_v47, 0.0 }
 0x3f9   :  { %v3050_v9 = vrot.slane %v3049_v2, 1  ;;  %v3057_v26 = vrot.slane %v3056_v21, 1  ;;  %v2356_v36 = vrot.slane %v2355_v28, 4  ;;  %v2362_v40 = vsel %vm1960_vm1, %v2284_v53, 0.0 }
 0x3fa   :  { %v2354_v42 = vadd.f32 %v2353_v52, %v2352_v58  ;;  %v2724_v11 = vrot.slane %v2723_v37, 2  ;;  %v2730_v14 = vadd.f32 %v2729_v39, %v2728_v33  ;;  %v2363_v7 = vrot.slane %v2362_v40, 4 }
 0x3fb   :  { %v6092_v22 = vmov 1   ;;  %v3051_v0 = vadd.f32 %v3050_v9, %v3049_v2  ;;  %v3058_v24 = vadd.f32 %v3057_v26, %v3056_v21  ;;  %v2357_v35 = vadd.f32 %v2356_v36, %v2355_v28 }
 0x3fc   :  { %4186 = vset.pattern.permute.xlu1 %v6092_v22  ;;  %v3276_v45 = vsel %vm3275_vm3, %v5433_v31, %v5421_v27  ;;  %v2725_v8 = vadd.f32 %v2724_v11, %v2723_v37  ;;  %v2731_v47 = vrot.slane %v2730_v14, 2  ;;  %v2364_v54 = vadd.f32 %v2363_v7, %v2362_v40  ;;  %v1839_v37 = vpop.permute.xlu1 %1838 }
 0x3fd   :  { %2242 = vperm.xlu1 %4186, %v5347_v29   ;;  %v3278_v58 = vsel %vm3277_vm4, %v5440_v19, %v3276_v45  ;;  %v3474_v4 = vsel %vm3340_vm5, %v3058_v24, %v3051_v0  ;;  %v2358_v6 = vrot.slane %v2357_v35, 2  ;;  %v3341_v12 = vsel %vm3340_vm5, %v5413_v13, %v5411_v23 }
 0x3fe   :  { %v3407_v52 = vsel %vm3273_vm2, %v5429_v59, %v5426_v10  ;;  %v5511_v27 = vsel %vm3342_vm6, %v5477_v34, %v3474_v4  ;;  %v2726_v11 = vrot.slane %v2725_v8, 1  ;;  %v5513_v31 = vadd.f32 %v2731_v47, %v2730_v14 }
 0x3ff   :  { %v2365_v33 = vrot.slane %v2364_v54, 2  ;;  %v3346_v19 = vsel %vm3340_vm5, %v2354_v42, %v2347_v50  ;;  %v2359_v53 = vadd.f32 %v2358_v6, %v2357_v35  ;;  %v3343_v2 = vsel %vm3342_vm6, %v5405_v51, %v3341_v12  ;;  %v2911_v50 = vpop.permute.xlu0 %2910 }
 0x400   :  { %v3408_v23 = vsel %vm3275_vm3, %v5444_v17, %v3407_v52  ;;  %v6093_v13 = vmov 3   ;;  %v5521_v10 = vadd.f32 %v2726_v11, %v2725_v8  ;;  %v3345_v34 = vsel %vm3344_vm7, %v5407_v60, %v3343_v2  ;;  %v2203_v45 = vpop.permute.xlu1 %2202 }
 0x401   :  { %4188 = vset.pattern.permute.xlu1 %v6093_v13  ;;  %v2366_v59 = vadd.f32 %v2365_v33, %v2364_v54  ;;  %v3471_v21 = vsel %vm3340_vm5, %v5402_v1, %v5395_v5  ;;  %v2360_v51 = vrot.slane %v2359_v53, 1  ;;  %v3409_v17 = vsel %vm3277_vm4, %v5449_v18, %v3408_v23 }
 0x402   :  { %2946 = vperm.xlu1 %4188, %v5347_v29   ;;  %v3472_v39 = vsel %vm3342_vm6, %v5468_v46, %v3471_v21  ;;  %v3503_v28 = vsel %vm1960_vm1, %v3278_v58, %v3345_v34  ;;  %v2733_v9 = vrot.slane %v5513_v31, 1  ;;  %v1901_v5 = vmul.f32 %v1844_v25, %v5091_v49 }
 0x403   :  { %v2367_v60 = vrot.slane %v2366_v59, 1  ;;  %v3473_v26 = vsel %vm3344_vm7, %v5472_v43, %v3472_v39  ;;  %v2361_v1 = vadd.f32 %v2360_v51, %v2359_v53  ;;  %v2604_v36 = vmul.f32 %v2551_v20, %v5385_v55 }
 0x404   :  { %v3511_v29 = vsel %vm1960_vm1, %v3409_v17, %v3473_v26  ;;  %v2958_v18 = vmul.f32 %v2911_v50, %v5091_v49  ;;  %v1933_v46 = vcombine.high %v1901_v5, %v1901_v5  ;;  %v2031_v14 = vsel %vm1960_vm1, %v1901_v5, 0.0  ;;  %v2907_v5 = vpop.permute.xlu1 %2906 }
 0x405   :  { %v2368_v40 = vadd.f32 %v2367_v60, %v2366_v59  ;;  %v3519_v42 = vpack.c.bf16 %v3511_v29, %v3503_v28  ;;  %v3347_v7 = vsel %vm3342_vm6, %v2361_v1, %v3346_v19  ;;  %v2032_v0 = vrot.slane %v2031_v14, 4 }
 0x406   :  { %4190 = vset.pattern.permute.xlu1 %v6092_v22  ;;  %v2636_v43 = vcombine.high %v2604_v36, %v2604_v36  ;;  %v2707_v25 = vsel %vm1960_vm1, %v2604_v36, 0.0  ;;  %v2038_v20 = vsel %vm1960_vm1, %v1933_v46, 0.0  ;;  %v2990_v35 = vcombine.high %v2958_v18, %v2958_v18 }
 0x407   :  { %2246 = vperm.xlu1 %4190, %v5354_v62   ;;  %v5547_v24 = vsel %vm3344_vm7, %v2368_v40, %v3347_v7  ;;  %4082 = vmatprep.mubr.bf16.mxu0 %v3519_v42  ;;  %v2708_v55 = vrot.slane %v2707_v25, 4  ;;  %v2033_v8 = vadd.f32 %v2032_v0, %v2031_v14  ;;  %v2039_v47 = vrot.slane %v2038_v20, 4 }
 0x408   :  { %v2714_v22 = vsel %vm1960_vm1, %v2636_v43, 0.0  ;;  %v3087_v54 = vsel %vm1960_vm1, %v2958_v18, 0.0  ;;  %v3094_v12 = vsel %vm1960_vm1, %v2990_v35, 0.0  ;;  %v1900_v19 = vmul.f32 %v1839_v37, %v5081_v63  ;;  %v2211_v18 = vpop.permute.xlu0 %2210 }
 0x409   :  { %v2709_v58 = vadd.f32 %v2708_v55, %v2707_v25  ;;  %v2715_v4 = vrot.slane %v2714_v22, 4  ;;  %v3088_v6 = vrot.slane %v3087_v54, 4  ;;  %v2034_v52 = vrot.slane %v2033_v8, 2 }
 0x40a   :  { %v2040_v11 = vadd.f32 %v2039_v47, %v2038_v20  ;;  %v3095_v33 = vrot.slane %v3094_v12, 4  ;;  %v6094_v53 = vmov 2   ;;  %v2253_v34 = vmul.f32 %v2203_v45, %v5081_v63 }
 0x40b   :  { %4191 = vset.pattern.permute.xlu1 %v6094_v53  ;;  %v2710_v2 = vrot.slane %v2709_v58, 2  ;;  %v2716_v23 = vadd.f32 %v2715_v4, %v2714_v22  ;;  %v3089_v59 = vadd.f32 %v3088_v6, %v3087_v54  ;;  %v2035_v21 = vadd.f32 %v2034_v52, %v2033_v8 }
 0x40c   :  { %2598 = vperm.xlu1 %4191, %v5354_v62   ;;  %v2041_v50 = vrot.slane %v2040_v11, 2  ;;  %v3096_v51 = vadd.f32 %v3095_v33, %v3094_v12  ;;  %v1932_v17 = vcombine.high %v1900_v19, %v1900_v19  ;;  %v2017_v26 = vsel %vm1960_vm1, %v1900_v19, 0.0  ;;  %v2567_v52 = vpop.permute.xlu0 %2566 }
 0x40d   :  { %v2711_v39 = vadd.f32 %v2710_v2, %v2709_v58  ;;  %v2717_v28 = vrot.slane %v2716_v23, 2  ;;  %v3090_v60 = vrot.slane %v3089_v59, 2  ;;  %v2036_v37 = vrot.slane %v2035_v21, 1  ;;  %v2207_v58 = vpop.permute.xlu1 %2206 }
 0x40e   :  { %v2042_v1 = vadd.f32 %v2041_v50, %v2040_v11  ;;  %v3097_v29 = vrot.slane %v3096_v51, 2  ;;  %v2018_v36 = vrot.slane %v2017_v26, 4  ;;  %v2024_v62 = vsel %vm1960_vm1, %v1932_v17, 0.0 }
 0x40f   :  { %v2712_v40 = vrot.slane %v2711_v39, 1  ;;  %v2718_v42 = vadd.f32 %v2717_v28, %v2716_v23  ;;  %v3091_v46 = vadd.f32 %v3090_v60, %v3089_v59  ;;  %v5561_v14 = vadd.f32 %v2733_v9, %v5513_v31 }
 0x410   :  { %4192 = vset.pattern.permute.xlu1 %v6093_v13  ;;  %v2043_v7 = vrot.slane %v2042_v1, 1  ;;  %v3098_v0 = vadd.f32 %v3097_v29, %v3096_v51  ;;  %v2019_v43 = vadd.f32 %v2018_v36, %v2017_v26  ;;  %v2025_v35 = vrot.slane %v2024_v62, 4 }
 0x411   :  { %2918 = vperm.xlu1 %4192, %v5282_v3   ;;  %v2713_v25 = vadd.f32 %v2712_v40, %v2711_v39  ;;  %v2719_v20 = vrot.slane %v2718_v42, 1  ;;  %v3092_v55 = vrot.slane %v3091_v46, 1  ;;  %v5564_v45 = vadd.f32 %v2036_v37, %v2035_v21 }
 0x412   :  { %v5566_v8 = vadd.f32 %v2043_v7, %v2042_v1  ;;  %v2020_v47 = vrot.slane %v2019_v43, 2  ;;  %v2285_v22 = vcombine.high %v2253_v34, %v2253_v34  ;;  %v3099_v13 = vrot.slane %v3098_v0, 1 }
 0x413   :  { %v2720_v54 = vadd.f32 %v2719_v20, %v2718_v42  ;;  %v3411_v31 = vsel %vm3275_vm3, %v2713_v25, %v5455_v16  ;;  %v2026_v9 = vadd.f32 %v2025_v35, %v2024_v62  ;;  %v5570_v4 = vadd.f32 %v3092_v55, %v3091_v46 }
 0x414   :  { %v2021_v3 = vadd.f32 %v2020_v47, %v2019_v43  ;;  %v2369_v6 = vsel %vm1960_vm1, %v2253_v34, 0.0  ;;  %v2376_v12 = vsel %vm1960_vm1, %v2285_v22, 0.0  ;;  %v2957_v16 = vmul.f32 %v2907_v5, %v5081_v63 }
 0x415   :  { %v5575_v11 = vsel %vm3277_vm4, %v2720_v54, %v3411_v31  ;;  %v2027_v33 = vrot.slane %v2026_v9, 2  ;;  %v2370_v19 = vrot.slane %v2369_v6, 4  ;;  %v2377_v53 = vrot.slane %v2376_v12, 4 }
 0x416   :  { %v2022_v2 = vrot.slane %v2021_v3, 1  ;;  %v2255_v23 = vmul.f32 %v2211_v18, %v5071_v61  ;;  %v2254_v59 = vmul.f32 %v2207_v58, %v5091_v49  ;;  %v2608_v34 = vmul.f32 %v2567_v52, %v5086_v44 }
 0x417   :  { %v2028_v21 = vadd.f32 %v2027_v33, %v2026_v9  ;;  %v2371_v50 = vadd.f32 %v2370_v19, %v2369_v6  ;;  %v2378_v51 = vadd.f32 %v2377_v53, %v2376_v12  ;;  %v5581_v17 = vadd.f32 %v3099_v13, %v3098_v0 }
 0x418   :  { %v2989_v39 = vcombine.high %v2957_v16, %v2957_v16  ;;  %v3073_v28 = vsel %vm1960_vm1, %v2957_v16, 0.0  ;;  %v2287_v60 = vcombine.high %v2255_v23, %v2255_v23  ;;  %v2397_v5 = vsel %vm1960_vm1, %v2255_v23, 0.0 }
 0x419   :  { %v2029_v26 = vrot.slane %v2028_v21, 1  ;;  %v2372_v37 = vrot.slane %v2371_v50, 2  ;;  %v2379_v1 = vrot.slane %v2378_v51, 2  ;;  %v3074_v29 = vrot.slane %v3073_v28, 4 }
 0x41a   :  { %v3080_v63 = vsel %vm1960_vm1, %v2989_v39, 0.0  ;;  %v2404_v36 = vsel %vm1960_vm1, %v2287_v60, 0.0  ;;  %v2286_v18 = vcombine.high %v2254_v59, %v2254_v59  ;;  %v5587_v40 = vadd.f32 %v2022_v2, %v2021_v3 }
 0x41b   :  { %v2373_v42 = vadd.f32 %v2372_v37, %v2371_v50  ;;  %v2380_v46 = vadd.f32 %v2379_v1, %v2378_v51  ;;  %v3075_v62 = vadd.f32 %v3074_v29, %v3073_v28  ;;  %v3081_v7 = vrot.slane %v3080_v63, 4 }
 0x41c   :  { %v2398_v0 = vrot.slane %v2397_v5, 4  ;;  %v2405_v43 = vrot.slane %v2404_v36, 4  ;;  %v2383_v25 = vsel %vm1960_vm1, %v2254_v59, 0.0  ;;  %v5590_v20 = vadd.f32 %v2029_v26, %v2028_v21  ;;  %v2559_v59 = vpop.permute.xlu1 %2558 }
 0x41d   :  { %v2374_v55 = vrot.slane %v2373_v42, 1  ;;  %v3076_v35 = vrot.slane %v3075_v62, 2  ;;  %v2384_v47 = vrot.slane %v2383_v25, 4  ;;  %v3082_v22 = vadd.f32 %v3081_v7, %v3080_v63 }
 0x41e   :  { %v2399_v54 = vadd.f32 %v2398_v0, %v2397_v5  ;;  %v2406_v31 = vadd.f32 %v2405_v43, %v2404_v36  ;;  %v2390_v13 = vsel %vm1960_vm1, %v2286_v18, 0.0  ;;  %v2381_v58 = vrot.slane %v2380_v46, 1  ;;  %v2219_v43 = vpop.permute.xlu0 %2218 }
 0x41f   :  { %v5593_v9 = vadd.f32 %v2374_v55, %v2373_v42  ;;  %v3077_v3 = vadd.f32 %v3076_v35, %v3075_v62  ;;  %v2385_v6 = vadd.f32 %v2384_v47, %v2383_v25  ;;  %v3083_v12 = vrot.slane %v3082_v22, 2 }
 0x420   :  { %v2400_v52 = vrot.slane %v2399_v54, 2  ;;  %v2407_v33 = vrot.slane %v2406_v31, 2  ;;  %v2391_v19 = vrot.slane %v2390_v13, 4  ;;  %v2640_v16 = vcombine.high %v2608_v34, %v2608_v34 }
 0x421   :  { %v3078_v53 = vrot.slane %v3077_v3, 1  ;;  %v2386_v2 = vrot.slane %v2385_v6, 2  ;;  %v2763_v23 = vsel %vm1960_vm1, %v2608_v34, 0.0  ;;  %v3084_v21 = vadd.f32 %v3083_v12, %v3082_v22  ;;  %v1849_v22 = vpop.permute.xlu1 %1848 }
 0x422   :  { %v2401_v50 = vadd.f32 %v2400_v52, %v2399_v54  ;;  %v2408_v51 = vadd.f32 %v2407_v33, %v2406_v31  ;;  %v2392_v39 = vadd.f32 %v2391_v19, %v2390_v13  ;;  %v5596_v28 = vadd.f32 %v2381_v58, %v2380_v46 }
 0x423   :  { %v2387_v60 = vadd.f32 %v2386_v2, %v2385_v6  ;;  %v2764_v26 = vrot.slane %v2763_v23, 4  ;;  %v2770_v37 = vsel %vm1960_vm1, %v2640_v16, 0.0  ;;  %v3085_v1 = vrot.slane %v3084_v21, 1 }
 0x424   :  { %v2402_v29 = vrot.slane %v2401_v50, 1  ;;  %v2409_v63 = vrot.slane %v2408_v51, 1  ;;  %v2393_v5 = vrot.slane %v2392_v39, 2  ;;  %v5599_v36 = vadd.f32 %v3078_v53, %v3077_v3 }
 0x425   :  { %v2765_v18 = vadd.f32 %v2764_v26, %v2763_v23  ;;  %v2771_v42 = vrot.slane %v2770_v37, 4  ;;  %v3281_v34 = vsel %vm3277_vm4, %v5461_v57, %v5491_v30  ;;  %v5604_v62 = vadd.f32 %v3085_v1, %v3084_v21  ;;  %v2575_v23 = vpop.permute.xlu0 %2574 }
 0x426   :  { %v5606_v46 = vadd.f32 %v2402_v29, %v2401_v50  ;;  %v2388_v7 = vrot.slane %v2387_v60, 1  ;;  %v2394_v0 = vadd.f32 %v2393_v5, %v2392_v39  ;;  %v5608_v25 = vadd.f32 %v2409_v63, %v2408_v51  ;;  %v2563_v39 = vpop.permute.xlu1 %2562 }
 0x427   :  { %v2766_v55 = vrot.slane %v2765_v18, 2  ;;  %v2772_v35 = vadd.f32 %v2771_v42, %v2770_v37  ;;  %v3476_v47 = vsel %vm3344_vm7, %v5487_v32, %v5511_v27  ;;  %v3504_v57 = vsel %vm1960_vm1, %v3281_v34, %v5547_v24 }
 0x428   :  { %6095 = vst [vmem:[#allocation15_spill] sm:$0xff] %v5606_v46  ;;  %6096 = vst [vmem:[#allocation16_spill] sm:$0xff] %v5608_v25  ;;  %v2395_v54 = vrot.slane %v2394_v0, 1  ;;  %v3512_v30 = vsel %vm1960_vm1, %v5575_v11, %v3476_v47  ;;  %v2606_v31 = vmul.f32 %v2559_v59, %v5091_v49  ;;  %v2257_v6 = vmul.f32 %v2219_v43, %v5111_v48 }
 0x429   :  { %v2767_v13 = vadd.f32 %v2766_v55, %v2765_v18  ;;  %v2773_v58 = vrot.slane %v2772_v35, 2  ;;  %v3520_v3 = vpack.c.bf16 %v3512_v30, %v3504_v57  ;;  %v5619_v12 = vadd.f32 %v2388_v7, %v2387_v60 }
 0x42a   :  { %v2638_v52 = vcombine.high %v2606_v31, %v2606_v31  ;;  %v2735_v32 = vsel %vm1960_vm1, %v2606_v31, 0.0  ;;  %v1902_v27 = vmul.f32 %v1849_v22, %v5071_v61  ;;  %v2289_v53 = vcombine.high %v2257_v6, %v2257_v6  ;;  %v1869_v31 = vpop.permute.xlu0 %1868 }
 0x42b   :  { %v2768_v33 = vrot.slane %v2767_v13, 1  ;;  %v2774_v19 = vadd.f32 %v2773_v58, %v2772_v35  ;;  %4083 = vmatmul.mubr.bf16.vlgmr.msra.gmra.mrb[64].mxu0 %v3520_v3  ;;  %v2736_v24 = vrot.slane %v2735_v32, 4  ;;  %v2425_v49 = vsel %vm1960_vm1, %v2257_v6, 0.0 }
 0x42c   :  { %v2742_v11 = vsel %vm1960_vm1, %v2638_v52, 0.0  ;;  %v1934_v2 = vcombine.high %v1902_v27, %v1902_v27  ;;  %v2045_v16 = vsel %vm1960_vm1, %v1902_v27, 0.0  ;;  %v5626_v59 = vadd.f32 %v2395_v54, %v2394_v0  ;;  %v2915_v52 = vpop.permute.xlu1 %2914 }
 0x42d   :  { %v5628_v21 = vadd.f32 %v2768_v33, %v2767_v13  ;;  %v2737_v50 = vadd.f32 %v2736_v24, %v2735_v32  ;;  %v2743_v51 = vrot.slane %v2742_v11, 4  ;;  %v2426_v60 = vrot.slane %v2425_v49, 4 }
 0x42e   :  { %v2432_v26 = vsel %vm1960_vm1, %v2289_v53, 0.0  ;;  %v2046_v37 = vrot.slane %v2045_v16, 4  ;;  %v2052_v1 = vsel %vm1960_vm1, %v1934_v2, 0.0  ;;  %v2775_v29 = vrot.slane %v2774_v19, 1 }
 0x42f   :  { %6097 = vst [vmem:[#allocation17_spill] sm:$0xff] %v5628_v21  ;;  %v2738_v63 = vrot.slane %v2737_v50, 2  ;;  %v2744_v5 = vadd.f32 %v2743_v51, %v2742_v11  ;;  %v2433_v18 = vrot.slane %v2432_v26, 4  ;;  %v2427_v42 = vadd.f32 %v2426_v60, %v2425_v49 }
 0x430   :  { %v2047_v34 = vadd.f32 %v2046_v37, %v2045_v16  ;;  %v2053_v7 = vrot.slane %v2052_v1, 4  ;;  %v2610_v0 = vmul.f32 %v2575_v23, %v5119_v15  ;;  %v2607_v47 = vmul.f32 %v2563_v39, %v5071_v61 }
 0x431   :  { %v2739_v43 = vadd.f32 %v2738_v63, %v2737_v50  ;;  %v2745_v55 = vrot.slane %v2744_v5, 2  ;;  %v2434_v35 = vadd.f32 %v2433_v18, %v2432_v26  ;;  %v2428_v22 = vrot.slane %v2427_v42, 2 }
 0x432   :  { %v2048_v54 = vrot.slane %v2047_v34, 2  ;;  %v2054_v57 = vadd.f32 %v2053_v7, %v2052_v1  ;;  %v2642_v30 = vcombine.high %v2610_v0, %v2610_v0  ;;  %v2791_v6 = vsel %vm1960_vm1, %v2610_v0, 0.0  ;;  %v1854_v0 = vpop.permute.xlu1 %1853 }
 0x433   :  { %v2740_v13 = vrot.slane %v2739_v43, 1  ;;  %v2746_v58 = vadd.f32 %v2745_v55, %v2744_v5  ;;  %v2435_v3 = vrot.slane %v2434_v35, 2  ;;  %v2429_v32 = vadd.f32 %v2428_v22, %v2427_v42 }
 0x434   :  { %v2049_v27 = vadd.f32 %v2048_v54, %v2047_v34  ;;  %v2055_v33 = vrot.slane %v2054_v57, 2  ;;  %v2792_v24 = vrot.slane %v2791_v6, 4  ;;  %v5635_v53 = vadd.f32 %v2775_v29, %v2774_v19  ;;  %v2931_v29 = vpop.permute.xlu0 %2930 }
 0x435   :  { %v2747_v11 = vrot.slane %v2746_v58, 1  ;;  %v2436_v49 = vadd.f32 %v2435_v3, %v2434_v35  ;;  %v2798_v2 = vsel %vm1960_vm1, %v2642_v30, 0.0  ;;  %v2430_v16 = vrot.slane %v2429_v32, 1 }
 0x436   :  { %6098 = vst [vmem:[#allocation18_spill] sm:$0xff] %v5635_v53  ;;  %v2050_v23 = vrot.slane %v2049_v27, 1  ;;  %v2056_v50 = vadd.f32 %v2055_v33, %v2054_v57  ;;  %v2793_v51 = vadd.f32 %v2792_v24, %v2791_v6  ;;  %v5638_v39 = vadd.f32 %v2740_v13, %v2739_v43 }
 0x437   :  { %v2437_v60 = vrot.slane %v2436_v49, 1  ;;  %v2799_v26 = vrot.slane %v2798_v2, 4  ;;  %v2639_v37 = vcombine.high %v2607_v47, %v2607_v47  ;;  %v5640_v1 = vadd.f32 %v2747_v11, %v2746_v58 }
 0x438   :  { %v5642_v63 = vadd.f32 %v2430_v16, %v2429_v32  ;;  %v5644_v5 = vadd.f32 %v2050_v23, %v2049_v27  ;;  %v2794_v19 = vrot.slane %v2793_v51, 2  ;;  %v2057_v18 = vrot.slane %v2056_v50, 1 }
 0x439   :  { %v2800_v42 = vadd.f32 %v2799_v26, %v2798_v2  ;;  %v2749_v34 = vsel %vm1960_vm1, %v2607_v47, 0.0  ;;  %v2756_v7 = vsel %vm1960_vm1, %v2639_v37, 0.0  ;;  %v5648_v43 = vadd.f32 %v2437_v60, %v2436_v49 }
 0x43a   :  { %6099 = vst [vmem:[#allocation19_spill] sm:$0xff] %v5644_v5  ;;  %v2795_v55 = vadd.f32 %v2794_v19, %v2793_v51  ;;  %v2750_v35 = vrot.slane %v2749_v34, 4  ;;  %v2757_v22 = vrot.slane %v2756_v7, 4  ;;  %v1906_v57 = vmul.f32 %v1869_v31, %v5108_v38  ;;  %v5660_v19 = vpop.permute.xlu1 %2214 }
 0x43b   :  { %v2801_v54 = vrot.slane %v2800_v42, 2  ;;  %v2959_v30 = vmul.f32 %v2915_v52, %v5071_v61  ;;  %v2963_v13 = vmul.f32 %v2931_v29, %v5108_v38  ;;  %v1903_v47 = vmul.f32 %v1854_v0, %v5086_v44 }
 0x43c   :  { %v2796_v58 = vrot.slane %v2795_v55, 1  ;;  %v2751_v3 = vadd.f32 %v2750_v35, %v2749_v34  ;;  %v2758_v6 = vadd.f32 %v2757_v22, %v2756_v7  ;;  %v1938_v27 = vcombine.high %v1906_v57, %v1906_v57 }
 0x43d   :  { %v2802_v32 = vadd.f32 %v2801_v54, %v2800_v42  ;;  %v2101_v33 = vsel %vm1960_vm1, %v1906_v57, 0.0  ;;  %v2991_v24 = vcombine.high %v2959_v30, %v2959_v30  ;;  %v5655_v11 = vadd.f32 %v2057_v18, %v2056_v50 }
 0x43e   :  { %v2752_v49 = vrot.slane %v2751_v3, 2  ;;  %v2759_v2 = vrot.slane %v2758_v6, 2  ;;  %v2102_v16 = vrot.slane %v2101_v33, 4  ;;  %v2108_v61 = vsel %vm1960_vm1, %v1938_v27, 0.0 }
 0x43f   :  { %6100 = vst [vmem:[#allocation20_spill] sm:$0xff] %v5655_v11  ;;  %v2803_v31 = vrot.slane %v2802_v32, 1  ;;  %v3101_v52 = vsel %vm1960_vm1, %v2959_v30, 0.0  ;;  %v3108_v23 = vsel %vm1960_vm1, %v2991_v24, 0.0  ;;  %v2109_v37 = vrot.slane %v2108_v61, 4 }
 0x440   :  { %v2753_v51 = vadd.f32 %v2752_v49, %v2751_v3  ;;  %v2760_v60 = vadd.f32 %v2759_v2, %v2758_v6  ;;  %v2103_v26 = vadd.f32 %v2102_v16, %v2101_v33  ;;  %v5662_v29 = vadd.f32 %v2796_v58, %v2795_v55 }
 0x441   :  { %v3102_v50 = vrot.slane %v3101_v52, 4  ;;  %v3109_v18 = vrot.slane %v3108_v23, 4  ;;  %v2995_v42 = vcombine.high %v2963_v13, %v2963_v13  ;;  %v5664_v34 = vadd.f32 %v2803_v31, %v2802_v32 }
 0x442   :  { %v2754_v7 = vrot.slane %v2753_v51, 1  ;;  %v2104_v0 = vrot.slane %v2103_v26, 2  ;;  %v2110_v35 = vadd.f32 %v2109_v37, %v2108_v61  ;;  %v3157_v57 = vsel %vm1960_vm1, %v2963_v13, 0.0  ;;  %v5671_v61 = vpop.permute.xlu1 %1858 }
 0x443   :  { %v3103_v22 = vadd.f32 %v3102_v50, %v3101_v52  ;;  %v3110_v54 = vadd.f32 %v3109_v18, %v3108_v23  ;;  %v3164_v30 = vsel %vm1960_vm1, %v2995_v42, 0.0  ;;  %v2761_v6 = vrot.slane %v2760_v60, 1 }
 0x444   :  { %v5668_v3 = vadd.f32 %v2754_v7, %v2753_v51  ;;  %v2105_v27 = vadd.f32 %v2104_v0, %v2103_v26  ;;  %v2111_v55 = vrot.slane %v2110_v35, 2  ;;  %v3158_v24 = vrot.slane %v3157_v57, 4  ;;  %v2231_v51 = vpop.permute.xlu0 %2230 }
 0x445   :  { %v3104_v58 = vrot.slane %v3103_v22, 2  ;;  %v3111_v33 = vrot.slane %v3110_v54, 2  ;;  %v3165_v49 = vrot.slane %v3164_v30, 4  ;;  %v1935_v16 = vcombine.high %v1903_v47, %v1903_v47 }
 0x446   :  { %6101 = vst [vmem:[#allocation21_spill] sm:$0xff] %v5668_v3  ;;  %v2106_v32 = vrot.slane %v2105_v27, 1  ;;  %v2112_v2 = vadd.f32 %v2111_v55, %v2110_v35  ;;  %v2059_v31 = vsel %vm1960_vm1, %v1903_v47, 0.0  ;;  %v3159_v23 = vadd.f32 %v3158_v24, %v3157_v57  ;;  %v5681_v24 = vpop.permute.xlu1 %2570 }
 0x447   :  { %v3105_v52 = vadd.f32 %v3104_v58, %v3103_v22  ;;  %v3112_v13 = vadd.f32 %v3111_v33, %v3110_v54  ;;  %v3166_v37 = vadd.f32 %v3165_v49, %v3164_v30  ;;  %v5673_v50 = vadd.f32 %v2761_v6, %v2760_v60 }
 0x448   :  { %v2113_v26 = vrot.slane %v2112_v2, 1  ;;  %v2060_v18 = vrot.slane %v2059_v31, 4  ;;  %v2066_v42 = vsel %vm1960_vm1, %v1935_v16, 0.0  ;;  %v3160_v53 = vrot.slane %v3159_v23, 2 }
 0x449   :  { %6102 = vst [vmem:[#allocation22_spill] sm:$0xff] %v5673_v50  ;;  %v3106_v7 = vrot.slane %v3105_v52, 1  ;;  %v3113_v0 = vrot.slane %v3112_v13, 1  ;;  %v3167_v35 = vrot.slane %v3166_v37, 2  ;;  %v2107_v55 = vadd.f32 %v2106_v32, %v2105_v27 }
 0x44a   :  { %v2061_v21 = vadd.f32 %v2060_v18, %v2059_v31  ;;  %v2067_v47 = vrot.slane %v2066_v42, 4  ;;  %v2260_v3 = vmul.f32 %v2231_v51, %v5116_v56  ;;  %v2114_v22 = vadd.f32 %v2113_v26, %v2112_v2 }
 0x44b   :  { %v5677_v54 = vadd.f32 %v3106_v7, %v3105_v52  ;;  %v3161_v57 = vadd.f32 %v3160_v53, %v3159_v23  ;;  %v3168_v30 = vadd.f32 %v3167_v35, %v3166_v37  ;;  %v5679_v60 = vadd.f32 %v3113_v0, %v3112_v13 }
 0x44c   :  { %v2062_v6 = vrot.slane %v2061_v21, 2  ;;  %v2068_v58 = vadd.f32 %v2067_v47, %v2066_v42  ;;  %v2292_v33 = vcombine.high %v2260_v3, %v2260_v3  ;;  %v2467_v27 = vsel %vm1960_vm1, %v2260_v3, 0.0  ;;  %v5706_v47 = vpop.permute.xlu1 %2922 }
 0x44d   :  { %6103 = vst [vmem:[#allocation23_spill] sm:$0xff] %v5677_v54  ;;  %6104 = vst [vmem:[#allocation24_spill] sm:$0xff] %v5679_v60  ;;  %v3162_v49 = vrot.slane %v3161_v57, 1  ;;  %v3169_v16 = vrot.slane %v3168_v30, 1  ;;  %v3282_v32 = vsel %vm3273_vm2, %v5590_v20, %v5587_v40  ;;  %v2468_v52 = vrot.slane %v2467_v27, 4 }
 0x44e   :  { %v2063_v2 = vadd.f32 %v2062_v6, %v2061_v21  ;;  %v2069_v31 = vrot.slane %v2068_v58, 2  ;;  %v2474_v53 = vsel %vm1960_vm1, %v2292_v33, 0.0  ;;  %v3283_v51 = vsel %vm3275_vm3, %v5564_v45, %v3282_v32 }
 0x44f   :  { %v3163_v13 = vadd.f32 %v3162_v49, %v3161_v57  ;;  %v3170_v23 = vadd.f32 %v3169_v16, %v3168_v30  ;;  %v2475_v37 = vrot.slane %v2474_v53, 4  ;;  %v2469_v42 = vadd.f32 %v2468_v52, %v2467_v27 }
 0x450   :  { %v2064_v26 = vrot.slane %v2063_v2, 1  ;;  %v2070_v18 = vadd.f32 %v2069_v31, %v2068_v58  ;;  %v3284_v3 = vsel %vm3277_vm4, %v5566_v8, %v3283_v51  ;;  %v5693_v7 = vsel %vm3273_vm2, %v2114_v22, %v2107_v55 }
 0x451   :  { %v5696_v40 = vsel %vm3340_vm5, %v3170_v23, %v3163_v13  ;;  %v2476_v20 = vadd.f32 %v2475_v37, %v2474_v53  ;;  %v3349_v21 = vsel %vm3340_vm5, %v5596_v28, %v5593_v9  ;;  %v2470_v35 = vrot.slane %v2469_v42, 2  ;;  %v1879_v28 = vpop.permute.xlu0 %1878 }
 0x452   :  { %v2071_v0 = vrot.slane %v2070_v18, 1  ;;  %v3350_v45 = vsel %vm3342_vm6, %v5619_v12, %v3349_v21  ;;  %v3413_v8 = vsel %vm3273_vm2, %v5561_v14, %v5521_v10  ;;  %v3477_v9 = vsel %vm3340_vm5, %v5604_v62, %v5599_v36 }
 0x453   :  { %v2477_v55 = vrot.slane %v2476_v20, 2  ;;  %v3351_v22 = vsel %vm3344_vm7, %v5626_v59, %v3350_v45  ;;  %v3414_v57 = vsel %vm3275_vm3, %v5638_v39, %v3413_v8  ;;  %v5715_v30 = vadd.f32 %v2064_v26, %v2063_v2 }
 0x454   :  { %v2471_v12 = vadd.f32 %v2470_v35, %v2469_v42  ;;  %v3415_v10 = vsel %vm3277_vm4, %v5640_v1, %v3414_v57  ;;  %v3478_v14 = vsel %vm3342_vm6, %v5570_v4, %v3477_v9  ;;  %v3505_v39 = vsel %vm1960_vm1, %v3284_v3, %v3351_v22 }
 0x455   :  { %6105 = vst [vmem:[#allocation25_spill] sm:$0xff] %v5715_v30  ;;  %v2478_v6 = vadd.f32 %v2477_v55, %v2476_v20  ;;  %v3479_v59 = vsel %vm3344_vm7, %v5581_v17, %v3478_v14  ;;  %v2256_v58 = vmul.f32 %v5660_v19, %v5086_v44  ;;  %v1908_v33 = vmul.f32 %v1879_v28, %v5131_v41  ;;  %v5734_v19 = vpop.permute.xlu1 %1863  ;;  %v2939_v23 = vpop.permute.xlu0 %2938 }
 0x456   :  { %v2472_v36 = vrot.slane %v2471_v12, 1  ;;  %v3513_v62 = vsel %vm1960_vm1, %v3415_v10, %v3479_v59  ;;  %v1904_v1 = vmul.f32 %v5671_v61, %v5111_v48  ;;  %v5730_v49 = vadd.f32 %v2071_v0, %v2070_v18 }
 0x457   :  { %v3521_v4 = vpack.c.bf16 %v3513_v62, %v3505_v39  ;;  %v2288_v16 = vcombine.high %v2256_v58, %v2256_v58  ;;  %v2411_v27 = vsel %vm1960_vm1, %v2256_v58, 0.0  ;;  %v2479_v17 = vrot.slane %v2478_v6, 1 }
 0x458   :  { %6106 = vst [vmem:[#allocation26_spill] sm:$0xff] %v5730_v49  ;;  %v2412_v32 = vrot.slane %v2411_v27, 4  ;;  %v1940_v2 = vcombine.high %v1908_v33, %v1908_v33  ;;  %v2129_v31 = vsel %vm1960_vm1, %v1908_v33, 0.0  ;;  %v5736_v52 = vadd.f32 %v2472_v36, %v2471_v12 }
 0x459   :  { %4086 = vmatprep.mubr.bf16.mxu0 %v3521_v4  ;;  %v2418_v53 = vsel %vm1960_vm1, %v2288_v16, 0.0  ;;  %v2130_v13 = vrot.slane %v2129_v31, 4  ;;  %v1936_v61 = vcombine.high %v1904_v1, %v1904_v1  ;;  %v2073_v18 = vsel %vm1960_vm1, %v1904_v1, 0.0  ;;  %v5745_v59 = vpop.permute.xlu1 %2222  ;;  %v2239_v33 = vpop.permute.xlu0 %2238 }
 0x45a   :  { %v2413_v37 = vadd.f32 %v2412_v32, %v2411_v27  ;;  %v2419_v51 = vrot.slane %v2418_v53, 4  ;;  %v2136_v26 = vsel %vm1960_vm1, %v1940_v2, 0.0  ;;  %v2074_v20 = vrot.slane %v2073_v18, 4 }
 0x45b   :  { %v2131_v42 = vadd.f32 %v2130_v13, %v2129_v31  ;;  %v2137_v3 = vrot.slane %v2136_v26, 4  ;;  %v2080_v21 = vsel %vm1960_vm1, %v1936_v61, 0.0  ;;  %v2965_v8 = vmul.f32 %v2939_v23, %v5131_v41 }
 0x45c   :  { %v2414_v0 = vrot.slane %v2413_v37, 2  ;;  %v2420_v35 = vadd.f32 %v2419_v51, %v2418_v53  ;;  %v2081_v45 = vrot.slane %v2080_v21, 4  ;;  %v2075_v57 = vadd.f32 %v2074_v20, %v2073_v18 }
 0x45d   :  { %v2132_v55 = vrot.slane %v2131_v42, 2  ;;  %v2138_v22 = vadd.f32 %v2137_v3, %v2136_v26  ;;  %v2609_v9 = vmul.f32 %v5681_v24, %v5111_v48  ;;  %v2997_v14 = vcombine.high %v2965_v8, %v2965_v8 }
 0x45e   :  { %v2415_v28 = vadd.f32 %v2414_v0, %v2413_v37  ;;  %v2421_v12 = vrot.slane %v2420_v35, 2  ;;  %v2082_v10 = vadd.f32 %v2081_v45, %v2080_v21  ;;  %v2076_v36 = vrot.slane %v2075_v57, 2  ;;  %v5755_v0 = vpop.permute.xlu1 %2926 }
 0x45f   :  { %v2133_v39 = vadd.f32 %v2132_v55, %v2131_v42  ;;  %v2139_v58 = vrot.slane %v2138_v22, 2  ;;  %v3185_v62 = vsel %vm1960_vm1, %v2965_v8, 0.0  ;;  %v3192_v24 = vsel %vm1960_vm1, %v2997_v14, 0.0  ;;  %v2595_v8 = vpop.permute.xlu0 %2594  ;;  %v6109_v14 = vld [vmem:[#allocation14_spill] sm:$0xff] }
 0x460   :  { %v2416_v1 = vrot.slane %v2415_v28, 1  ;;  %v2422_v4 = vadd.f32 %v2421_v12, %v2420_v35  ;;  %v2083_v16 = vrot.slane %v2082_v10, 2  ;;  %v3186_v27 = vrot.slane %v3185_v62, 4 }
 0x461   :  { %v2134_v32 = vrot.slane %v2133_v39, 1  ;;  %v2140_v2 = vadd.f32 %v2139_v58, %v2138_v22  ;;  %v2077_v31 = vadd.f32 %v2076_v36, %v2075_v57  ;;  %v5749_v53 = vadd.f32 %v2479_v17, %v2478_v6 }
 0x462   :  { %v2423_v13 = vrot.slane %v2422_v4, 1  ;;  %v2084_v61 = vadd.f32 %v2083_v16, %v2082_v10  ;;  %v3187_v23 = vadd.f32 %v3186_v27, %v3185_v62  ;;  %v5751_v37 = vadd.f32 %v2416_v1, %v2415_v28 }
 0x463   :  { %v2141_v51 = vrot.slane %v2140_v2, 1  ;;  %v2078_v26 = vrot.slane %v2077_v31, 1  ;;  %v3193_v18 = vrot.slane %v3192_v24, 4  ;;  %v5753_v42 = vadd.f32 %v2134_v32, %v2133_v39 }
 0x464   :  { %6107 = vst [vmem:[#allocation27_spill] sm:$0xff] %v5751_v37  ;;  %v2085_v3 = vrot.slane %v2084_v61, 1  ;;  %v3188_v20 = vrot.slane %v3187_v23, 2  ;;  %v2641_v21 = vcombine.high %v2609_v9, %v2609_v9  ;;  %v5757_v35 = vadd.f32 %v2423_v13, %v2422_v4  ;;  %v6110_v4 = vld [vmem:[#allocation12_spill] sm:$0xff] }
 0x465   :  { %v5759_v45 = vadd.f32 %v2141_v51, %v2140_v2  ;;  %v3194_v6 = vadd.f32 %v3193_v18, %v3192_v24  ;;  %v2777_v17 = vsel %vm1960_vm1, %v2609_v9, 0.0  ;;  %v5762_v55 = vadd.f32 %v2078_v26, %v2077_v31 }
 0x466   :  { %6108 = vst [vmem:[#allocation28_spill] sm:$0xff] %v5757_v35  ;;  %v3189_v22 = vadd.f32 %v3188_v20, %v3187_v23  ;;  %v2778_v57 = vrot.slane %v2777_v17, 4  ;;  %v2784_v28 = vsel %vm1960_vm1, %v2641_v21, 0.0  ;;  %v2262_v39 = vmul.f32 %v2239_v33, %v6109_v14  ;;  %v5774_v23 = vpop.permute.xlu1 %2226 }
 0x467   :  { %v3195_v12 = vrot.slane %v3194_v6, 2  ;;  %v2785_v10 = vrot.slane %v2784_v28, 4  ;;  %v2961_v58 = vmul.f32 %v5706_v47, %v5111_v48  ;;  %v5768_v36 = vadd.f32 %v2085_v3, %v2084_v61 }
 0x468   :  { %v3190_v62 = vrot.slane %v3189_v22, 1  ;;  %v2779_v1 = vadd.f32 %v2778_v57, %v2777_v17  ;;  %v2615_v9 = vmul.f32 %v2595_v8, %v6110_v4  ;;  %v2294_v32 = vcombine.high %v2262_v39, %v2262_v39 }
 0x469   :  { %v3196_v16 = vadd.f32 %v3195_v12, %v3194_v6  ;;  %v2786_v27 = vadd.f32 %v2785_v10, %v2784_v28  ;;  %v2495_v2 = vsel %vm1960_vm1, %v2262_v39, 0.0  ;;  %v2993_v13 = vcombine.high %v2961_v58, %v2961_v58 }
 0x46a   :  { %v2780_v31 = vrot.slane %v2779_v1, 2  ;;  %v2496_v24 = vrot.slane %v2495_v2, 4  ;;  %v1905_v33 = vmul.f32 %v5734_v19, %v5119_v15  ;;  %v2502_v61 = vsel %vm1960_vm1, %v2294_v32, 0.0 }
 0x46b   :  { %v3197_v48 = vrot.slane %v3196_v16, 1  ;;  %v2787_v47 = vrot.slane %v2786_v27, 2  ;;  %v3129_v51 = vsel %vm1960_vm1, %v2961_v58, 0.0  ;;  %v2503_v3 = vrot.slane %v2502_v61, 4 }
 0x46c   :  { %v2781_v26 = vadd.f32 %v2780_v31, %v2779_v1  ;;  %v2497_v18 = vadd.f32 %v2496_v24, %v2495_v2  ;;  %v3130_v20 = vrot.slane %v3129_v51, 4  ;;  %v5778_v21 = vadd.f32 %v3190_v62, %v3189_v22  ;;  %v1894_v62 = vpop.permute.xlu0 %1893 }
 0x46d   :  { %v2788_v6 = vadd.f32 %v2787_v47, %v2786_v27  ;;  %v3136_v17 = vsel %vm1960_vm1, %v2993_v13, 0.0  ;;  %v2647_v8 = vcombine.high %v2615_v9, %v2615_v9  ;;  %v2504_v28 = vadd.f32 %v2503_v3, %v2502_v61  ;;  %v5785_v27 = vpop.permute.xlu1 %2578 }
 0x46e   :  { %v2782_v57 = vrot.slane %v2781_v26, 1  ;;  %v2498_v19 = vrot.slane %v2497_v18, 2  ;;  %v3131_v12 = vadd.f32 %v3130_v20, %v3129_v51  ;;  %v5781_v10 = vadd.f32 %v3197_v48, %v3196_v16 }
 0x46f   :  { %v3137_v39 = vrot.slane %v3136_v17, 4  ;;  %v2861_v32 = vsel %vm1960_vm1, %v2615_v9, 0.0  ;;  %v2868_v58 = vsel %vm1960_vm1, %v2647_v8, 0.0  ;;  %v2789_v1 = vrot.slane %v2788_v6, 1 }
 0x470   :  { %6111 = vst [vmem:[#allocation14_spill] sm:$0xff] %v5781_v10  ;;  %v2499_v2 = vadd.f32 %v2498_v19, %v2497_v18  ;;  %v2505_v31 = vrot.slane %v2504_v28, 2  ;;  %v3132_v22 = vrot.slane %v3131_v12, 2  ;;  %v5787_v24 = vadd.f32 %v2782_v57, %v2781_v26 }
 0x471   :  { %v3138_v13 = vadd.f32 %v3137_v39, %v3136_v17  ;;  %v2862_v47 = vrot.slane %v2861_v32, 4  ;;  %v2869_v61 = vrot.slane %v2868_v58, 4  ;;  %v1937_v3 = vcombine.high %v1905_v33, %v1905_v33 }
 0x472   :  { %v2500_v51 = vrot.slane %v2499_v2, 1  ;;  %v2506_v16 = vadd.f32 %v2505_v31, %v2504_v28  ;;  %v3133_v48 = vadd.f32 %v3132_v22, %v3131_v12  ;;  %v2087_v8 = vsel %vm1960_vm1, %v1905_v33, 0.0  ;;  %v6112_v22 = vld [vmem:[#allocation13_spill] sm:$0xff] }
 0x473   :  { %v3139_v20 = vrot.slane %v3138_v13, 2  ;;  %v2863_v9 = vadd.f32 %v2862_v47, %v2861_v32  ;;  %v2870_v60 = vadd.f32 %v2869_v61, %v2868_v58  ;;  %v5790_v18 = vadd.f32 %v2789_v1, %v2788_v6  ;;  %v2951_v32 = vpop.permute.xlu0 %2950  ;;  %v5797_v58 = vpop.permute.xlu1 %1873 }
 0x474   :  { %v2507_v19 = vrot.slane %v2506_v16, 1  ;;  %v3134_v54 = vrot.slane %v3133_v48, 1  ;;  %v2088_v50 = vrot.slane %v2087_v8, 4  ;;  %v2094_v17 = vsel %vm1960_vm1, %v1937_v3, 0.0 }
 0x475   :  { %v3140_v35 = vadd.f32 %v3139_v20, %v3138_v13  ;;  %v2864_v26 = vrot.slane %v2863_v9, 2  ;;  %v2871_v57 = vrot.slane %v2870_v60, 2  ;;  %v5793_v39 = vadd.f32 %v2500_v51, %v2499_v2 }
 0x476   :  { %v5795_v28 = vadd.f32 %v2507_v19, %v2506_v16  ;;  %v2089_v12 = vadd.f32 %v2088_v50, %v2087_v8  ;;  %v2095_v31 = vrot.slane %v2094_v17, 4  ;;  %v1911_v47 = vmul.f32 %v1894_v62, %v6112_v22 }
 0x477   :  { %v3141_v33 = vrot.slane %v3140_v35, 1  ;;  %v2865_v6 = vadd.f32 %v2864_v26, %v2863_v9  ;;  %v2872_v1 = vadd.f32 %v2871_v57, %v2870_v60  ;;  %v5800_v61 = vadd.f32 %v3134_v54, %v3133_v48 }
 0x478   :  { %v2090_v13 = vrot.slane %v2089_v12, 2  ;;  %v2096_v20 = vadd.f32 %v2095_v31, %v2094_v17  ;;  %v2258_v2 = vmul.f32 %v5745_v59, %v5119_v15  ;;  %v1943_v3 = vcombine.high %v1911_v47, %v1911_v47  ;;  %v5812_v31 = vpop.permute.xlu1 %2582 }
 0x479   :  { %v2866_v51 = vrot.slane %v2865_v6, 1  ;;  %v2873_v16 = vrot.slane %v2872_v1, 1  ;;  %v2968_v50 = vmul.f32 %v2951_v32, %v6112_v22  ;;  %v2171_v37 = vsel %vm1960_vm1, %v1911_v47, 0.0 }
 0x47a   :  { %v2091_v8 = vadd.f32 %v2090_v13, %v2089_v12  ;;  %v2097_v19 = vrot.slane %v2096_v20, 2  ;;  %v2290_v9 = vcombine.high %v2258_v2, %v2258_v2  ;;  %v5806_v60 = vadd.f32 %v3141_v33, %v3140_v35 }
 0x47b   :  { %v5808_v62 = vadd.f32 %v2866_v51, %v2865_v6  ;;  %v2172_v54 = vrot.slane %v2171_v37, 4  ;;  %v2178_v48 = vsel %vm1960_vm1, %v1943_v3, 0.0  ;;  %v2439_v17 = vsel %vm1960_vm1, %v2258_v2, 0.0 }
 0x47c   :  { %v2092_v26 = vrot.slane %v2091_v8, 1  ;;  %v2098_v57 = vadd.f32 %v2097_v19, %v2096_v20  ;;  %v2179_v59 = vrot.slane %v2178_v48, 4  ;;  %v2440_v12 = vrot.slane %v2439_v17, 4 }
 0x47d   :  { %6113 = vst [vmem:[#allocation12_spill] sm:$0xff] %v5808_v62  ;;  %v2173_v32 = vadd.f32 %v2172_v54, %v2171_v37  ;;  %v2446_v13 = vsel %vm1960_vm1, %v2290_v9, 0.0  ;;  %v3000_v47 = vcombine.high %v2968_v50, %v2968_v50  ;;  %v5815_v49 = vadd.f32 %v2873_v16, %v2872_v1 }
 0x47e   :  { %v5817_v35 = vadd.f32 %v2092_v26, %v2091_v8  ;;  %v2180_v33 = vadd.f32 %v2179_v59, %v2178_v48  ;;  %v2447_v6 = vrot.slane %v2446_v13, 4  ;;  %v2441_v3 = vadd.f32 %v2440_v12, %v2439_v17  ;;  %v5825_v59 = vpop.permute.xlu1 %2934 }
 0x47f   :  { %6114 = vst [vmem:[#allocation13_spill] sm:$0xff] %v5815_v49  ;;  %v2174_v51 = vrot.slane %v2173_v32, 2  ;;  %v3227_v20 = vsel %vm1960_vm1, %v2968_v50, 0.0  ;;  %v3234_v19 = vsel %vm1960_vm1, %v3000_v47, 0.0  ;;  %v2099_v2 = vrot.slane %v2098_v57, 1 }
 0x480   :  { %v2181_v62 = vrot.slane %v2180_v33, 2  ;;  %v2448_v25 = vadd.f32 %v2447_v6, %v2446_v13  ;;  %v3228_v37 = vrot.slane %v3227_v20, 4  ;;  %v2442_v46 = vrot.slane %v2441_v3, 2 }
 0x481   :  { %v2175_v54 = vadd.f32 %v2174_v51, %v2173_v32  ;;  %v3235_v9 = vrot.slane %v3234_v19, 4  ;;  %v2962_v1 = vmul.f32 %v5755_v0, %v5119_v15  ;;  %v2259_v26 = vmul.f32 %v5774_v23, %v5108_v38 }
 0x482   :  { %v2182_v16 = vadd.f32 %v2181_v62, %v2180_v33  ;;  %v2449_v8 = vrot.slane %v2448_v25, 2  ;;  %v3229_v48 = vadd.f32 %v3228_v37, %v3227_v20  ;;  %v2443_v17 = vadd.f32 %v2442_v46, %v2441_v3 }
 0x483   :  { %v2176_v50 = vrot.slane %v2175_v54, 1  ;;  %v3236_v12 = vadd.f32 %v3235_v9, %v3234_v19  ;;  %v2994_v47 = vcombine.high %v2962_v1, %v2962_v1  ;;  %v3143_v51 = vsel %vm1960_vm1, %v2962_v1, 0.0  ;;  %v5840_v1 = vpop.permute.xlu1 %2234 }
 0x484   :  { %v2183_v13 = vrot.slane %v2182_v16, 1  ;;  %v2450_v6 = vadd.f32 %v2449_v8, %v2448_v25  ;;  %v3230_v32 = vrot.slane %v3229_v48, 2  ;;  %v5828_v49 = vadd.f32 %v2099_v2, %v2098_v57 }
 0x485   :  { %v2444_v15 = vrot.slane %v2443_v17, 1  ;;  %v3237_v0 = vrot.slane %v3236_v12, 2  ;;  %v3144_v62 = vrot.slane %v3143_v51, 4  ;;  %v5830_v33 = vadd.f32 %v2176_v50, %v2175_v54 }
 0x486   :  { %v2451_v20 = vrot.slane %v2450_v6, 1  ;;  %v3231_v23 = vadd.f32 %v3230_v32, %v3229_v48  ;;  %v3150_v37 = vsel %vm1960_vm1, %v2994_v47, 0.0  ;;  %v5833_v30 = vadd.f32 %v2183_v13, %v2182_v16 }
 0x487   :  { %6115 = vst [vmem:[#allocation29_spill] sm:$0xff] %v5830_v33  ;;  %v5835_v46 = vadd.f32 %v3237_v0, %v3236_v12  ;;  %v3145_v3 = vadd.f32 %v3144_v62, %v3143_v51  ;;  %v3151_v25 = vrot.slane %v3150_v37, 4  ;;  %v5837_v19 = vadd.f32 %v2444_v15, %v2443_v17 }
 0x488   :  { %6116 = vst [vmem:[#allocation30_spill] sm:$0xff] %v5833_v30  ;;  %v3232_v9 = vrot.slane %v3231_v23, 1  ;;  %v2291_v57 = vcombine.high %v2259_v26, %v2259_v26  ;;  %v2453_v2 = vsel %vm1960_vm1, %v2259_v26, 0.0  ;;  %v5842_v54 = vadd.f32 %v2451_v20, %v2450_v6 }
 0x489   :  { %v3146_v8 = vrot.slane %v3145_v3, 2  ;;  %v3152_v48 = vadd.f32 %v3151_v25, %v3150_v37  ;;  %v2454_v50 = vrot.slane %v2453_v2, 4  ;;  %v2611_v47 = vmul.f32 %v5785_v27, %v5108_v38 }
 0x48a   :  { %v2460_v12 = vsel %vm1960_vm1, %v2291_v57, 0.0  ;;  %v1907_v17 = vmul.f32 %v5797_v58, %v5116_v56  ;;  %v5850_v13 = vadd.f32 %v3232_v9, %v3231_v23  ;;  %v5856_v23 = vpop.permute.xlu1 %2586 }
 0x48b   :  { %v3147_v26 = vadd.f32 %v3146_v8, %v3145_v3  ;;  %v3153_v32 = vrot.slane %v3152_v48, 2  ;;  %v2455_v51 = vadd.f32 %v2454_v50, %v2453_v2  ;;  %v2461_v6 = vrot.slane %v2460_v12, 4 }
 0x48c   :  { %6117 = vst [vmem:[#allocation31_spill] sm:$0xff] %v5850_v13  ;;  %v2643_v15 = vcombine.high %v2611_v47, %v2611_v47  ;;  %v2805_v0 = vsel %vm1960_vm1, %v2611_v47, 0.0  ;;  %v1939_v62 = vcombine.high %v1907_v17, %v1907_v17  ;;  %v2115_v27 = vsel %vm1960_vm1, %v1907_v17, 0.0 }
 0x48d   :  { %v3148_v20 = vrot.slane %v3147_v26, 1  ;;  %v3154_v37 = vadd.f32 %v3153_v32, %v3152_v48  ;;  %v2456_v25 = vrot.slane %v2455_v51, 2  ;;  %v2806_v57 = vrot.slane %v2805_v0, 4 }
 0x48e   :  { %v2462_v16 = vadd.f32 %v2461_v6, %v2460_v12  ;;  %v2812_v38 = vsel %vm1960_vm1, %v2643_v15, 0.0  ;;  %v2122_v58 = vsel %vm1960_vm1, %v1939_v62, 0.0  ;;  %v2116_v11 = vrot.slane %v2115_v27, 4 }
 0x48f   :  { %v5858_v3 = vadd.f32 %v3148_v20, %v3147_v26  ;;  %v3155_v9 = vrot.slane %v3154_v37, 1  ;;  %v2457_v2 = vadd.f32 %v2456_v25, %v2455_v51  ;;  %v2807_v8 = vadd.f32 %v2806_v57, %v2805_v0 }
 0x490   :  { %v2463_v50 = vrot.slane %v2462_v16, 2  ;;  %v2813_v47 = vrot.slane %v2812_v38, 4  ;;  %v2123_v48 = vrot.slane %v2122_v58, 4  ;;  %v2612_v17 = vmul.f32 %v5812_v31, %v5116_v56 }
 0x491   :  { %v5860_v32 = vadd.f32 %v3155_v9, %v3154_v37  ;;  %v2458_v12 = vrot.slane %v2457_v2, 1  ;;  %v2808_v6 = vrot.slane %v2807_v8, 2  ;;  %v2117_v5 = vadd.f32 %v2116_v11, %v2115_v27  ;;  %v5865_v37 = vpop.permute.xlu1 %1883 }
 0x492   :  { %v2464_v15 = vadd.f32 %v2463_v50, %v2462_v16  ;;  %v2814_v62 = vadd.f32 %v2813_v47, %v2812_v38  ;;  %v2124_v13 = vadd.f32 %v2123_v48, %v2122_v58  ;;  %v2644_v30 = vcombine.high %v2612_v17, %v2612_v17 }
 0x493   :  { %v2459_v26 = vadd.f32 %v2458_v12, %v2457_v2  ;;  %v2809_v20 = vadd.f32 %v2808_v6, %v2807_v8  ;;  %v2819_v51 = vsel %vm1960_vm1, %v2612_v17, 0.0  ;;  %v2118_v57 = vrot.slane %v2117_v5, 2 }
 0x494   :  { %v2465_v0 = vrot.slane %v2464_v15, 1  ;;  %v2815_v25 = vrot.slane %v2814_v62, 2  ;;  %v2125_v33 = vrot.slane %v2124_v13, 2  ;;  %v2820_v44 = vrot.slane %v2819_v51, 4 }
 0x495   :  { %v2810_v9 = vrot.slane %v2809_v20, 1  ;;  %v2826_v10 = vsel %vm1960_vm1, %v2644_v30, 0.0  ;;  %v3288_v11 = vsel %vm3273_vm2, %v5768_v36, %v5762_v55  ;;  %v2119_v38 = vadd.f32 %v2118_v57, %v2117_v5  ;;  %v5883_v17 = vpop.permute.xlu1 %2590 }
 0x496   :  { %v2466_v31 = vadd.f32 %v2465_v0, %v2464_v15  ;;  %v2816_v16 = vadd.f32 %v2815_v25, %v2814_v62  ;;  %v2126_v27 = vadd.f32 %v2125_v33, %v2124_v13  ;;  %v2821_v2 = vadd.f32 %v2820_v44, %v2819_v51 }
 0x497   :  { %v2811_v58 = vadd.f32 %v2810_v9, %v2809_v20  ;;  %v2827_v8 = vrot.slane %v2826_v10, 4  ;;  %v3289_v50 = vsel %vm3275_vm3, %v5817_v35, %v3288_v11  ;;  %v2120_v12 = vrot.slane %v2119_v38, 1 }
 0x498   :  { %v3358_v47 = vsel %vm3340_vm5, %v2466_v31, %v2459_v26  ;;  %v2817_v48 = vrot.slane %v2816_v16, 1  ;;  %v2127_v6 = vrot.slane %v2126_v27, 1  ;;  %v2822_v55 = vrot.slane %v2821_v2, 2 }
 0x499   :  { %v5876_v30 = vsel %vm3342_vm6, %v5736_v52, %v3358_v47  ;;  %v2828_v36 = vadd.f32 %v2827_v8, %v2826_v10  ;;  %v3290_v5 = vsel %vm3277_vm4, %v5828_v49, %v3289_v50  ;;  %v2121_v44 = vadd.f32 %v2120_v12, %v2119_v38  ;;  %v5917_v31 = vpop.permute.xlu1 %2942 }
 0x49a   :  { %v2818_v33 = vadd.f32 %v2817_v48, %v2816_v16  ;;  %v2128_v13 = vadd.f32 %v2127_v6, %v2126_v27  ;;  %v3355_v35 = vsel %vm3340_vm5, %v5648_v43, %v5642_v63  ;;  %v2823_v15 = vadd.f32 %v2822_v55, %v2821_v2 }
 0x49b   :  { %v2829_v62 = vrot.slane %v2828_v36, 2  ;;  %v3356_v52 = vsel %vm3342_vm6, %v5837_v19, %v3355_v35  ;;  %v3419_v10 = vsel %vm3273_vm2, %v5790_v18, %v5787_v24  ;;  %v3292_v26 = vsel %vm3275_vm3, %v2121_v44, %v5693_v7 }
 0x49c   :  { %v3422_v49 = vsel %vm3273_vm2, %v2818_v33, %v2811_v58  ;;  %v3357_v20 = vsel %vm3344_vm7, %v5842_v54, %v3356_v52  ;;  %v3420_v63 = vsel %vm3275_vm3, %v5662_v29, %v3419_v10  ;;  %v5898_v43 = vsel %vm3277_vm4, %v2128_v13, %v3292_v26 }
 0x49d   :  { %v2824_v51 = vrot.slane %v2823_v15, 1  ;;  %v2830_v19 = vadd.f32 %v2829_v62, %v2828_v36  ;;  %v3421_v0 = vsel %vm3277_vm4, %v5664_v34, %v3420_v63  ;;  %v3483_v24 = vsel %vm3340_vm5, %v5806_v60, %v5800_v61  ;;  %v1889_v35 = vpop.permute.xlu1 %1888 }
 0x49e   :  { %v3507_v7 = vsel %vm1960_vm1, %v3290_v5, %v3357_v20  ;;  %v2964_v18 = vmul.f32 %v5825_v59, %v5116_v56  ;;  %v2261_v29 = vmul.f32 %v5840_v1, %v5131_v41  ;;  %v3484_v57 = vsel %vm3342_vm6, %v5858_v3, %v3483_v24 }
 0x49f   :  { %v2825_v54 = vadd.f32 %v2824_v51, %v2823_v15  ;;  %v2831_v25 = vrot.slane %v2830_v19, 1  ;;  %v2613_v34 = vmul.f32 %v5856_v23, %v5131_v41  ;;  %v3485_v9 = vsel %vm3344_vm7, %v5860_v32, %v3484_v57 }
 0x4a0   :  { %v2996_v61 = vcombine.high %v2964_v18, %v2964_v18  ;;  %v3171_v60 = vsel %vm1960_vm1, %v2964_v18, 0.0  ;;  %v2293_v11 = vcombine.high %v2261_v29, %v2261_v29  ;;  %v3515_v1 = vsel %vm1960_vm1, %v3421_v0, %v3485_v9 }
 0x4a1   :  { %v2832_v56 = vadd.f32 %v2831_v25, %v2830_v19  ;;  %v3423_v59 = vsel %vm3275_vm3, %v2825_v54, %v3422_v49  ;;  %v3172_v16 = vrot.slane %v3171_v60, 4  ;;  %v3523_v38 = vpack.c.bf16 %v3515_v1, %v3507_v7 }
 0x4a2   :  { %v3178_v3 = vsel %vm1960_vm1, %v2996_v61, 0.0  ;;  %v2481_v41 = vsel %vm1960_vm1, %v2261_v29, 0.0  ;;  %v2488_v23 = vsel %vm1960_vm1, %v2293_v11, 0.0  ;;  %v2645_v50 = vcombine.high %v2613_v34, %v2613_v34 }
 0x4a3   :  { %v3424_v32 = vsel %vm3277_vm4, %v2832_v56, %v3423_v59  ;;  %v3173_v27 = vadd.f32 %v3172_v16, %v3171_v60  ;;  %v3179_v58 = vrot.slane %v3178_v3, 4  ;;  %v2482_v2 = vrot.slane %v2481_v41, 4  ;;  %4090 = vmatprep.mubr.bf16.mxu1 %v3523_v38  ;;  %v2243_v56 = vpop.permute.xlu1 %2242 }
 0x4a4   :  { %v2489_v8 = vrot.slane %v2488_v23, 4  ;;  %v2833_v47 = vsel %vm1960_vm1, %v2613_v34, 0.0  ;;  %v1909_v48 = vmul.f32 %v5865_v37, %v6109_v14  ;;  %v2840_v33 = vsel %vm1960_vm1, %v2645_v50, 0.0 }
 0x4a5   :  { %v3174_v12 = vrot.slane %v3173_v27, 2  ;;  %v3180_v6 = vadd.f32 %v3179_v58, %v3178_v3  ;;  %v2483_v55 = vadd.f32 %v2482_v2, %v2481_v41  ;;  %v2834_v36 = vrot.slane %v2833_v47, 4 }
 0x4a6   :  { %v2490_v5 = vadd.f32 %v2489_v8, %v2488_v23  ;;  %v1941_v44 = vcombine.high %v1909_v48, %v1909_v48  ;;  %v2143_v13 = vsel %vm1960_vm1, %v1909_v48, 0.0  ;;  %v2841_v26 = vrot.slane %v2840_v33, 4 }
 0x4a7   :  { %v3175_v15 = vadd.f32 %v3174_v12, %v3173_v27  ;;  %v3181_v62 = vrot.slane %v3180_v6, 2  ;;  %v2484_v52 = vrot.slane %v2483_v55, 2  ;;  %v2835_v10 = vadd.f32 %v2834_v36, %v2833_v47 }
 0x4a8   :  { %v2491_v49 = vrot.slane %v2490_v5, 2  ;;  %v2144_v20 = vrot.slane %v2143_v13, 4  ;;  %v2150_v37 = vsel %vm1960_vm1, %v1941_v44, 0.0  ;;  %v2842_v7 = vadd.f32 %v2841_v26, %v2840_v33 }
 0x4a9   :  { %v3176_v63 = vrot.slane %v3175_v15, 1  ;;  %v3182_v51 = vadd.f32 %v3181_v62, %v3180_v6  ;;  %v2485_v19 = vadd.f32 %v2484_v52, %v2483_v55  ;;  %v2836_v0 = vrot.slane %v2835_v10, 2 }
 0x4aa   :  { %v2492_v24 = vadd.f32 %v2491_v49, %v2490_v5  ;;  %v2145_v18 = vadd.f32 %v2144_v20, %v2143_v13  ;;  %v2151_v29 = vrot.slane %v2150_v37, 4  ;;  %v2843_v61 = vrot.slane %v2842_v7, 2 }
 0x4ab   :  { %v3177_v54 = vadd.f32 %v3176_v63, %v3175_v15  ;;  %v3183_v25 = vrot.slane %v3182_v51, 1  ;;  %v2486_v57 = vrot.slane %v2485_v19, 1  ;;  %v2837_v34 = vadd.f32 %v2836_v0, %v2835_v10 }
 0x4ac   :  { %v2493_v9 = vrot.slane %v2492_v24, 1  ;;  %v2146_v60 = vrot.slane %v2145_v18, 2  ;;  %v2152_v11 = vadd.f32 %v2151_v29, %v2150_v37  ;;  %v6118_v59 = vrot.slane %v5835_v46, 1 }
 0x4ad   :  { %v3184_v16 = vadd.f32 %v3183_v25, %v3182_v51  ;;  %v3487_v38 = vsel %vm3342_vm6, %v3177_v54, %v5696_v40  ;;  %v5938_v3 = vadd.f32 %v2486_v57, %v2485_v19  ;;  %v2838_v41 = vrot.slane %v2837_v34, 1 }
 0x4ae   :  { %v5934_v1 = vadd.f32 %v6118_v59, %v5835_v46  ;;  %v2844_v23 = vadd.f32 %v2843_v61, %v2842_v7  ;;  %v2147_v27 = vadd.f32 %v2146_v60, %v2145_v18  ;;  %v2153_v58 = vrot.slane %v2152_v11, 2 }
 0x4af   :  { %v3488_v2 = vsel %vm3344_vm7, %v3184_v16, %v3487_v38  ;;  %v5941_v8 = vadd.f32 %v2493_v9, %v2492_v24  ;;  %v2614_v50 = vmul.f32 %v5883_v17, %v6109_v14  ;;  %v3360_v46 = vsel %vm3344_vm7, %v5749_v53, %v5876_v30  ;;  %v2947_v30 = vpop.permute.xlu1 %2946 }
 0x4b0   :  { %v2845_v47 = vrot.slane %v2844_v23, 1  ;;  %v2148_v48 = vrot.slane %v2147_v27, 1  ;;  %v2154_v40 = vadd.f32 %v2153_v58, %v2152_v11  ;;  %v3508_v12 = vsel %vm1960_vm1, %v5898_v43, %v3360_v46 }
 0x4b1   :  { %v2646_v6 = vcombine.high %v2614_v50, %v2614_v50  ;;  %v2847_v55 = vsel %vm1960_vm1, %v2614_v50, 0.0  ;;  %v3516_v36 = vsel %vm1960_vm1, %v3424_v32, %v3488_v2  ;;  %v2966_v5 = vmul.f32 %v5917_v31, %v6109_v14 }
 0x4b2   :  { %v5954_v33 = vadd.f32 %v2838_v41, %v2837_v34  ;;  %v5956_v17 = vadd.f32 %v2845_v47, %v2844_v23  ;;  %v5958_v44 = vadd.f32 %v2148_v48, %v2147_v27  ;;  %v2848_v53 = vrot.slane %v2847_v55, 4 }
 0x4b3   :  { %v2854_v13 = vsel %vm1960_vm1, %v2646_v6, 0.0  ;;  %v3524_v15 = vpack.c.bf16 %v3516_v36, %v3508_v12  ;;  %v2998_v43 = vcombine.high %v2966_v5, %v2966_v5  ;;  %v3199_v62 = vsel %vm1960_vm1, %v2966_v5, 0.0  ;;  %v2247_v12 = vpop.permute.xlu1 %2246 }
 0x4b4   :  { %v2155_v52 = vrot.slane %v2154_v40, 1  ;;  %v2849_v10 = vadd.f32 %v2848_v53, %v2847_v55  ;;  %v2855_v32 = vrot.slane %v2854_v13, 4  ;;  %v3200_v49 = vrot.slane %v3199_v62, 4 }
 0x4b5   :  { %4091 = vmatmul.mubr.bf16.vlgmr.msra.gmra.mrb[64].mxu1 %v3524_v15  ;;  %v3206_v14 = vsel %vm1960_vm1, %v2998_v43, 0.0  ;;  %v1910_v31 = vmul.f32 %v1889_v35, %v6110_v4  ;;  %v2263_v26 = vmul.f32 %v2243_v56, %v6110_v4  ;;  %v2967_v20 = vmul.f32 %v2947_v30, %v6110_v4 }
 0x4b6   :  { %v2850_v37 = vrot.slane %v2849_v10, 2  ;;  %v2856_v63 = vadd.f32 %v2855_v32, %v2854_v13  ;;  %v3201_v51 = vadd.f32 %v3200_v49, %v3199_v62  ;;  %v3207_v19 = vrot.slane %v3206_v14, 4 }
 0x4b7   :  { %v1942_v0 = vcombine.high %v1910_v31, %v1910_v31  ;;  %v2157_v24 = vsel %vm1960_vm1, %v1910_v31, 0.0  ;;  %v2295_v7 = vcombine.high %v2263_v26, %v2263_v26  ;;  %v2509_v18 = vsel %vm1960_vm1, %v2263_v26, 0.0 }
 0x4b8   :  { %v2851_v29 = vadd.f32 %v2850_v37, %v2849_v10  ;;  %v2857_v54 = vrot.slane %v2856_v63, 2  ;;  %v3202_v25 = vrot.slane %v3201_v51, 2  ;;  %v3208_v57 = vadd.f32 %v3207_v19, %v3206_v14 }
 0x4b9   :  { %v2158_v34 = vrot.slane %v2157_v24, 4  ;;  %v2164_v35 = vsel %vm1960_vm1, %v1942_v0, 0.0  ;;  %v2510_v9 = vrot.slane %v2509_v18, 4  ;;  %v2516_v4 = vsel %vm1960_vm1, %v2295_v7, 0.0 }
 0x4ba   :  { %v2852_v61 = vrot.slane %v2851_v29, 1  ;;  %v2858_v60 = vadd.f32 %v2857_v54, %v2856_v63  ;;  %v3203_v11 = vadd.f32 %v3202_v25, %v3201_v51  ;;  %v3209_v56 = vrot.slane %v3208_v57, 2 }
 0x4bb   :  { %v2159_v59 = vadd.f32 %v2158_v34, %v2157_v24  ;;  %v2165_v16 = vrot.slane %v2164_v35, 4  ;;  %v2511_v38 = vadd.f32 %v2510_v9, %v2509_v18  ;;  %v2517_v41 = vrot.slane %v2516_v4, 4 }
 0x4bc   :  { %v2156_v23 = vadd.f32 %v2155_v52, %v2154_v40  ;;  %v2859_v27 = vrot.slane %v2858_v60, 1  ;;  %v3204_v58 = vrot.slane %v3203_v11, 1  ;;  %v3210_v2 = vadd.f32 %v3209_v56, %v3208_v57 }
 0x4bd   :  { %v2160_v50 = vrot.slane %v2159_v59, 2  ;;  %v2166_v46 = vadd.f32 %v2165_v16, %v2164_v35  ;;  %v2512_v47 = vrot.slane %v2511_v38, 2  ;;  %v2518_v48 = vadd.f32 %v2517_v41, %v2516_v4  ;;  %v2599_v35 = vpop.permute.xlu1 %2598 }
 0x4be   :  { %v2853_v6 = vadd.f32 %v2852_v61, %v2851_v29  ;;  %v2860_v55 = vadd.f32 %v2859_v27, %v2858_v60  ;;  %v3211_v36 = vrot.slane %v3210_v2, 1  ;;  %v2999_v5 = vcombine.high %v2967_v20, %v2967_v20 }
 0x4bf   :  { %v2161_v53 = vadd.f32 %v2160_v50, %v2159_v59  ;;  %v2167_v30 = vrot.slane %v2166_v46, 2  ;;  %v2513_v13 = vadd.f32 %v2512_v47, %v2511_v38  ;;  %v2519_v15 = vrot.slane %v2518_v48, 2 }
 0x4c0   :  { %v3205_v43 = vadd.f32 %v3204_v58, %v3203_v11  ;;  %v3213_v62 = vsel %vm1960_vm1, %v2967_v20, 0.0  ;;  %v3220_v40 = vsel %vm1960_vm1, %v2999_v5, 0.0  ;;  %v2264_v52 = vmul.f32 %v2247_v12, %v6112_v22 }
 0x4c1   :  { %v2162_v10 = vrot.slane %v2161_v53, 1  ;;  %v2168_v32 = vadd.f32 %v2167_v30, %v2166_v46  ;;  %v2514_v49 = vrot.slane %v2513_v13, 1  ;;  %v2520_v14 = vadd.f32 %v2519_v15, %v2518_v48  ;;  %v2919_v48 = vpop.permute.xlu1 %2918 }
 0x4c2   :  { %v3214_v31 = vrot.slane %v3213_v62, 4  ;;  %v3221_v26 = vrot.slane %v3220_v40, 4  ;;  %v2296_v37 = vcombine.high %v2264_v52, %v2264_v52  ;;  %v2523_v63 = vsel %vm1960_vm1, %v2264_v52, 0.0 }
 0x4c3   :  { %v3212_v51 = vadd.f32 %v3211_v36, %v3210_v2  ;;  %v2163_v19 = vadd.f32 %v2162_v10, %v2161_v53  ;;  %v2169_v0 = vrot.slane %v2168_v32, 1  ;;  %v2515_v24 = vadd.f32 %v2514_v49, %v2513_v13 }
 0x4c4   :  { %v3215_v7 = vadd.f32 %v3214_v31, %v3213_v62  ;;  %v3222_v18 = vadd.f32 %v3221_v26, %v3220_v40  ;;  %v2524_v20 = vrot.slane %v2523_v63, 4  ;;  %v2530_v29 = vsel %vm1960_vm1, %v2296_v37, 0.0 }
 0x4c5   :  { %v2170_v54 = vadd.f32 %v2169_v0, %v2168_v32  ;;  %v2521_v25 = vrot.slane %v2520_v14, 1  ;;  %v2531_v57 = vrot.slane %v2530_v29, 4  ;;  %v3294_v34 = vsel %vm3273_vm2, %v5759_v45, %v5753_v42 }
 0x4c6   :  { %v3216_v9 = vrot.slane %v3215_v7, 2  ;;  %v3223_v4 = vrot.slane %v3222_v18, 2  ;;  %v2525_v61 = vadd.f32 %v2524_v20, %v2523_v63  ;;  %v3295_v60 = vsel %vm3275_vm3, %v5958_v44, %v3294_v34  ;;  %v6121_v63 = vld [vmem:[#allocation29_spill] sm:$0xff] }
 0x4c7   :  { %v2532_v11 = vadd.f32 %v2531_v57, %v2530_v29  ;;  %v3296_v56 = vsel %vm3277_vm4, %v2156_v23, %v3295_v60  ;;  %v3361_v59 = vsel %vm3340_vm5, %v5941_v8, %v5938_v3  ;;  %v3425_v16 = vsel %vm3273_vm2, %v5956_v17, %v5954_v33  ;;  %v6119_v8 = vld [vmem:[#allocation14_spill] sm:$0xff] }
 0x4c8   :  { %v3217_v38 = vadd.f32 %v3216_v9, %v3215_v7  ;;  %v3224_v42 = vadd.f32 %v3223_v4, %v3222_v18  ;;  %v2526_v45 = vrot.slane %v2525_v61, 2  ;;  %v3362_v41 = vsel %vm3342_vm6, %v5793_v39, %v3361_v59  ;;  %v6123_v9 = vld [vmem:[#allocation31_spill] sm:$0xff] }
 0x4c9   :  { %v2522_v27 = vadd.f32 %v2521_v25, %v2520_v14  ;;  %v2533_v58 = vrot.slane %v2532_v11, 2  ;;  %v3363_v44 = vsel %vm3344_vm7, %v5795_v28, %v3362_v41  ;;  %v3426_v23 = vsel %vm3275_vm3, %v2853_v6, %v3425_v16  ;;  %v6124_v59 = vld [vmem:[#allocation19_spill] sm:$0xff]  ;;  %v6125_v16 = vld [vmem:[#allocation20_spill] sm:$0xff]  ;;  %v6126_v41 = vld [vmem:[#allocation25_spill] sm:$0xff] }
 0x4ca   :  { %v3225_v2 = vrot.slane %v3224_v42, 1  ;;  %v2527_v50 = vadd.f32 %v2526_v45, %v2525_v61  ;;  %v3427_v3 = vsel %vm3277_vm4, %v2860_v55, %v3426_v23  ;;  %v3489_v33 = vsel %vm3340_vm5, %v6119_v8, %v5778_v21 }
 0x4cb   :  { %v2534_v17 = vadd.f32 %v2533_v58, %v2532_v11  ;;  %v3490_v46 = vsel %vm3342_vm6, %v3205_v43, %v3489_v33  ;;  %v3509_v39 = vsel %vm1960_vm1, %v3296_v56, %v3363_v44  ;;  %v2616_v47 = vmul.f32 %v2599_v35, %v6112_v22  ;;  %v6120_v43 = vld [vmem:[#allocation11_spill] sm:$0xff]  ;;  %v6128_v44 = vld [vmem:[#allocation16_spill] sm:$0xff] }
 0x4cc   :  { %v3218_v12 = vrot.slane %v3217_v38, 1  ;;  %v3226_v28 = vadd.f32 %v3225_v2, %v3224_v42  ;;  %v2528_v36 = vrot.slane %v2527_v50, 1  ;;  %v3491_v6 = vsel %vm3344_vm7, %v3212_v51, %v3490_v46  ;;  %v6127_v58 = vld [vmem:[#allocation15_spill] sm:$0xff] }
 0x4cd   :  { %v2535_v5 = vrot.slane %v2534_v17, 1  ;;  %v3517_v55 = vsel %vm1960_vm1, %v3427_v3, %v3491_v6  ;;  %v2648_v53 = vcombine.high %v2616_v47, %v2616_v47  ;;  %v2875_v30 = vsel %vm1960_vm1, %v2616_v47, 0.0  ;;  %v6129_v3 = vld [vmem:[#allocation26_spill] sm:$0xff]  ;;  %v6130_v33 = vld [vmem:[#allocation27_spill] sm:$0xff] }
 0x4ce   :  { %v2529_v21 = vadd.f32 %v2528_v36, %v2527_v50  ;;  %v3525_v13 = vpack.c.bf16 %v3517_v55, %v3509_v39  ;;  %v2876_v15 = vrot.slane %v2875_v30, 4  ;;  %v2960_v62 = vmul.f32 %v2919_v48, %v6120_v43  ;;  %v6131_v39 = vld [vmem:[#allocation28_spill] sm:$0xff]  ;;  %v6132_v48 = vld [vmem:[#allocation21_spill] sm:$0xff]  ;;  %v6137_v43 = vld [vmem:[#allocation18_spill] sm:$0xff] }
 0x4cf   :  { %v2536_v40 = vadd.f32 %v2535_v5, %v2534_v17  ;;  %v2882_v22 = vsel %vm1960_vm1, %v2648_v53, 0.0  ;;  %v3297_v52 = vsel %vm3273_vm2, %v2170_v54, %v2163_v19  ;;  %v3364_v10 = vsel %vm3340_vm5, %v2522_v27, %v2515_v24  ;;  %v6122_v19 = vld [vmem:[#allocation30_spill] sm:$0xff]  ;;  %v6134_v5 = vld [vmem:[#allocation12_spill] sm:$0xff]  ;;  %v6135_v55 = vld [vmem:[#allocation13_spill] sm:$0xff] }
 0x4d0   :  { %4094 = vmatprep.mubr.bf16.mxu1 %v3525_v13  ;;  %v2877_v32 = vadd.f32 %v2876_v15, %v2875_v30  ;;  %v2883_v49 = vrot.slane %v2882_v22, 4  ;;  %v2992_v14 = vcombine.high %v2960_v62, %v2960_v62  ;;  %v3115_v31 = vsel %vm1960_vm1, %v2960_v62, 0.0  ;;  %v6136_v30 = vld [vmem:[#allocation17_spill] sm:$0xff] }
 0x4d1   :  { %v3219_v26 = vadd.f32 %v3218_v12, %v3217_v38  ;;  %v3116_v37 = vrot.slane %v3115_v31, 4  ;;  %v3298_v51 = vsel %vm3275_vm3, %v6121_v63, %v3297_v52  ;;  %v3365_v0 = vsel %vm3342_vm6, %v2529_v21, %v3364_v10  ;;  %v6133_v12 = vld [vmem:[#allocation22_spill] sm:$0xff] }
 0x4d2   :  { %v2878_v7 = vrot.slane %v2877_v32, 2  ;;  %v2884_v18 = vadd.f32 %v2883_v49, %v2882_v22  ;;  %v3122_v20 = vsel %vm1960_vm1, %v2992_v14, 0.0  ;;  %v3299_v24 = vsel %vm3277_vm4, %v6122_v19, %v3298_v51  ;;  %v6139_v49 = vld [vmem:[#allocation24_spill] sm:$0xff] }
 0x4d3   :  { %v3117_v29 = vadd.f32 %v3116_v37, %v3115_v31  ;;  %v3123_v54 = vrot.slane %v3122_v20, 4  ;;  %v3366_v25 = vsel %vm3344_vm7, %v2536_v40, %v3365_v0  ;;  %v3492_v57 = vsel %vm3340_vm5, %v3226_v28, %v3219_v26 }
 0x4d4   :  { %v2879_v34 = vadd.f32 %v2878_v7, %v2877_v32  ;;  %v2885_v35 = vrot.slane %v2884_v18, 2  ;;  %v3493_v4 = vsel %vm3342_vm6, %v6123_v9, %v3492_v57  ;;  %v3510_v61 = vsel %vm1960_vm1, %v3299_v24, %v3366_v25  ;;  %v6138_v32 = vld [vmem:[#allocation23_spill] sm:$0xff] }
 0x4d5   :  { %v3118_v60 = vrot.slane %v3117_v29, 2  ;;  %v3124_v11 = vadd.f32 %v3123_v54, %v3122_v20  ;;  %v3494_v56 = vsel %vm3344_vm7, %v5934_v1, %v3493_v4  ;;  %v3285_v38 = vsel %vm3273_vm2, %v6125_v16, %v6124_v59 }
 0x4d6   :  { %v2880_v42 = vrot.slane %v2879_v34, 1  ;;  %v2886_v45 = vadd.f32 %v2885_v35, %v2884_v18  ;;  %v3286_v27 = vsel %vm3275_vm3, %v6126_v41, %v3285_v38  ;;  %v3352_v23 = vsel %vm3340_vm5, %v6128_v44, %v6127_v58  ;;  %v3825_v18 = vld [vmem:[%s6075_s6] ss:$0 sm:$0xff]  ;;  %s4415_s6 = smov [#allocation7]  }
 0x4d7   :  { %v3119_v2 = vadd.f32 %v3118_v60, %v3117_v29  ;;  %v3125_v50 = vrot.slane %v3124_v11, 2  ;;  %v3287_v8 = vsel %vm3277_vm4, %v6129_v3, %v3286_v27  ;;  %v3353_v1 = vsel %vm3342_vm6, %v6130_v33, %v3352_v23  ;;  %s3732_s1 = sshll.u32 %s4415_s6, 4  ;;  %s3733_s1 = int_to_ptr.vmem [resolvable:$true] %s3732_s1 }
 0x4d8   :  { %v2881_v17 = vadd.f32 %v2880_v42, %v2879_v34  ;;  %v2887_v46 = vrot.slane %v2886_v45, 1  ;;  %v3354_v47 = vsel %vm3344_vm7, %v6131_v39, %v3353_v1  ;;  %v3416_v28 = vsel %vm3273_vm2, %v6133_v12, %v6132_v48  ;;  %s4374_s13 = scalar_lea.vmem %s3733_s1, 2048  ;;  %p4379_p3 = scmp.lt.s32.totalorder %s3733_s1, %s3733_s1 }
 0x4d9   :  { %v3120_v36 = vrot.slane %v3119_v2, 1  ;;  %v3126_v6 = vadd.f32 %v3125_v50, %v3124_v11  ;;  %v3428_v53 = vsel %vm3273_vm2, %v6135_v55, %v6134_v5  ;;  %v3417_v21 = vsel %vm3275_vm3, %v6136_v30, %v3416_v28  ;;  %p4375_p2 = scmp.ne.s32.totalorder %s3733_s1, %s4374_s13  ;;  %p4380_p4 = scmp.lt.s32.totalorder %s4374_s13, %s4374_s13 }
 0x4da   :  { %v2888_v13 = vadd.f32 %v2887_v46, %v2886_v45  ;;  %v3429_v15 = vsel %vm3275_vm3, %v2881_v17, %v3428_v53  ;;  %v3418_v62 = vsel %vm3277_vm4, %v6137_v43, %v3417_v21  ;;  %v3506_v40 = vsel %vm1960_vm1, %v3287_v8, %v3354_v47 }
 0x4db   :  { %v3121_v22 = vadd.f32 %v3120_v36, %v3119_v2  ;;  %v3127_v52 = vrot.slane %v3126_v6, 1  ;;  %v3480_v14 = vsel %vm3340_vm5, %v6139_v49, %v6138_v32  ;;  %p4381_p5 = por %p4380_p4, %p4379_p3 }
 0x4dc   :  { %v3430_v10 = vsel %vm3277_vm4, %v2888_v13, %v3429_v15 }
 0x4dd   :  { %v3128_v31 = vadd.f32 %v3127_v52, %v3126_v6  ;;  %v3518_v26 = vsel %vm1960_vm1, %v3430_v10, %v3494_v56  ;;  %v3481_v37 = vsel %vm3342_vm6, %v3121_v22, %v3480_v14  ;;  %p4382_p6 = pnand %p4381_p5, %p4375_p2 }
 0x4de   :  { %v3526_v63 = vpack.c.bf16 %v3518_v26, %v3510_v61 }
 0x4df   :  { %v3482_v51 = vsel %vm3344_vm7, %v3128_v31, %v3481_v37 }
 0x4e0   :  { %4095 = vmatmul.mubr.bf16.gmra.mrb[68].mxu1 %v3526_v63  ;;  %v3514_v0 = vsel %vm1960_vm1, %v3418_v62, %v3482_v51 }
 0x4e1   :  { %v3522_v7 = vpack.c.bf16 %v3514_v0, %v3506_v40 }
 0x4e3   :  { %4087 = vmatmul.mubr.bf16.gmra.mrb[68].mxu0 %v3522_v7 }
 0x4fe   :  { %v4084_v20 = vpop.f32.mrb[64].mxu0 }
 0x4ff   :  { %v3697_v19 = vadd.f32 %v4084_v20, %v3825_v18  ;;  %v3625_v24 = vpop.f32.mrb[65].mxu0 }
 0x500   :  { %v3695_v29 = vadd.f32 %v3825_v18, %v3625_v24  ;;  %v4085_v54 = vpop.f32.mrb[66].mxu0 }
 0x501   :  { %3713 = vst [vmem:[#allocation7 + $0x10] sm:$0xff] %v3697_v19  ;;  %v3698_v25 = vadd.f32 %v4085_v54, %v3825_v18  ;;  %v3628_v57 = vpop.f32.mrb[67].mxu0 }
 0x502   :  { %3711 = vst [vmem:[#allocation7] sm:$0xff] %v3695_v29  ;;  %v3696_v34 = vadd.f32 %v3825_v18, %v3628_v57 }
 0x503   :  { %3714 = vst [vmem:[#allocation7 + $0x18] sm:$0xff] %v3698_v25 }
 0x504   :  { %3712 = vst [vmem:[#allocation7 + $0x8] sm:$0xff] %v3696_v34 }
 0x588   :  { %v4092_v35 = vpop.f32.mrb[64].mxu1 }
 0x589   :  { %v3705_v9 = vadd.f32 %v4092_v35, %v3825_v18  ;;  %v3657_v4 = vpop.f32.mrb[65].mxu1 }
 0x58a   :  { %v3703_v61 = vadd.f32 %v3825_v18, %v3657_v4  ;;  %v4093_v60 = vpop.f32.mrb[66].mxu1 }
 0x58b   :  { %3721 = vst [vmem:[#allocation7 + $0x50] sm:$0xff] %v3705_v9  ;;  %v3706_v11 = vadd.f32 %v4093_v60, %v3825_v18  ;;  %v3660_v56 = vpop.f32.mrb[67].mxu1 }
 0x58c   :  { %3719 = vst [vmem:[#allocation7 + $0x40] sm:$0xff] %v3703_v61  ;;  %v3704_v59 = vadd.f32 %v3825_v18, %v3660_v56 }
 0x58d   :  { %3722 = vst [vmem:[#allocation7 + $0x58] sm:$0xff] %v3706_v11 }
 0x58e   :  { %3720 = vst [vmem:[#allocation7 + $0x48] sm:$0xff] %v3704_v59 }
 0x5b3   :  { %v4096_v16 = vpop.f32.mrb[68].mxu1 }
 0x5b4   :  { %v3709_v38 = vadd.f32 %v4096_v16, %v3825_v18  ;;  %v3673_v42 = vpop.f32.mrb[69].mxu1 }
 0x5b5   :  { %v3707_v45 = vadd.f32 %v3825_v18, %v3673_v42  ;;  %v4097_v41 = vpop.f32.mrb[70].mxu1 }
 0x5b6   :  { %3725 = vst [vmem:[#allocation7 + $0x70] sm:$0xff] %v3709_v38  ;;  %v3710_v27 = vadd.f32 %v4097_v41, %v3825_v18  ;;  %v3676_v58 = vpop.f32.mrb[71].mxu1  ;;  %v4088_v44 = vpop.f32.mrb[68].mxu0 }
 0x5b7   :  { %3723 = vst [vmem:[#allocation7 + $0x60] sm:$0xff] %v3707_v45  ;;  %v3708_v23 = vadd.f32 %v3825_v18, %v3676_v58  ;;  %v3701_v2 = vadd.f32 %v4088_v44, %v3825_v18  ;;  %v3641_v50 = vpop.f32.mrb[69].mxu0 }
 0x5b8   :  { %3726 = vst [vmem:[#allocation7 + $0x78] sm:$0xff] %v3710_v27  ;;  %v3699_v3 = vadd.f32 %v3825_v18, %v3641_v50  ;;  %v4089_v8 = vpop.f32.mrb[70].mxu0 }
 0x5b9   :  { %3724 = vst [vmem:[#allocation7 + $0x68] sm:$0xff] %v3708_v23  ;;  %3717 = vst [vmem:[#allocation7 + $0x30] sm:$0xff] %v3701_v2  ;;  %v3702_v33 = vadd.f32 %v4089_v8, %v3825_v18  ;;  %v3644_v1 = vpop.f32.mrb[71].mxu0 }
 0x5ba   :  { %3715 = vst [vmem:[#allocation7 + $0x20] sm:$0xff] %v3699_v3  ;;  %v3700_v17 = vadd.f32 %v3825_v18, %v3644_v1 }
 0x5bb   :  { %3718 = vst [vmem:[#allocation7 + $0x38] sm:$0xff] %v3702_v33 }
 0x5bc   :  { %3716 = vst [vmem:[#allocation7 + $0x28] sm:$0xff] %v3700_v17 }
 0x5bd   :  { %4385 = shalt.err (!%p4382_p6)
}
 0x5be   :  { %s4386_s16 = scalar_lea.hbm %s6076_s7, 2048 }
 0x5bf   :  { %p4387_p7 = scmp.ne.s32.totalorder %s6076_s7, %s4386_s16  ;;  %p4390_p8 = scmp.lt.u32.totalorder %s4386_s16, %s6076_s7 }
 0x5c1   :  { %p4392_p9 = pnand %p4390_p8, %p4387_p7 }
 0x5c3   :  { %4395 = shalt.err (!%p4392_p9)
}
 0x5c4   :  { %s4416_s21 = smov 128   ;;  %s4417_s22 = smov 8  }
 0x5c5   :  { %3738 = dma.vmem_to_hbm [thread:$0]  %s3733_s1, 2048, %s6076_s7, [#allocation4], %s4416_s21, %s4416_s21, %s4417_s22  }
 0x5c6   :  { %4400 = dma.done.wait [#allocation4], 2048  }
 0x5c7   :  { %4401 = vsyncadd [#allocation4], 4294965248 }
 0x5c8   :  { %3742 = vsyncpa [#allocation3], 1 }
 0x5c9   :  { %3743 = vsyncpa [#allocation6], 1 }
 0x5ca   :  { %3744 = vsyncpa [#allocation4], 1 }

</bundles_post_ra>
